<compile_context>
chip_gen: v6e
topology: v6e:2x2x1
jax: 0.10.0
libtpu: 0.0.40
codegen_flags: <defaults>
</compile_context>

<pallas_src>
import functools

import jax
import jax.numpy as jnp
from jax.experimental import pallas as pl
from jax.experimental.pallas import tpu as pltpu


# ----------------------------------------------------------------------------
# Generation-aware knobs
# ----------------------------------------------------------------------------
def _select_vmem_budgets():
    """(tile_bytes_budget, vmem_limit_bytes) based on the part's VMEM size."""
    vmem_cap = None
    try:
        info = pltpu.get_tpu_info()
        for name in ("vmem_capacity_bytes", "vmem_size_bytes", "vmem_bytes"):
            v = getattr(info, name, None)
            if v:
                vmem_cap = int(v)
                break
    except Exception:
        vmem_cap = None
    if vmem_cap is None or vmem_cap <= 0:
        vmem_cap = 64 * 1024 * 1024          # conservative (v7x per-core VMEM)
    if vmem_cap >= 100 * 1024 * 1024:        # 128-MiB parts (v5e / v6e)
        return 24 * 1024 * 1024, 96 * 1024 * 1024
    return 8 * 1024 * 1024, 44 * 1024 * 1024


def _select_compute_dtype():
    """bf16 elementwise on parts with a bf16 VPU (v6e/v7x); f32 on v5e/older."""
    try:
        kind = jax.devices()[0].device_kind.lower()
    except Exception:
        return jnp.float32
    if ("v6" in kind) or ("v7" in kind) or ("tpu7" in kind):
        return jnp.bfloat16
    return jnp.float32


_TILE_BYTES_BUDGET, _VMEM_LIMIT_BYTES = _select_vmem_budgets()
_COMPUTE_DTYPE = _select_compute_dtype()


def _round_up(x, m):
    return ((x + m - 1) // m) * m


def _choose_spatial_tile(S, C, feat_itemsize, cdt_itemsize, budget_bytes):
    """Largest 128-multiple spatial tile whose true VMEM footprint fits budget."""
    # Per-lane footprint:
    #   2 inputs x 2 pipeline buffers of (C, ts) features
    # + ~4 live (C, ts) temporaries in compute dtype (f*f, u0, u1, d2)
    # + a handful of (1, ts) f32 vectors (norms, reciprocals, accumulator).
    per_lane = 2 * 2 * C * feat_itemsize + 4 * C * cdt_itemsize + 8 * 4
    cap = max(128, (budget_bytes // per_lane) // 128 * 128)
    s128 = _round_up(S, 128)
    if s128 <= cap:
        return int(s128)
    # Prefer a tile that divides the 128-padded extent (no extra padding),
    # otherwise take the largest tile under the cap and pad the remainder.
    ts = cap
    while ts >= 128 and s128 % ts:
        ts -= 128
    if ts >= 128 and ts >= cap // 2:
        return int(ts)
    return int(cap)


# ----------------------------------------------------------------------------
# Fused LPIPS layer kernel
#   normalize_tensor(f0/f1) -> (diff)^2 -> 1x1 conv (C -> 1, no bias)
#   -> spatial mean, accumulated across spatial tiles.
# Grid: (N, n_split, S_pad // (n_split*ts)); batch + split axes are "parallel"
# (megacore sharding), the spatial axis is the reduction ("arbitrary").
# ----------------------------------------------------------------------------
def _lpips_layer_kernel(f0_ref, f1_ref, w_ref, o_ref, acc_ref, *, inv_s, cdt):
    s = pl.program_id(2)

    @pl.when(s == 0)
    def _():
        acc_ref[...] = jnp.zeros_like(acc_ref)

    eps = 1e-10
    f0 = f0_ref[...].astype(cdt)                       # (C, ts)
    f1 = f1_ref[...].astype(cdt)
    C = f0.shape[0]
    ones_c = jnp.ones((1, C), cdt)

    # Channel sum-of-squares on the MXU (f32 accumulation); VPU only does f*f.
    nsq0 = jnp.dot(ones_c, f0 * f0, preferred_element_type=jnp.float32)  # (1,ts)
    nsq1 = jnp.dot(ones_c, f1 * f1, preferred_element_type=jnp.float32)

    # normalize_tensor: eps added to the norm (outside the sqrt), matching the
    # PyTorch reference; one reciprocal per pixel, EUP slot, approximated.
    inv0 = pl.reciprocal(jnp.sqrt(nsq0) + eps, approx=True)              # f32
    inv1 = pl.reciprocal(jnp.sqrt(nsq1) + eps, approx=True)

    u0 = f0 * inv0.astype(cdt)
    u1 = f1 * inv1.astype(cdt)
    d2 = u0 - u1
    d2 = d2 * d2                                                          # (C,ts)

    # NetLinLayer 1x1 conv (C -> 1, no bias) as an MXU dot; accumulate the
    # per-lane partial sums -- no cross-lane reduce per tile.
    acc_ref[...] += jnp.dot(w_ref[...], d2, preferred_element_type=jnp.float32)

    @pl.when(s == pl.num_programs(2) - 1)
    def _():
        # spatial_average: one cross-lane reduce + 1/S per (batch, split).
        o_ref[...] = jnp.sum(acc_ref[...], axis=-1, keepdims=True) * inv_s


def lpips_layer_score(f0, f1, lin_w):
    """f0, f1: (N, C, H, W); lin_w: (1, C, 1, 1).  Returns (N, 1, 1, 1) f32."""
    N, C, H, W = f0.shape
    S = H * W
    feat_itemsize = jnp.dtype(f0.dtype).itemsize
    cdt_itemsize = jnp.dtype(_COMPUTE_DTYPE).itemsize
    ts = _choose_spatial_tile(S, C, feat_itemsize, cdt_itemsize,
                              _TILE_BYTES_BUDGET)

    steps_total = -(-S // ts)                       # cdiv
    # Split the spatial reduction across two cores when batch alone cannot
    # keep both v7x TensorCores busy.
    n_split = 2 if (N % 2 == 1 and steps_total >= 2) else 1
    steps_total = _round_up(steps_total, n_split)
    S_pad = steps_total * ts
    steps = steps_total // n_split

    f0r = f0.reshape(N, C, S)
    f1r = f1.reshape(N, C, S)
    if S_pad != S:
        # Zero padding is exact: padded pixels give diff 0 and the mean below
        # divides by the true S.
        pad = ((0, 0), (0, 0), (0, S_pad - S))
        f0r = jnp.pad(f0r, pad)
        f1r = jnp.pad(f1r, pad)

    w2 = lin_w.reshape(1, C).astype(_COMPUTE_DTYPE)

    kernel = functools.partial(_lpips_layer_kernel, inv_s=1.0 / S,
                               cdt=_COMPUTE_DTYPE)
    cost = pl.CostEstimate(
        flops=16 * N * C * S_pad,
        transcendentals=4 * N * S_pad,
        bytes_accessed=2 * N * C * S_pad * feat_itemsize + C * cdt_itemsize
        + N * n_split * 4,
    )

    def _feat_map(n, p, s):
        return (n, 0, p * steps + s)

    out = pl.pallas_call(
        kernel,
        out_shape=jax.ShapeDtypeStruct((N, n_split, 1, 1), jnp.float32),
        grid_spec=pltpu.PrefetchScalarGridSpec(
            num_scalar_prefetch=0,
            grid=(N, n_split, steps),
            in_specs=[
                pl.BlockSpec((None, C, ts), _feat_map),       # f0 -> (C, ts)
                pl.BlockSpec((None, C, ts), _feat_map),       # f1 -> (C, ts)
                pl.BlockSpec((1, C), lambda n, p, s: (0, 0)),  # w  -> (1, C)
            ],
            out_specs=pl.BlockSpec((None, None, 1, 1),
                                   lambda n, p, s: (n, p, 0, 0)),
            scratch_shapes=[pltpu.VMEM((1, ts), jnp.float32)],
        ),
        compiler_params=pltpu.CompilerParams(
            dimension_semantics=("parallel", "parallel", "arbitrary"),
            vmem_limit_bytes=_VMEM_LIMIT_BYTES,
        ),
        cost_estimate=cost,
    )(f0r, f1r, w2)

    return jnp.sum(out, axis=1).reshape(N, 1, 1, 1)


# ----------------------------------------------------------------------------
# ScalingLayer: trivial elementwise op -- left to XLA so it fuses with the
# first backbone conv (no extra full-tensor HBM round trip / kernel launch).
# ----------------------------------------------------------------------------
SHIFT = jnp.array([-0.030, -0.088, -0.188], jnp.float32)
SCALE = jnp.array([0.458, 0.448, 0.450], jnp.float32)


def scaling_layer(x, shift, scale):
    inv_scale = (1.0 / scale).reshape(1, -1, 1, 1)
    return (x - shift.reshape(1, -1, 1, 1)) * inv_scale


# ----------------------------------------------------------------------------
# Surrogate backbone (plain JAX glue; stands in for pretrained pn.vgg16).
# Feature maps are stored in bf16 to halve HBM traffic for the LPIPS kernels.
# ----------------------------------------------------------------------------
VGG_CHNS = [64, 128, 256, 512, 512]


def surrogate_backbone(x, conv_ws):
    """NCHW input -> list of 5 bf16 feature maps with channel counts VGG_CHNS."""
    feats = []
    for i, w in enumerate(conv_ws):
        stride = 1 if i == 0 else 2
        x = jax.lax.conv_general_dilated(
            x, w, window_strides=(stride, stride), padding="SAME",
            dimension_numbers=("NCHW", "OIHW", "NCHW"))
        x = jax.nn.relu(x)
        feats.append(x.astype(jnp.bfloat16))
    return feats


def init_params(key):
    chns = VGG_CHNS
    n_layers = len(chns)
    keys = jax.random.split(key, 2 * n_layers)
    conv_ws, lin_ws = [], []
    in_c = 3
    for i, c in enumerate(chns):
        conv_ws.append(
            0.05 * jax.random.normal(keys[i], (c, in_c, 3, 3), jnp.float32))
        # NetLinLayer: Conv2d(chn_in=c, chn_out=1, kernel=1x1, bias=False)
        lin_ws.append(
            jnp.abs(jax.random.normal(keys[n_layers + i], (1, c, 1, 1),
                                      jnp.float32)) * 0.1)
        in_c = c
    return {"backbone": conv_ws, "lins": lin_ws}


# ----------------------------------------------------------------------------
# PNetLin forward (lpips=True, spatial=False, version='0.1')
# ----------------------------------------------------------------------------
@jax.jit
def pnetlin_forward(in0, in1, params):
    in0_input = scaling_layer(in0, SHIFT, SCALE)
    in1_input = scaling_layer(in1, SHIFT, SCALE)

    outs0 = surrogate_backbone(in0_input, params["backbone"])
    outs1 = surrogate_backbone(in1_input, params["backbone"])

    val = None
    for kk in range(len(VGG_CHNS)):
        res_kk = lpips_layer_score(outs0[kk], outs1[kk], params["lins"][kk])
        val = res_kk if val is None else val + res_kk
    return val  # (N, 1, 1, 1), matching spatial_average(..., keepdim=True)


# ----------------------------------------------------------------------------
# Pure-JAX f32 reference (same surrogate backbone / bf16 feature maps) used to
# validate the bf16 + approx-reciprocal kernel path with a loose tolerance.
# ----------------------------------------------------------------------------
def _lpips_reference(outs0, outs1, lin_ws):
    val = None
    for f0, f1, w in zip(outs0, outs1, lin_ws):
        f0 = f0.astype(jnp.float32)
        f1 = f1.astype(jnp.float32)
        n0 = jnp.sqrt(jnp.sum(f0 * f0, axis=1, keepdims=True))
        n1 = jnp.sqrt(jnp.sum(f1 * f1, axis=1, keepdims=True))
        d = (f0 / (n0 + 1e-10) - f1 / (n1 + 1e-10)) ** 2
        r = jnp.sum(d * w.reshape(1, -1, 1, 1), axis=1, keepdims=True)
        r = jnp.mean(r, axis=(2, 3), keepdims=True)
        val = r if val is None else val + r
    return val


@jax.jit
def pnetlin_reference(in0, in1, params):
    x0 = scaling_layer(in0, SHIFT, SCALE)
    x1 = scaling_layer(in1, SHIFT, SCALE)
    return _lpips_reference(surrogate_backbone(x0, params["backbone"]),
                            surrogate_backbone(x1, params["backbone"]),
                            params["lins"])


if __name__ == "__main__":
    key = jax.random.PRNGKey(0)
    k_p, k0, k1, k2, k3 = jax.random.split(key, 5)

    params = init_params(k_p)

    # Small canonical test (even batch, tiny spatial).
    in0 = jax.random.uniform(k0, (2, 3, 16, 16), jnp.float32, -1.0, 1.0)
    in1 = jax.random.uniform(k1, (2, 3, 16, 16), jnp.float32, -1.0, 1.0)
    val = pnetlin_forward(in0, in1, params)
    jax.block_until_ready(val)
    assert val.shape == (2, 1, 1, 1), val.shape
    assert bool(jnp.all(jnp.isfinite(val)))
    ref = pnetlin_reference(in0, in1, params)
    rel = float(jnp.max(jnp.abs(val - ref) / (jnp.abs(ref) + 1e-6)))
    assert rel < 0.1, f"kernel vs reference relative error too large: {rel}"

    # Odd-batch, larger spatial test: exercises zero-padding and (on parts
    # with small tile budgets) the two-way spatial split across TensorCores.
    in0b = jax.random.uniform(k2, (1, 3, 128, 128), jnp.float32, -1.0, 1.0)
    in1b = jax.random.uniform(k3, (1, 3, 128, 128), jnp.float32, -1.0, 1.0)
    valb = pnetlin_forward(in0b, in1b, params)
    jax.block_until_ready(valb)
    assert valb.shape == (1, 1, 1, 1), valb.shape
    assert bool(jnp.all(jnp.isfinite(valb)))
    refb = pnetlin_reference(in0b, in1b, params)
    relb = float(jnp.max(jnp.abs(valb - refb) / (jnp.abs(refb) + 1e-6)))
    assert relb < 0.1, f"kernel vs reference relative error too large: {relb}"

    print("KERNEL_OK")
</pallas_src>

<mosaic_0001>
module attributes {stable_mosaic.version = 11 : i64} {
  func.func @_lpips_layer_kernel(%arg0: i32, %arg1: i32, %arg2: i32, %arg3: memref<1x128x128xbf16, #tpu.memory_space<vmem>>, %arg4: memref<1x128x128xbf16, #tpu.memory_space<vmem>>, %arg5: memref<1x128xf32, #tpu.memory_space<vmem>>, %arg6: memref<1x1x1x1xf32, #tpu.memory_space<vmem>>, %arg7: memref<1x128xf32, #tpu.memory_space<vmem>>) attributes {dimension_semantics = [#tpu.dimension_semantics<parallel>, #tpu.dimension_semantics<parallel>, #tpu.dimension_semantics<arbitrary>], iteration_bounds = array<i64: 2, 1, 1>, scalar_prefetch = 0 : i64, scratch_operands = 1 : i64, tpu.core_type = #tpu.core_type<tc>, window_params = [{transform_indices = @transform_0, window_bounds = array<i64: 1, 128, 128>}, {transform_indices = @transform_1, window_bounds = array<i64: 1, 128, 128>}, {pipeline_mode = #tpu.pipeline_mode<synchronous>, transform_indices = @transform_2, window_bounds = array<i64: 1, 128>}, {transform_indices = @transform_3, window_bounds = array<i64: 1, 1, 1, 1>}]} {
    %c0_i32 = arith.constant 0 : i32
    %0 = arith.cmpi eq, %arg2, %c0_i32 : i32
    %1 = arith.extui %0 : i1 to i32
    %c0_i32_0 = arith.constant 0 : i32
    %2 = arith.cmpi ne, %1, %c0_i32_0 : i32
    scf.if %2 {
      %cst_19 = arith.constant 0.000000e+00 : f32
      %36 = vector.broadcast %cst_19 : f32 to vector<1x128xf32>
      %c0_20 = arith.constant 0 : index
      %c0_21 = arith.constant 0 : index
      %37 = vector.load %arg7[%c0_20, %c0_21] : memref<1x128xf32, #tpu.memory_space<vmem>>, vector<1x128xf32>
      tpu.vector_store %arg7[%c0_20, %c0_21], %36 {strides = array<i32>} : memref<1x128xf32, #tpu.memory_space<vmem>>, vector<1x128xf32>,
    } else {
    }
    %c0 = arith.constant 0 : index
    %c0_1 = arith.constant 0 : index
    %c0_2 = arith.constant 0 : index
    %3 = vector.load %arg3[%c0, %c0_1, %c0_2] : memref<1x128x128xbf16, #tpu.memory_space<vmem>>, vector<1x128x128xbf16>
    %4 = vector.shape_cast %3 : vector<1x128x128xbf16> to vector<128x128xbf16>
    %5 = arith.extf %4 : vector<128x128xbf16> to vector<128x128xf32>
    %c0_3 = arith.constant 0 : index
    %c0_4 = arith.constant 0 : index
    %c0_5 = arith.constant 0 : index
    %6 = vector.load %arg4[%c0_3, %c0_4, %c0_5] : memref<1x128x128xbf16, #tpu.memory_space<vmem>>, vector<1x128x128xbf16>
    %7 = vector.shape_cast %6 : vector<1x128x128xbf16> to vector<128x128xbf16>
    %8 = arith.extf %7 : vector<128x128xbf16> to vector<128x128xf32>
    %cst = arith.constant 1.000000e+00 : f32
    %9 = vector.broadcast %cst : f32 to vector<1x128xf32>
    %10 = arith.mulf %5, %5 : vector<128x128xf32>
    %cst_6 = arith.constant dense<0.000000e+00> : vector<1x128xf32>
    %11 = tpu.matmul %9, %10, %cst_6 {dimension_numbers = #tpu.dot_dimension_numbers<[1], [0], [0], [1], [0, 0, 1, 1], [], []>} : vector<1x128xf32>, vector<128x128xf32>, vector<1x128xf32> -> vector<1x128xf32>
    %12 = arith.mulf %8, %8 : vector<128x128xf32>
    %cst_7 = arith.constant dense<0.000000e+00> : vector<1x128xf32>
    %13 = tpu.matmul %9, %12, %cst_7 {dimension_numbers = #tpu.dot_dimension_numbers<[1], [0], [0], [1], [0, 0, 1, 1], [], []>} : vector<1x128xf32>, vector<128x128xf32>, vector<1x128xf32> -> vector<1x128xf32>
    %14 = math.sqrt %11 : vector<1x128xf32>
    %cst_8 = arith.constant 1.000000e-10 : f32
    %15 = vector.broadcast %cst_8 : f32 to vector<1x128xf32>
    %16 = arith.addf %14, %15 : vector<1x128xf32>
    %17 = tpu.reciprocal %16 {approx = true} : vector<1x128xf32> -> vector<1x128xf32>
    %18 = math.sqrt %13 : vector<1x128xf32>
    %cst_9 = arith.constant 1.000000e-10 : f32
    %19 = vector.broadcast %cst_9 : f32 to vector<1x128xf32>
    %20 = arith.addf %18, %19 : vector<1x128xf32>
    %21 = tpu.reciprocal %20 {approx = true} : vector<1x128xf32> -> vector<1x128xf32>
    %22 = vector.broadcast %17 : vector<1x128xf32> to vector<128x128xf32>
    %23 = arith.mulf %5, %22 : vector<128x128xf32>
    %24 = vector.broadcast %21 : vector<1x128xf32> to vector<128x128xf32>
    %25 = arith.mulf %8, %24 : vector<128x128xf32>
    %26 = arith.subf %23, %25 : vector<128x128xf32>
    %27 = arith.mulf %26, %26 : vector<128x128xf32>
    %c0_10 = arith.constant 0 : index
    %c0_11 = arith.constant 0 : index
    %28 = vector.load %arg7[%c0_10, %c0_11] : memref<1x128xf32, #tpu.memory_space<vmem>>, vector<1x128xf32>
    %c0_12 = arith.constant 0 : index
    %c0_13 = arith.constant 0 : index
    %29 = vector.load %arg5[%c0_12, %c0_13] : memref<1x128xf32, #tpu.memory_space<vmem>>, vector<1x128xf32>
    %cst_14 = arith.constant dense<0.000000e+00> : vector<1x128xf32>
    %30 = tpu.matmul %29, %27, %cst_14 {dimension_numbers = #tpu.dot_dimension_numbers<[1], [0], [0], [1], [0, 0, 1, 1], [], []>} : vector<1x128xf32>, vector<128x128xf32>, vector<1x128xf32> -> vector<1x128xf32>
    %31 = arith.addf %28, %30 : vector<1x128xf32>
    %c0_15 = arith.constant 0 : index
    %c0_16 = arith.constant 0 : index
    %32 = vector.load %arg7[%c0_15, %c0_16] : memref<1x128xf32, #tpu.memory_space<vmem>>, vector<1x128xf32>
    tpu.vector_store %arg7[%c0_15, %c0_16], %31 {strides = array<i32>} : memref<1x128xf32, #tpu.memory_space<vmem>>, vector<1x128xf32>,
    %c0_i32_17 = arith.constant 0 : i32
    %33 = arith.cmpi eq, %arg2, %c0_i32_17 : i32
    %34 = arith.extui %33 : i1 to i32
    %c0_i32_18 = arith.constant 0 : i32
    %35 = arith.cmpi ne, %34, %c0_i32_18 : i32
    scf.if %35 {
      %c0_19 = arith.constant 0 : index
      %c0_20 = arith.constant 0 : index
      %36 = vector.load %arg7[%c0_19, %c0_20] : memref<1x128xf32, #tpu.memory_space<vmem>>, vector<1x128xf32>
      %cst_21 = arith.constant dense<0.000000e+00> : vector<1xf32>
      %37 = vector.multi_reduction <add>, %36, %cst_21 [1] : vector<1x128xf32> to vector<1xf32>
      %38 = vector.shape_cast %37 : vector<1xf32> to vector<1x1xf32>
      %cst_22 = arith.constant 1.562500e-02 : f32
      %39 = vector.broadcast %cst_22 : f32 to vector<1x1xf32>
      %40 = arith.mulf %38, %39 : vector<1x1xf32>
      %c0_23 = arith.constant 0 : index
      %c0_24 = arith.constant 0 : index
      %c0_25 = arith.constant 0 : index
      %c0_26 = arith.constant 0 : index
      %41 = vector.load %arg6[%c0_23, %c0_24, %c0_25, %c0_26] : memref<1x1x1x1xf32, #tpu.memory_space<vmem>>, vector<1x1x1x1xf32>
      %42 = vector.shape_cast %41 : vector<1x1x1x1xf32> to vector<1x1xf32>
      %43 = vector.shape_cast %40 : vector<1x1xf32> to vector<1x1x1x1xf32>
      tpu.vector_store %arg6[%c0_23, %c0_24, %c0_25, %c0_26], %43 {strides = array<i32>} : memref<1x1x1x1xf32, #tpu.memory_space<vmem>>, vector<1x1x1x1xf32>,
    } else {
    }
    return
  }
  func.func @transform_0(%arg0: i32, %arg1: i32, %arg2: i32) -> (i32, i32, i32) {
    %c1_i32 = arith.constant 1 : i32
    %0 = arith.muli %arg1, %c1_i32 : i32
    %1 = arith.addi %0, %arg2 : i32
    %c0_i32 = arith.constant 0 : i32
    %c0_i32_0 = arith.constant 0 : i32
    return %arg0, %c0_i32, %1 : i32, i32, i32
  }
  func.func @transform_1(%arg0: i32, %arg1: i32, %arg2: i32) -> (i32, i32, i32) {
    %c1_i32 = arith.constant 1 : i32
    %0 = arith.muli %arg1, %c1_i32 : i32
    %1 = arith.addi %0, %arg2 : i32
    %c0_i32 = arith.constant 0 : i32
    %c0_i32_0 = arith.constant 0 : i32
    return %arg0, %c0_i32, %1 : i32, i32, i32
  }
  func.func @transform_2(%arg0: i32, %arg1: i32, %arg2: i32) -> (i32, i32) {
    %c0_i32 = arith.constant 0 : i32
    %c0_i32_0 = arith.constant 0 : i32
    %c0_i32_1 = arith.constant 0 : i32
    return %c0_i32, %c0_i32_0 : i32, i32
  }
  func.func @transform_3(%arg0: i32, %arg1: i32, %arg2: i32) -> (i32, i32, i32, i32) {
    %c0_i32 = arith.constant 0 : i32
    %c0_i32_0 = arith.constant 0 : i32
    %c0_i32_1 = arith.constant 0 : i32
    return %arg0, %arg1, %c0_i32, %c0_i32_0 : i32, i32, i32, i32
  }
}

module attributes {stable_mosaic.version = 11 : i64} {
  func.func @_lpips_layer_kernel(%arg0: i32, %arg1: i32, %arg2: i32, %arg3: memref<1x64x256xbf16, #tpu.memory_space<vmem>>, %arg4: memref<1x64x256xbf16, #tpu.memory_space<vmem>>, %arg5: memref<1x64xf32, #tpu.memory_space<vmem>>, %arg6: memref<1x1x1x1xf32, #tpu.memory_space<vmem>>, %arg7: memref<1x256xf32, #tpu.memory_space<vmem>>) attributes {dimension_semantics = [#tpu.dimension_semantics<parallel>, #tpu.dimension_semantics<parallel>, #tpu.dimension_semantics<arbitrary>], iteration_bounds = array<i64: 2, 1, 1>, scalar_prefetch = 0 : i64, scratch_operands = 1 : i64, tpu.core_type = #tpu.core_type<tc>, window_params = [{transform_indices = @transform_0, window_bounds = array<i64: 1, 64, 256>}, {transform_indices = @transform_1, window_bounds = array<i64: 1, 64, 256>}, {pipeline_mode = #tpu.pipeline_mode<synchronous>, transform_indices = @transform_2, window_bounds = array<i64: 1, 64>}, {transform_indices = @transform_3, window_bounds = array<i64: 1, 1, 1, 1>}]} {
    %c0_i32 = arith.constant 0 : i32
    %0 = arith.cmpi eq, %arg2, %c0_i32 : i32
    %1 = arith.extui %0 : i1 to i32
    %c0_i32_0 = arith.constant 0 : i32
    %2 = arith.cmpi ne, %1, %c0_i32_0 : i32
    scf.if %2 {
      %cst_19 = arith.constant 0.000000e+00 : f32
      %36 = vector.broadcast %cst_19 : f32 to vector<1x256xf32>
      %c0_20 = arith.constant 0 : index
      %c0_21 = arith.constant 0 : index
      %37 = vector.load %arg7[%c0_20, %c0_21] : memref<1x256xf32, #tpu.memory_space<vmem>>, vector<1x256xf32>
      tpu.vector_store %arg7[%c0_20, %c0_21], %36 {strides = array<i32>} : memref<1x256xf32, #tpu.memory_space<vmem>>, vector<1x256xf32>,
    } else {
    }
    %c0 = arith.constant 0 : index
    %c0_1 = arith.constant 0 : index
    %c0_2 = arith.constant 0 : index
    %3 = vector.load %arg3[%c0, %c0_1, %c0_2] : memref<1x64x256xbf16, #tpu.memory_space<vmem>>, vector<1x64x256xbf16>
    %4 = vector.shape_cast %3 : vector<1x64x256xbf16> to vector<64x256xbf16>
    %5 = arith.extf %4 : vector<64x256xbf16> to vector<64x256xf32>
    %c0_3 = arith.constant 0 : index
    %c0_4 = arith.constant 0 : index
    %c0_5 = arith.constant 0 : index
    %6 = vector.load %arg4[%c0_3, %c0_4, %c0_5] : memref<1x64x256xbf16, #tpu.memory_space<vmem>>, vector<1x64x256xbf16>
    %7 = vector.shape_cast %6 : vector<1x64x256xbf16> to vector<64x256xbf16>
    %8 = arith.extf %7 : vector<64x256xbf16> to vector<64x256xf32>
    %cst = arith.constant 1.000000e+00 : f32
    %9 = vector.broadcast %cst : f32 to vector<1x64xf32>
    %10 = arith.mulf %5, %5 : vector<64x256xf32>
    %cst_6 = arith.constant dense<0.000000e+00> : vector<1x256xf32>
    %11 = tpu.matmul %9, %10, %cst_6 {dimension_numbers = #tpu.dot_dimension_numbers<[1], [0], [0], [1], [0, 0, 1, 1], [], []>} : vector<1x64xf32>, vector<64x256xf32>, vector<1x256xf32> -> vector<1x256xf32>
    %12 = arith.mulf %8, %8 : vector<64x256xf32>
    %cst_7 = arith.constant dense<0.000000e+00> : vector<1x256xf32>
    %13 = tpu.matmul %9, %12, %cst_7 {dimension_numbers = #tpu.dot_dimension_numbers<[1], [0], [0], [1], [0, 0, 1, 1], [], []>} : vector<1x64xf32>, vector<64x256xf32>, vector<1x256xf32> -> vector<1x256xf32>
    %14 = math.sqrt %11 : vector<1x256xf32>
    %cst_8 = arith.constant 1.000000e-10 : f32
    %15 = vector.broadcast %cst_8 : f32 to vector<1x256xf32>
    %16 = arith.addf %14, %15 : vector<1x256xf32>
    %17 = tpu.reciprocal %16 {approx = true} : vector<1x256xf32> -> vector<1x256xf32>
    %18 = math.sqrt %13 : vector<1x256xf32>
    %cst_9 = arith.constant 1.000000e-10 : f32
    %19 = vector.broadcast %cst_9 : f32 to vector<1x256xf32>
    %20 = arith.addf %18, %19 : vector<1x256xf32>
    %21 = tpu.reciprocal %20 {approx = true} : vector<1x256xf32> -> vector<1x256xf32>
    %22 = vector.broadcast %17 : vector<1x256xf32> to vector<64x256xf32>
    %23 = arith.mulf %5, %22 : vector<64x256xf32>
    %24 = vector.broadcast %21 : vector<1x256xf32> to vector<64x256xf32>
    %25 = arith.mulf %8, %24 : vector<64x256xf32>
    %26 = arith.subf %23, %25 : vector<64x256xf32>
    %27 = arith.mulf %26, %26 : vector<64x256xf32>
    %c0_10 = arith.constant 0 : index
    %c0_11 = arith.constant 0 : index
    %28 = vector.load %arg7[%c0_10, %c0_11] : memref<1x256xf32, #tpu.memory_space<vmem>>, vector<1x256xf32>
    %c0_12 = arith.constant 0 : index
    %c0_13 = arith.constant 0 : index
    %29 = vector.load %arg5[%c0_12, %c0_13] : memref<1x64xf32, #tpu.memory_space<vmem>>, vector<1x64xf32>
    %cst_14 = arith.constant dense<0.000000e+00> : vector<1x256xf32>
    %30 = tpu.matmul %29, %27, %cst_14 {dimension_numbers = #tpu.dot_dimension_numbers<[1], [0], [0], [1], [0, 0, 1, 1], [], []>} : vector<1x64xf32>, vector<64x256xf32>, vector<1x256xf32> -> vector<1x256xf32>
    %31 = arith.addf %28, %30 : vector<1x256xf32>
    %c0_15 = arith.constant 0 : index
    %c0_16 = arith.constant 0 : index
    %32 = vector.load %arg7[%c0_15, %c0_16] : memref<1x256xf32, #tpu.memory_space<vmem>>, vector<1x256xf32>
    tpu.vector_store %arg7[%c0_15, %c0_16], %31 {strides = array<i32>} : memref<1x256xf32, #tpu.memory_space<vmem>>, vector<1x256xf32>,
    %c0_i32_17 = arith.constant 0 : i32
    %33 = arith.cmpi eq, %arg2, %c0_i32_17 : i32
    %34 = arith.extui %33 : i1 to i32
    %c0_i32_18 = arith.constant 0 : i32
    %35 = arith.cmpi ne, %34, %c0_i32_18 : i32
    scf.if %35 {
      %c0_19 = arith.constant 0 : index
      %c0_20 = arith.constant 0 : index
      %36 = vector.load %arg7[%c0_19, %c0_20] : memref<1x256xf32, #tpu.memory_space<vmem>>, vector<1x256xf32>
      %cst_21 = arith.constant dense<0.000000e+00> : vector<1xf32>
      %37 = vector.multi_reduction <add>, %36, %cst_21 [1] : vector<1x256xf32> to vector<1xf32>
      %38 = vector.shape_cast %37 : vector<1xf32> to vector<1x1xf32>
      %cst_22 = arith.constant 3.906250e-03 : f32
      %39 = vector.broadcast %cst_22 : f32 to vector<1x1xf32>
      %40 = arith.mulf %38, %39 : vector<1x1xf32>
      %c0_23 = arith.constant 0 : index
      %c0_24 = arith.constant 0 : index
      %c0_25 = arith.constant 0 : index
      %c0_26 = arith.constant 0 : index
      %41 = vector.load %arg6[%c0_23, %c0_24, %c0_25, %c0_26] : memref<1x1x1x1xf32, #tpu.memory_space<vmem>>, vector<1x1x1x1xf32>
      %42 = vector.shape_cast %41 : vector<1x1x1x1xf32> to vector<1x1xf32>
      %43 = vector.shape_cast %40 : vector<1x1xf32> to vector<1x1x1x1xf32>
      tpu.vector_store %arg6[%c0_23, %c0_24, %c0_25, %c0_26], %43 {strides = array<i32>} : memref<1x1x1x1xf32, #tpu.memory_space<vmem>>, vector<1x1x1x1xf32>,
    } else {
    }
    return
  }
  func.func @transform_0(%arg0: i32, %arg1: i32, %arg2: i32) -> (i32, i32, i32) {
    %c1_i32 = arith.constant 1 : i32
    %0 = arith.muli %arg1, %c1_i32 : i32
    %1 = arith.addi %0, %arg2 : i32
    %c0_i32 = arith.constant 0 : i32
    %c0_i32_0 = arith.constant 0 : i32
    return %arg0, %c0_i32, %1 : i32, i32, i32
  }
  func.func @transform_1(%arg0: i32, %arg1: i32, %arg2: i32) -> (i32, i32, i32) {
    %c1_i32 = arith.constant 1 : i32
    %0 = arith.muli %arg1, %c1_i32 : i32
    %1 = arith.addi %0, %arg2 : i32
    %c0_i32 = arith.constant 0 : i32
    %c0_i32_0 = arith.constant 0 : i32
    return %arg0, %c0_i32, %1 : i32, i32, i32
  }
  func.func @transform_2(%arg0: i32, %arg1: i32, %arg2: i32) -> (i32, i32) {
    %c0_i32 = arith.constant 0 : i32
    %c0_i32_0 = arith.constant 0 : i32
    %c0_i32_1 = arith.constant 0 : i32
    return %c0_i32, %c0_i32_0 : i32, i32
  }
  func.func @transform_3(%arg0: i32, %arg1: i32, %arg2: i32) -> (i32, i32, i32, i32) {
    %c0_i32 = arith.constant 0 : i32
    %c0_i32_0 = arith.constant 0 : i32
    %c0_i32_1 = arith.constant 0 : i32
    return %arg0, %arg1, %c0_i32, %c0_i32_0 : i32, i32, i32, i32
  }
}

module attributes {stable_mosaic.version = 11 : i64} {
  func.func @_lpips_layer_kernel(%arg0: i32, %arg1: i32, %arg2: i32, %arg3: memref<1x256x128xbf16, #tpu.memory_space<vmem>>, %arg4: memref<1x256x128xbf16, #tpu.memory_space<vmem>>, %arg5: memref<1x256xf32, #tpu.memory_space<vmem>>, %arg6: memref<1x1x1x1xf32, #tpu.memory_space<vmem>>, %arg7: memref<1x128xf32, #tpu.memory_space<vmem>>) attributes {dimension_semantics = [#tpu.dimension_semantics<parallel>, #tpu.dimension_semantics<parallel>, #tpu.dimension_semantics<arbitrary>], iteration_bounds = array<i64: 2, 1, 1>, scalar_prefetch = 0 : i64, scratch_operands = 1 : i64, tpu.core_type = #tpu.core_type<tc>, window_params = [{transform_indices = @transform_0, window_bounds = array<i64: 1, 256, 128>}, {transform_indices = @transform_1, window_bounds = array<i64: 1, 256, 128>}, {pipeline_mode = #tpu.pipeline_mode<synchronous>, transform_indices = @transform_2, window_bounds = array<i64: 1, 256>}, {transform_indices = @transform_3, window_bounds = array<i64: 1, 1, 1, 1>}]} {
    %c0_i32 = arith.constant 0 : i32
    %0 = arith.cmpi eq, %arg2, %c0_i32 : i32
    %1 = arith.extui %0 : i1 to i32
    %c0_i32_0 = arith.constant 0 : i32
    %2 = arith.cmpi ne, %1, %c0_i32_0 : i32
    scf.if %2 {
      %cst_19 = arith.constant 0.000000e+00 : f32
      %36 = vector.broadcast %cst_19 : f32 to vector<1x128xf32>
      %c0_20 = arith.constant 0 : index
      %c0_21 = arith.constant 0 : index
      %37 = vector.load %arg7[%c0_20, %c0_21] : memref<1x128xf32, #tpu.memory_space<vmem>>, vector<1x128xf32>
      tpu.vector_store %arg7[%c0_20, %c0_21], %36 {strides = array<i32>} : memref<1x128xf32, #tpu.memory_space<vmem>>, vector<1x128xf32>,
    } else {
    }
    %c0 = arith.constant 0 : index
    %c0_1 = arith.constant 0 : index
    %c0_2 = arith.constant 0 : index
    %3 = vector.load %arg3[%c0, %c0_1, %c0_2] : memref<1x256x128xbf16, #tpu.memory_space<vmem>>, vector<1x256x128xbf16>
    %4 = vector.shape_cast %3 : vector<1x256x128xbf16> to vector<256x128xbf16>
    %5 = arith.extf %4 : vector<256x128xbf16> to vector<256x128xf32>
    %c0_3 = arith.constant 0 : index
    %c0_4 = arith.constant 0 : index
    %c0_5 = arith.constant 0 : index
    %6 = vector.load %arg4[%c0_3, %c0_4, %c0_5] : memref<1x256x128xbf16, #tpu.memory_space<vmem>>, vector<1x256x128xbf16>
    %7 = vector.shape_cast %6 : vector<1x256x128xbf16> to vector<256x128xbf16>
    %8 = arith.extf %7 : vector<256x128xbf16> to vector<256x128xf32>
    %cst = arith.constant 1.000000e+00 : f32
    %9 = vector.broadcast %cst : f32 to vector<1x256xf32>
    %10 = arith.mulf %5, %5 : vector<256x128xf32>
    %cst_6 = arith.constant dense<0.000000e+00> : vector<1x128xf32>
    %11 = tpu.matmul %9, %10, %cst_6 {dimension_numbers = #tpu.dot_dimension_numbers<[1], [0], [0], [1], [0, 0, 1, 1], [], []>} : vector<1x256xf32>, vector<256x128xf32>, vector<1x128xf32> -> vector<1x128xf32>
    %12 = arith.mulf %8, %8 : vector<256x128xf32>
    %cst_7 = arith.constant dense<0.000000e+00> : vector<1x128xf32>
    %13 = tpu.matmul %9, %12, %cst_7 {dimension_numbers = #tpu.dot_dimension_numbers<[1], [0], [0], [1], [0, 0, 1, 1], [], []>} : vector<1x256xf32>, vector<256x128xf32>, vector<1x128xf32> -> vector<1x128xf32>
    %14 = math.sqrt %11 : vector<1x128xf32>
    %cst_8 = arith.constant 1.000000e-10 : f32
    %15 = vector.broadcast %cst_8 : f32 to vector<1x128xf32>
    %16 = arith.addf %14, %15 : vector<1x128xf32>
    %17 = tpu.reciprocal %16 {approx = true} : vector<1x128xf32> -> vector<1x128xf32>
    %18 = math.sqrt %13 : vector<1x128xf32>
    %cst_9 = arith.constant 1.000000e-10 : f32
    %19 = vector.broadcast %cst_9 : f32 to vector<1x128xf32>
    %20 = arith.addf %18, %19 : vector<1x128xf32>
    %21 = tpu.reciprocal %20 {approx = true} : vector<1x128xf32> -> vector<1x128xf32>
    %22 = vector.broadcast %17 : vector<1x128xf32> to vector<256x128xf32>
    %23 = arith.mulf %5, %22 : vector<256x128xf32>
    %24 = vector.broadcast %21 : vector<1x128xf32> to vector<256x128xf32>
    %25 = arith.mulf %8, %24 : vector<256x128xf32>
    %26 = arith.subf %23, %25 : vector<256x128xf32>
    %27 = arith.mulf %26, %26 : vector<256x128xf32>
    %c0_10 = arith.constant 0 : index
    %c0_11 = arith.constant 0 : index
    %28 = vector.load %arg7[%c0_10, %c0_11] : memref<1x128xf32, #tpu.memory_space<vmem>>, vector<1x128xf32>
    %c0_12 = arith.constant 0 : index
    %c0_13 = arith.constant 0 : index
    %29 = vector.load %arg5[%c0_12, %c0_13] : memref<1x256xf32, #tpu.memory_space<vmem>>, vector<1x256xf32>
    %cst_14 = arith.constant dense<0.000000e+00> : vector<1x128xf32>
    %30 = tpu.matmul %29, %27, %cst_14 {dimension_numbers = #tpu.dot_dimension_numbers<[1], [0], [0], [1], [0, 0, 1, 1], [], []>} : vector<1x256xf32>, vector<256x128xf32>, vector<1x128xf32> -> vector<1x128xf32>
    %31 = arith.addf %28, %30 : vector<1x128xf32>
    %c0_15 = arith.constant 0 : index
    %c0_16 = arith.constant 0 : index
    %32 = vector.load %arg7[%c0_15, %c0_16] : memref<1x128xf32, #tpu.memory_space<vmem>>, vector<1x128xf32>
    tpu.vector_store %arg7[%c0_15, %c0_16], %31 {strides = array<i32>} : memref<1x128xf32, #tpu.memory_space<vmem>>, vector<1x128xf32>,
    %c0_i32_17 = arith.constant 0 : i32
    %33 = arith.cmpi eq, %arg2, %c0_i32_17 : i32
    %34 = arith.extui %33 : i1 to i32
    %c0_i32_18 = arith.constant 0 : i32
    %35 = arith.cmpi ne, %34, %c0_i32_18 : i32
    scf.if %35 {
      %c0_19 = arith.constant 0 : index
      %c0_20 = arith.constant 0 : index
      %36 = vector.load %arg7[%c0_19, %c0_20] : memref<1x128xf32, #tpu.memory_space<vmem>>, vector<1x128xf32>
      %cst_21 = arith.constant dense<0.000000e+00> : vector<1xf32>
      %37 = vector.multi_reduction <add>, %36, %cst_21 [1] : vector<1x128xf32> to vector<1xf32>
      %38 = vector.shape_cast %37 : vector<1xf32> to vector<1x1xf32>
      %cst_22 = arith.constant 6.250000e-02 : f32
      %39 = vector.broadcast %cst_22 : f32 to vector<1x1xf32>
      %40 = arith.mulf %38, %39 : vector<1x1xf32>
      %c0_23 = arith.constant 0 : index
      %c0_24 = arith.constant 0 : index
      %c0_25 = arith.constant 0 : index
      %c0_26 = arith.constant 0 : index
      %41 = vector.load %arg6[%c0_23, %c0_24, %c0_25, %c0_26] : memref<1x1x1x1xf32, #tpu.memory_space<vmem>>, vector<1x1x1x1xf32>
      %42 = vector.shape_cast %41 : vector<1x1x1x1xf32> to vector<1x1xf32>
      %43 = vector.shape_cast %40 : vector<1x1xf32> to vector<1x1x1x1xf32>
      tpu.vector_store %arg6[%c0_23, %c0_24, %c0_25, %c0_26], %43 {strides = array<i32>} : memref<1x1x1x1xf32, #tpu.memory_space<vmem>>, vector<1x1x1x1xf32>,
    } else {
    }
    return
  }
  func.func @transform_0(%arg0: i32, %arg1: i32, %arg2: i32) -> (i32, i32, i32) {
    %c1_i32 = arith.constant 1 : i32
    %0 = arith.muli %arg1, %c1_i32 : i32
    %1 = arith.addi %0, %arg2 : i32
    %c0_i32 = arith.constant 0 : i32
    %c0_i32_0 = arith.constant 0 : i32
    return %arg0, %c0_i32, %1 : i32, i32, i32
  }
  func.func @transform_1(%arg0: i32, %arg1: i32, %arg2: i32) -> (i32, i32, i32) {
    %c1_i32 = arith.constant 1 : i32
    %0 = arith.muli %arg1, %c1_i32 : i32
    %1 = arith.addi %0, %arg2 : i32
    %c0_i32 = arith.constant 0 : i32
    %c0_i32_0 = arith.constant 0 : i32
    return %arg0, %c0_i32, %1 : i32, i32, i32
  }
  func.func @transform_2(%arg0: i32, %arg1: i32, %arg2: i32) -> (i32, i32) {
    %c0_i32 = arith.constant 0 : i32
    %c0_i32_0 = arith.constant 0 : i32
    %c0_i32_1 = arith.constant 0 : i32
    return %c0_i32, %c0_i32_0 : i32, i32
  }
  func.func @transform_3(%arg0: i32, %arg1: i32, %arg2: i32) -> (i32, i32, i32, i32) {
    %c0_i32 = arith.constant 0 : i32
    %c0_i32_0 = arith.constant 0 : i32
    %c0_i32_1 = arith.constant 0 : i32
    return %arg0, %arg1, %c0_i32, %c0_i32_0 : i32, i32, i32, i32
  }
}

module attributes {stable_mosaic.version = 11 : i64} {
  func.func @_lpips_layer_kernel(%arg0: i32, %arg1: i32, %arg2: i32, %arg3: memref<1x512x128xbf16, #tpu.memory_space<vmem>>, %arg4: memref<1x512x128xbf16, #tpu.memory_space<vmem>>, %arg5: memref<1x512xf32, #tpu.memory_space<vmem>>, %arg6: memref<1x1x1x1xf32, #tpu.memory_space<vmem>>, %arg7: memref<1x128xf32, #tpu.memory_space<vmem>>) attributes {dimension_semantics = [#tpu.dimension_semantics<parallel>, #tpu.dimension_semantics<parallel>, #tpu.dimension_semantics<arbitrary>], iteration_bounds = array<i64: 2, 1, 1>, scalar_prefetch = 0 : i64, scratch_operands = 1 : i64, tpu.core_type = #tpu.core_type<tc>, window_params = [{transform_indices = @transform_0, window_bounds = array<i64: 1, 512, 128>}, {transform_indices = @transform_1, window_bounds = array<i64: 1, 512, 128>}, {pipeline_mode = #tpu.pipeline_mode<synchronous>, transform_indices = @transform_2, window_bounds = array<i64: 1, 512>}, {transform_indices = @transform_3, window_bounds = array<i64: 1, 1, 1, 1>}]} {
    %c0_i32 = arith.constant 0 : i32
    %0 = arith.cmpi eq, %arg2, %c0_i32 : i32
    %1 = arith.extui %0 : i1 to i32
    %c0_i32_0 = arith.constant 0 : i32
    %2 = arith.cmpi ne, %1, %c0_i32_0 : i32
    scf.if %2 {
      %cst_19 = arith.constant 0.000000e+00 : f32
      %36 = vector.broadcast %cst_19 : f32 to vector<1x128xf32>
      %c0_20 = arith.constant 0 : index
      %c0_21 = arith.constant 0 : index
      %37 = vector.load %arg7[%c0_20, %c0_21] : memref<1x128xf32, #tpu.memory_space<vmem>>, vector<1x128xf32>
      tpu.vector_store %arg7[%c0_20, %c0_21], %36 {strides = array<i32>} : memref<1x128xf32, #tpu.memory_space<vmem>>, vector<1x128xf32>,
    } else {
    }
    %c0 = arith.constant 0 : index
    %c0_1 = arith.constant 0 : index
    %c0_2 = arith.constant 0 : index
    %3 = vector.load %arg3[%c0, %c0_1, %c0_2] : memref<1x512x128xbf16, #tpu.memory_space<vmem>>, vector<1x512x128xbf16>
    %4 = vector.shape_cast %3 : vector<1x512x128xbf16> to vector<512x128xbf16>
    %5 = arith.extf %4 : vector<512x128xbf16> to vector<512x128xf32>
    %c0_3 = arith.constant 0 : index
    %c0_4 = arith.constant 0 : index
    %c0_5 = arith.constant 0 : index
    %6 = vector.load %arg4[%c0_3, %c0_4, %c0_5] : memref<1x512x128xbf16, #tpu.memory_space<vmem>>, vector<1x512x128xbf16>
    %7 = vector.shape_cast %6 : vector<1x512x128xbf16> to vector<512x128xbf16>
    %8 = arith.extf %7 : vector<512x128xbf16> to vector<512x128xf32>
    %cst = arith.constant 1.000000e+00 : f32
    %9 = vector.broadcast %cst : f32 to vector<1x512xf32>
    %10 = arith.mulf %5, %5 : vector<512x128xf32>
    %cst_6 = arith.constant dense<0.000000e+00> : vector<1x128xf32>
    %11 = tpu.matmul %9, %10, %cst_6 {dimension_numbers = #tpu.dot_dimension_numbers<[1], [0], [0], [1], [0, 0, 1, 1], [], []>} : vector<1x512xf32>, vector<512x128xf32>, vector<1x128xf32> -> vector<1x128xf32>
    %12 = arith.mulf %8, %8 : vector<512x128xf32>
    %cst_7 = arith.constant dense<0.000000e+00> : vector<1x128xf32>
    %13 = tpu.matmul %9, %12, %cst_7 {dimension_numbers = #tpu.dot_dimension_numbers<[1], [0], [0], [1], [0, 0, 1, 1], [], []>} : vector<1x512xf32>, vector<512x128xf32>, vector<1x128xf32> -> vector<1x128xf32>
    %14 = math.sqrt %11 : vector<1x128xf32>
    %cst_8 = arith.constant 1.000000e-10 : f32
    %15 = vector.broadcast %cst_8 : f32 to vector<1x128xf32>
    %16 = arith.addf %14, %15 : vector<1x128xf32>
    %17 = tpu.reciprocal %16 {approx = true} : vector<1x128xf32> -> vector<1x128xf32>
    %18 = math.sqrt %13 : vector<1x128xf32>
    %cst_9 = arith.constant 1.000000e-10 : f32
    %19 = vector.broadcast %cst_9 : f32 to vector<1x128xf32>
    %20 = arith.addf %18, %19 : vector<1x128xf32>
    %21 = tpu.reciprocal %20 {approx = true} : vector<1x128xf32> -> vector<1x128xf32>
    %22 = vector.broadcast %17 : vector<1x128xf32> to vector<512x128xf32>
    %23 = arith.mulf %5, %22 : vector<512x128xf32>
    %24 = vector.broadcast %21 : vector<1x128xf32> to vector<512x128xf32>
    %25 = arith.mulf %8, %24 : vector<512x128xf32>
    %26 = arith.subf %23, %25 : vector<512x128xf32>
    %27 = arith.mulf %26, %26 : vector<512x128xf32>
    %c0_10 = arith.constant 0 : index
    %c0_11 = arith.constant 0 : index
    %28 = vector.load %arg7[%c0_10, %c0_11] : memref<1x128xf32, #tpu.memory_space<vmem>>, vector<1x128xf32>
    %c0_12 = arith.constant 0 : index
    %c0_13 = arith.constant 0 : index
    %29 = vector.load %arg5[%c0_12, %c0_13] : memref<1x512xf32, #tpu.memory_space<vmem>>, vector<1x512xf32>
    %cst_14 = arith.constant dense<0.000000e+00> : vector<1x128xf32>
    %30 = tpu.matmul %29, %27, %cst_14 {dimension_numbers = #tpu.dot_dimension_numbers<[1], [0], [0], [1], [0, 0, 1, 1], [], []>} : vector<1x512xf32>, vector<512x128xf32>, vector<1x128xf32> -> vector<1x128xf32>
    %31 = arith.addf %28, %30 : vector<1x128xf32>
    %c0_15 = arith.constant 0 : index
    %c0_16 = arith.constant 0 : index
    %32 = vector.load %arg7[%c0_15, %c0_16] : memref<1x128xf32, #tpu.memory_space<vmem>>, vector<1x128xf32>
    tpu.vector_store %arg7[%c0_15, %c0_16], %31 {strides = array<i32>} : memref<1x128xf32, #tpu.memory_space<vmem>>, vector<1x128xf32>,
    %c0_i32_17 = arith.constant 0 : i32
    %33 = arith.cmpi eq, %arg2, %c0_i32_17 : i32
    %34 = arith.extui %33 : i1 to i32
    %c0_i32_18 = arith.constant 0 : i32
    %35 = arith.cmpi ne, %34, %c0_i32_18 : i32
    scf.if %35 {
      %c0_19 = arith.constant 0 : index
      %c0_20 = arith.constant 0 : index
      %36 = vector.load %arg7[%c0_19, %c0_20] : memref<1x128xf32, #tpu.memory_space<vmem>>, vector<1x128xf32>
      %cst_21 = arith.constant dense<0.000000e+00> : vector<1xf32>
      %37 = vector.multi_reduction <add>, %36, %cst_21 [1] : vector<1x128xf32> to vector<1xf32>
      %38 = vector.shape_cast %37 : vector<1xf32> to vector<1x1xf32>
      %cst_22 = arith.constant 2.500000e-01 : f32
      %39 = vector.broadcast %cst_22 : f32 to vector<1x1xf32>
      %40 = arith.mulf %38, %39 : vector<1x1xf32>
      %c0_23 = arith.constant 0 : index
      %c0_24 = arith.constant 0 : index
      %c0_25 = arith.constant 0 : index
      %c0_26 = arith.constant 0 : index
      %41 = vector.load %arg6[%c0_23, %c0_24, %c0_25, %c0_26] : memref<1x1x1x1xf32, #tpu.memory_space<vmem>>, vector<1x1x1x1xf32>
      %42 = vector.shape_cast %41 : vector<1x1x1x1xf32> to vector<1x1xf32>
      %43 = vector.shape_cast %40 : vector<1x1xf32> to vector<1x1x1x1xf32>
      tpu.vector_store %arg6[%c0_23, %c0_24, %c0_25, %c0_26], %43 {strides = array<i32>} : memref<1x1x1x1xf32, #tpu.memory_space<vmem>>, vector<1x1x1x1xf32>,
    } else {
    }
    return
  }
  func.func @transform_0(%arg0: i32, %arg1: i32, %arg2: i32) -> (i32, i32, i32) {
    %c1_i32 = arith.constant 1 : i32
    %0 = arith.muli %arg1, %c1_i32 : i32
    %1 = arith.addi %0, %arg2 : i32
    %c0_i32 = arith.constant 0 : i32
    %c0_i32_0 = arith.constant 0 : i32
    return %arg0, %c0_i32, %1 : i32, i32, i32
  }
  func.func @transform_1(%arg0: i32, %arg1: i32, %arg2: i32) -> (i32, i32, i32) {
    %c1_i32 = arith.constant 1 : i32
    %0 = arith.muli %arg1, %c1_i32 : i32
    %1 = arith.addi %0, %arg2 : i32
    %c0_i32 = arith.constant 0 : i32
    %c0_i32_0 = arith.constant 0 : i32
    return %arg0, %c0_i32, %1 : i32, i32, i32
  }
  func.func @transform_2(%arg0: i32, %arg1: i32, %arg2: i32) -> (i32, i32) {
    %c0_i32 = arith.constant 0 : i32
    %c0_i32_0 = arith.constant 0 : i32
    %c0_i32_1 = arith.constant 0 : i32
    return %c0_i32, %c0_i32_0 : i32, i32
  }
  func.func @transform_3(%arg0: i32, %arg1: i32, %arg2: i32) -> (i32, i32, i32, i32) {
    %c0_i32 = arith.constant 0 : i32
    %c0_i32_0 = arith.constant 0 : i32
    %c0_i32_1 = arith.constant 0 : i32
    return %arg0, %arg1, %c0_i32, %c0_i32_0 : i32, i32, i32, i32
  }
}

module attributes {stable_mosaic.version = 11 : i64} {
  func.func @_lpips_layer_kernel(%arg0: i32, %arg1: i32, %arg2: i32, %arg3: memref<1x512x128xbf16, #tpu.memory_space<vmem>>, %arg4: memref<1x512x128xbf16, #tpu.memory_space<vmem>>, %arg5: memref<1x512xf32, #tpu.memory_space<vmem>>, %arg6: memref<1x1x1x1xf32, #tpu.memory_space<vmem>>, %arg7: memref<1x128xf32, #tpu.memory_space<vmem>>) attributes {dimension_semantics = [#tpu.dimension_semantics<parallel>, #tpu.dimension_semantics<parallel>, #tpu.dimension_semantics<arbitrary>], iteration_bounds = array<i64: 2, 1, 1>, scalar_prefetch = 0 : i64, scratch_operands = 1 : i64, tpu.core_type = #tpu.core_type<tc>, window_params = [{transform_indices = @transform_0, window_bounds = array<i64: 1, 512, 128>}, {transform_indices = @transform_1, window_bounds = array<i64: 1, 512, 128>}, {pipeline_mode = #tpu.pipeline_mode<synchronous>, transform_indices = @transform_2, window_bounds = array<i64: 1, 512>}, {transform_indices = @transform_3, window_bounds = array<i64: 1, 1, 1, 1>}]} {
    %c0_i32 = arith.constant 0 : i32
    %0 = arith.cmpi eq, %arg2, %c0_i32 : i32
    %1 = arith.extui %0 : i1 to i32
    %c0_i32_0 = arith.constant 0 : i32
    %2 = arith.cmpi ne, %1, %c0_i32_0 : i32
    scf.if %2 {
      %cst_19 = arith.constant 0.000000e+00 : f32
      %36 = vector.broadcast %cst_19 : f32 to vector<1x128xf32>
      %c0_20 = arith.constant 0 : index
      %c0_21 = arith.constant 0 : index
      %37 = vector.load %arg7[%c0_20, %c0_21] : memref<1x128xf32, #tpu.memory_space<vmem>>, vector<1x128xf32>
      tpu.vector_store %arg7[%c0_20, %c0_21], %36 {strides = array<i32>} : memref<1x128xf32, #tpu.memory_space<vmem>>, vector<1x128xf32>,
    } else {
    }
    %c0 = arith.constant 0 : index
    %c0_1 = arith.constant 0 : index
    %c0_2 = arith.constant 0 : index
    %3 = vector.load %arg3[%c0, %c0_1, %c0_2] : memref<1x512x128xbf16, #tpu.memory_space<vmem>>, vector<1x512x128xbf16>
    %4 = vector.shape_cast %3 : vector<1x512x128xbf16> to vector<512x128xbf16>
    %5 = arith.extf %4 : vector<512x128xbf16> to vector<512x128xf32>
    %c0_3 = arith.constant 0 : index
    %c0_4 = arith.constant 0 : index
    %c0_5 = arith.constant 0 : index
    %6 = vector.load %arg4[%c0_3, %c0_4, %c0_5] : memref<1x512x128xbf16, #tpu.memory_space<vmem>>, vector<1x512x128xbf16>
    %7 = vector.shape_cast %6 : vector<1x512x128xbf16> to vector<512x128xbf16>
    %8 = arith.extf %7 : vector<512x128xbf16> to vector<512x128xf32>
    %cst = arith.constant 1.000000e+00 : f32
    %9 = vector.broadcast %cst : f32 to vector<1x512xf32>
    %10 = arith.mulf %5, %5 : vector<512x128xf32>
    %cst_6 = arith.constant dense<0.000000e+00> : vector<1x128xf32>
    %11 = tpu.matmul %9, %10, %cst_6 {dimension_numbers = #tpu.dot_dimension_numbers<[1], [0], [0], [1], [0, 0, 1, 1], [], []>} : vector<1x512xf32>, vector<512x128xf32>, vector<1x128xf32> -> vector<1x128xf32>
    %12 = arith.mulf %8, %8 : vector<512x128xf32>
    %cst_7 = arith.constant dense<0.000000e+00> : vector<1x128xf32>
    %13 = tpu.matmul %9, %12, %cst_7 {dimension_numbers = #tpu.dot_dimension_numbers<[1], [0], [0], [1], [0, 0, 1, 1], [], []>} : vector<1x512xf32>, vector<512x128xf32>, vector<1x128xf32> -> vector<1x128xf32>
    %14 = math.sqrt %11 : vector<1x128xf32>
    %cst_8 = arith.constant 1.000000e-10 : f32
    %15 = vector.broadcast %cst_8 : f32 to vector<1x128xf32>
    %16 = arith.addf %14, %15 : vector<1x128xf32>
    %17 = tpu.reciprocal %16 {approx = true} : vector<1x128xf32> -> vector<1x128xf32>
    %18 = math.sqrt %13 : vector<1x128xf32>
    %cst_9 = arith.constant 1.000000e-10 : f32
    %19 = vector.broadcast %cst_9 : f32 to vector<1x128xf32>
    %20 = arith.addf %18, %19 : vector<1x128xf32>
    %21 = tpu.reciprocal %20 {approx = true} : vector<1x128xf32> -> vector<1x128xf32>
    %22 = vector.broadcast %17 : vector<1x128xf32> to vector<512x128xf32>
    %23 = arith.mulf %5, %22 : vector<512x128xf32>
    %24 = vector.broadcast %21 : vector<1x128xf32> to vector<512x128xf32>
    %25 = arith.mulf %8, %24 : vector<512x128xf32>
    %26 = arith.subf %23, %25 : vector<512x128xf32>
    %27 = arith.mulf %26, %26 : vector<512x128xf32>
    %c0_10 = arith.constant 0 : index
    %c0_11 = arith.constant 0 : index
    %28 = vector.load %arg7[%c0_10, %c0_11] : memref<1x128xf32, #tpu.memory_space<vmem>>, vector<1x128xf32>
    %c0_12 = arith.constant 0 : index
    %c0_13 = arith.constant 0 : index
    %29 = vector.load %arg5[%c0_12, %c0_13] : memref<1x512xf32, #tpu.memory_space<vmem>>, vector<1x512xf32>
    %cst_14 = arith.constant dense<0.000000e+00> : vector<1x128xf32>
    %30 = tpu.matmul %29, %27, %cst_14 {dimension_numbers = #tpu.dot_dimension_numbers<[1], [0], [0], [1], [0, 0, 1, 1], [], []>} : vector<1x512xf32>, vector<512x128xf32>, vector<1x128xf32> -> vector<1x128xf32>
    %31 = arith.addf %28, %30 : vector<1x128xf32>
    %c0_15 = arith.constant 0 : index
    %c0_16 = arith.constant 0 : index
    %32 = vector.load %arg7[%c0_15, %c0_16] : memref<1x128xf32, #tpu.memory_space<vmem>>, vector<1x128xf32>
    tpu.vector_store %arg7[%c0_15, %c0_16], %31 {strides = array<i32>} : memref<1x128xf32, #tpu.memory_space<vmem>>, vector<1x128xf32>,
    %c0_i32_17 = arith.constant 0 : i32
    %33 = arith.cmpi eq, %arg2, %c0_i32_17 : i32
    %34 = arith.extui %33 : i1 to i32
    %c0_i32_18 = arith.constant 0 : i32
    %35 = arith.cmpi ne, %34, %c0_i32_18 : i32
    scf.if %35 {
      %c0_19 = arith.constant 0 : index
      %c0_20 = arith.constant 0 : index
      %36 = vector.load %arg7[%c0_19, %c0_20] : memref<1x128xf32, #tpu.memory_space<vmem>>, vector<1x128xf32>
      %cst_21 = arith.constant dense<0.000000e+00> : vector<1xf32>
      %37 = vector.multi_reduction <add>, %36, %cst_21 [1] : vector<1x128xf32> to vector<1xf32>
      %38 = vector.shape_cast %37 : vector<1xf32> to vector<1x1xf32>
      %cst_22 = arith.constant 1.000000e+00 : f32
      %39 = vector.broadcast %cst_22 : f32 to vector<1x1xf32>
      %40 = arith.mulf %38, %39 : vector<1x1xf32>
      %c0_23 = arith.constant 0 : index
      %c0_24 = arith.constant 0 : index
      %c0_25 = arith.constant 0 : index
      %c0_26 = arith.constant 0 : index
      %41 = vector.load %arg6[%c0_23, %c0_24, %c0_25, %c0_26] : memref<1x1x1x1xf32, #tpu.memory_space<vmem>>, vector<1x1x1x1xf32>
      %42 = vector.shape_cast %41 : vector<1x1x1x1xf32> to vector<1x1xf32>
      %43 = vector.shape_cast %40 : vector<1x1xf32> to vector<1x1x1x1xf32>
      tpu.vector_store %arg6[%c0_23, %c0_24, %c0_25, %c0_26], %43 {strides = array<i32>} : memref<1x1x1x1xf32, #tpu.memory_space<vmem>>, vector<1x1x1x1xf32>,
    } else {
    }
    return
  }
  func.func @transform_0(%arg0: i32, %arg1: i32, %arg2: i32) -> (i32, i32, i32) {
    %c1_i32 = arith.constant 1 : i32
    %0 = arith.muli %arg1, %c1_i32 : i32
    %1 = arith.addi %0, %arg2 : i32
    %c0_i32 = arith.constant 0 : i32
    %c0_i32_0 = arith.constant 0 : i32
    return %arg0, %c0_i32, %1 : i32, i32, i32
  }
  func.func @transform_1(%arg0: i32, %arg1: i32, %arg2: i32) -> (i32, i32, i32) {
    %c1_i32 = arith.constant 1 : i32
    %0 = arith.muli %arg1, %c1_i32 : i32
    %1 = arith.addi %0, %arg2 : i32
    %c0_i32 = arith.constant 0 : i32
    %c0_i32_0 = arith.constant 0 : i32
    return %arg0, %c0_i32, %1 : i32, i32, i32
  }
  func.func @transform_2(%arg0: i32, %arg1: i32, %arg2: i32) -> (i32, i32) {
    %c0_i32 = arith.constant 0 : i32
    %c0_i32_0 = arith.constant 0 : i32
    %c0_i32_1 = arith.constant 0 : i32
    return %c0_i32, %c0_i32_0 : i32, i32
  }
  func.func @transform_3(%arg0: i32, %arg1: i32, %arg2: i32) -> (i32, i32, i32, i32) {
    %c0_i32 = arith.constant 0 : i32
    %c0_i32_0 = arith.constant 0 : i32
    %c0_i32_1 = arith.constant 0 : i32
    return %arg0, %arg1, %c0_i32, %c0_i32_0 : i32, i32, i32, i32
  }
}

</mosaic_0001>

<bundles_post_ra>
// kernel: pnetlin_forward.5
= control target key start
LH: loop header
LB: loop body
LE: loop exit
PB: predicated region body
PF: predicated region fallthrough
CT: control target
= control target key end

     0   :  { %s933_s12 = smov 0   ;;  %s935_s13 = smov 0   ;;  %s1185_s0 = inlined_call_operand.vmem [shape: bf16[2,64,256], index: 0, kind: input, shape index: {}]   ;;  %s1186_s1 = inlined_call_operand.vmem [shape: bf16[2,64,256], index: 1, kind: input, shape index: {}]   ;;  %s1187_s2 = inlined_call_operand.vmem [shape: f32[1,64], index: 2, kind: input, shape index: {}]   ;;  %s1188_s3 = inlined_call_operand.vmem [shape: f32[2,1,1,1], index: 3, kind: output, shape index: {}]  }
   0x1   :  { %s937_s14 = smov 0  }
   0x2 LB: > { %s32_s15 = sadd.s32 1, %s904_s13  ;;  %p831_p0 = scmp.ge.s32.totalorder %s908_s14, 1  ;;  %s908_s14 = sphi %s937_s14, %s13_s14   ;;  %s904_s13 = sphi %s935_s13, %s1192_s13   ;;  %s900_s12 = sphi %s933_s12, %s1191_s12  }
   0x3   : > { %p34_p1 = scmp.ge.s32.totalorder %s32_s15, 2  ;;  %p190_p2 = scmp.lt.s32.totalorder %s908_s14, 3 }
   0x5   : > { %s1194_s15 = smov (%p34_p1, %s32_s15), 0  ;;  %p191_p3 = pnand %p831_p0, %p190_p2 }
   0x6   : > { %p232_p4 = scmp.lt.s32.totalorder (!%p191_p3), %s900_s12, 1 }
   0x7   : > { %194 = sbr.rel (%p191_p3) target bundleno = 647 (0x287), region = 32 }
   0xc   : > { %v264_v0 = vlaneseq  ;;  %v910_v1 = vmov 0.0   ;;  %s1196_s12 = smov (!%p232_p4, %s900_s12), 1  ;;  %vm333_vm1 = vcmask 523264   ;;  %vm726_vm10 = vcmask 1040384  }
   0xd   : > { %401 = vmatprep.mubr.f32.mxu0 %v910_v1  ;;  %488 = vmatprep.mubr.f32.mxu1 %v910_v1  ;;  %s841_s16 = sshll.u32 %s1196_s12, 6  ;;  %s259_s27 = scalar_lea.vmem %s1188_s3, %s1196_s12  ;;  %vm733_vm11 = vcmask 0  }
   0xe   : > { %vm956_vm0 = vcmp.lt.s32.totalorder %v264_v0, 256  ;;  %s967_s19 = scalar_lea.vmem %s1185_s0, %s841_s16  ;;  %s972_s22 = scalar_lea.vmem %s1186_s1, %s841_s16 }
   0xf   : > { %268 = vst.msk [vmem:[#allocation2] sm:$0x3] %vm956_vm0, %v910_v1  ;;  %v276_v3 = vld [vmem:[%s967_s19 + $0x38] sm:$0xff]  ;;  %v275_v5 = vld [vmem:[%s967_s19 + $0x30] sm:$0xff]  ;;  %v274_v15 = vld [vmem:[%s967_s19 + $0x28] sm:$0xff] }
  0x10   : > { %v300_v4 = vld [vmem:[%s972_s22 + $0x38] sm:$0xff]  ;;  %v977_v6 = vunpack.c.h.bf16 %v276_v3  ;;  %v981_v8 = vunpack.c.l.bf16 %v276_v3  ;;  %v299_v10 = vld [vmem:[%s972_s22 + $0x30] sm:$0xff]  ;;  %v986_v11 = vunpack.c.h.bf16 %v275_v5  ;;  %v990_v13 = vunpack.c.l.bf16 %v275_v5  ;;  %v298_v16 = vld [vmem:[%s972_s22 + $0x28] sm:$0xff] }
  0x11   : > { %v979_v7 = vunpack.c.h.bf16 %v300_v4  ;;  %v983_v9 = vunpack.c.l.bf16 %v300_v4  ;;  %v988_v12 = vunpack.c.h.bf16 %v299_v10  ;;  %v992_v14 = vunpack.c.l.bf16 %v299_v10  ;;  %v273_v21 = vld [vmem:[%s967_s19 + $0x20] sm:$0xff]  ;;  %v272_v27 = vld [vmem:[%s967_s19 + $0x18] sm:$0xff]  ;;  %v271_v41 = vld [vmem:[%s967_s19 + $0x10] sm:$0xff] }
  0x12   : > { %v332_v17 = vmul.f32 %v977_v6, %v977_v6  ;;  %v331_v19 = vmul.f32 %v981_v8, %v981_v8  ;;  %v297_v22 = vld [vmem:[%s972_s22 + $0x20] sm:$0xff]  ;;  %v330_v23 = vmul.f32 %v986_v11, %v986_v11  ;;  %v329_v25 = vmul.f32 %v990_v13, %v990_v13  ;;  %v296_v32 = vld [vmem:[%s972_s22 + $0x18] sm:$0xff]  ;;  %v295_v42 = vld [vmem:[%s972_s22 + $0x10] sm:$0xff] }
  0x13   : > { %v423_v18 = vmul.f32 %v979_v7, %v979_v7  ;;  %v422_v20 = vmul.f32 %v983_v9, %v983_v9  ;;  %v421_v24 = vmul.f32 %v988_v12, %v988_v12  ;;  %v420_v26 = vmul.f32 %v992_v14, %v992_v14  ;;  %v270_v47 = vld [vmem:[%s967_s19 + $0x8] sm:$0xff]  ;;  %v269_v61 = vld [vmem:[%s967_s19] sm:$0xff] }
  0x14   : > { %353 = vmatprep.subr.mxu0 %v332_v17  ;;  %v1015_v28 = vunpack.c.h.bf16 %v274_v15  ;;  %v1017_v29 = vunpack.c.h.bf16 %v298_v16  ;;  %v1019_v30 = vunpack.c.l.bf16 %v274_v15  ;;  %v1021_v31 = vunpack.c.l.bf16 %v298_v16  ;;  %v294_v52 = vld [vmem:[%s972_s22 + $0x8] sm:$0xff]  ;;  %v293_v62 = vld [vmem:[%s972_s22] sm:$0xff] }
  0x15   : > { %440 = vmatprep.subr.mxu1 %v423_v18  ;;  %354 = vmatpush1.msra.mxu0 %v331_v19  ;;  %v1024_v33 = vunpack.c.h.bf16 %v273_v21  ;;  %v1026_v34 = vunpack.c.h.bf16 %v297_v22  ;;  %v1028_v35 = vunpack.c.l.bf16 %v273_v21  ;;  %v1030_v36 = vunpack.c.l.bf16 %v297_v22 }
  0x16   : > { %441 = vmatpush1.msra.mxu1 %v422_v20  ;;  %355 = vmatprep.subr.mxu0 %v330_v23  ;;  %v328_v37 = vmul.f32 %v1015_v28, %v1015_v28  ;;  %v419_v38 = vmul.f32 %v1017_v29, %v1017_v29  ;;  %v327_v39 = vmul.f32 %v1019_v30, %v1019_v30  ;;  %v1038_v40 = vunpack.c.h.bf16 %v272_v27 }
  0x17   : > { %442 = vmatprep.subr.mxu1 %v421_v24  ;;  %356 = vmatpush1.msra.mxu0 %v329_v25  ;;  %v418_v43 = vmul.f32 %v1021_v31, %v1021_v31  ;;  %v326_v44 = vmul.f32 %v1024_v33, %v1024_v33  ;;  %v417_v45 = vmul.f32 %v1026_v34, %v1026_v34  ;;  %v1048_v46 = vunpack.c.h.bf16 %v296_v32 }
  0x18   : > { %443 = vmatpush1.msra.mxu1 %v420_v26  ;;  %357 = vmatprep.subr.mxu0 %v328_v37  ;;  %v325_v48 = vmul.f32 %v1028_v35, %v1028_v35  ;;  %v416_v49 = vmul.f32 %v1030_v36, %v1030_v36  ;;  %v324_v50 = vmul.f32 %v1038_v40, %v1038_v40  ;;  %v1057_v51 = vunpack.c.l.bf16 %v272_v27 }
  0x19   : > { %444 = vmatprep.subr.mxu1 %v419_v38  ;;  %358 = vmatpush1.msra.mxu0 %v327_v39  ;;  %v415_v53 = vmul.f32 %v1048_v46, %v1048_v46  ;;  %v1062_v54 = vunpack.c.l.bf16 %v296_v32  ;;  %v1064_v55 = vunpack.c.h.bf16 %v271_v41  ;;  %v1066_v56 = vunpack.c.h.bf16 %v295_v42 }
  0x1a   : > { %445 = vmatpush1.msra.mxu1 %v418_v43  ;;  %359 = vmatprep.subr.mxu0 %v326_v44  ;;  %v323_v57 = vmul.f32 %v1057_v51, %v1057_v51  ;;  %v1070_v58 = vunpack.c.l.bf16 %v271_v41  ;;  %v1072_v59 = vunpack.c.l.bf16 %v295_v42  ;;  %v1074_v60 = vunpack.c.h.bf16 %v270_v47 }
  0x1b   : > { %446 = vmatprep.subr.mxu1 %v417_v45  ;;  %360 = vmatpush1.msra.mxu0 %v325_v48  ;;  %v414_v63 = vmul.f32 %v1062_v54, %v1062_v54  ;;  %v322_v3 = vmul.f32 %v1064_v55, %v1064_v55  ;;  %v413_v4 = vmul.f32 %v1066_v56, %v1066_v56  ;;  %v1084_v5 = vunpack.c.h.bf16 %v294_v52 }
  0x1c   : > { %447 = vmatpush1.msra.mxu1 %v416_v49  ;;  %361 = vmatprep.subr.mxu0 %v324_v50  ;;  %v321_v10 = vmul.f32 %v1070_v58, %v1070_v58  ;;  %v412_v15 = vmul.f32 %v1072_v59, %v1072_v59  ;;  %v320_v16 = vmul.f32 %v1074_v60, %v1074_v60  ;;  %v1092_v17 = vunpack.c.l.bf16 %v270_v47 }
  0x1d   : > { %448 = vmatprep.subr.mxu1 %v415_v53  ;;  %362 = vmatpush1.msra.mxu0 %v323_v57  ;;  %v411_v18 = vmul.f32 %v1084_v5, %v1084_v5  ;;  %v1096_v19 = vunpack.c.l.bf16 %v294_v52  ;;  %v1098_v20 = vunpack.c.h.bf16 %v269_v61  ;;  %v1100_v21 = vunpack.c.h.bf16 %v293_v62 }
  0x1e   : > { %449 = vmatpush1.msra.mxu1 %v414_v63  ;;  %363 = vmatprep.subr.mxu0 %v322_v3  ;;  %v319_v22 = vmul.f32 %v1092_v17, %v1092_v17  ;;  %v1104_v23 = vunpack.c.l.bf16 %v269_v61  ;;  %v1106_v24 = vunpack.c.l.bf16 %v293_v62  ;;  %v911_v38 = vmov 1.0  }
  0x1f   : > { %450 = vmatprep.subr.mxu1 %v413_v4  ;;  %364 = vmatpush1.msra.mxu0 %v321_v10  ;;  %v410_v25 = vmul.f32 %v1096_v19, %v1096_v19  ;;  %v318_v26 = vmul.f32 %v1098_v20, %v1098_v20  ;;  %v409_v27 = vmul.f32 %v1100_v21, %v1100_v21 }
  0x20   : > { %451 = vmatpush1.msra.mxu1 %v412_v15  ;;  %365 = vmatprep.subr.mxu0 %v320_v16  ;;  %v317_v32 = vmul.f32 %v1104_v23, %v1104_v23  ;;  %v408_v37 = vmul.f32 %v1106_v24, %v1106_v24 }
  0x21   : > { %452 = vmatprep.subr.mxu1 %v411_v18  ;;  %366 = vmatpush1.msra.mxu0 %v319_v22 }
  0x22   : > { %453 = vmatpush1.msra.mxu1 %v410_v25  ;;  %367 = vmatprep.subr.mxu0 %v318_v26 }
  0x23   : > { %454 = vmatprep.subr.mxu1 %v409_v27  ;;  %368 = vmatpush1.msra.mxu0 %v317_v32 }
  0x24   : > { %455 = vmatpush1.msra.mxu1 %v408_v37  ;;  %836 = vmatmul.mubr.msk.f32.vlgmr.msra.gmra.mxu0 %vm333_vm1, %v911_v38  ;;  %v1122_v37 = vshrl.u32 %v264_v0, 7 }
  0x25   : > { %837 = vmatmul.mubr.msk.f32.vlgmr.msra.gmra.mxu1 %vm333_vm1, %v911_v38  ;;  %680 = vmatprep.mubr.f32.mxu0 %v910_v1 }
  0x26   : > { %v1125_v38 = vsub.s32 0, %v1122_v37 }
  0xe4   : > { %v403_v39 = vpop.f32.mrf.mxu0 }
  0xe5   : > { %v490_v41 = vpop.f32.mrf.mxu1  ;;  %870 = vrsqrt.f32 %v403_v39  ;;  %vm497_vm2 = vcmp.eq.f32.partialorder %v403_v39, inf  ;;  %vm499_vm3 = vcmp.eq.f32.partialorder %v403_v39, 0.0  ;;  %v500_v48 = vand.u32 2147483648, %v403_v39 }
  0xe6   : > { %872 = vrsqrt.f32 %v490_v41  ;;  %v405_v42 = vpop.f32.mrf.mxu0  ;;  %vm515_vm4 = vcmp.eq.f32.partialorder %v490_v41, inf  ;;  %vm517_vm5 = vcmp.eq.f32.partialorder %v490_v41, 0.0  ;;  %v518_v52 = vand.u32 2147483648, %v490_v41 }
  0xe7   : > { %v492_v43 = vpop.f32.mrf.mxu1  ;;  %874 = vrsqrt.f32 %v405_v42  ;;  %vm504_vm6 = vcmp.eq.f32.partialorder %v405_v42, inf  ;;  %vm506_vm7 = vcmp.eq.f32.partialorder %v405_v42, 0.0  ;;  %v507_v61 = vand.u32 2147483648, %v405_v42 }
  0xe8   : > { %876 = vrsqrt.f32 %v492_v43  ;;  %vm522_vm8 = vcmp.eq.f32.partialorder %v492_v43, inf  ;;  %v525_v16 = vand.u32 2147483648, %v492_v43  ;;  %vm524_vm9 = vcmp.eq.f32.partialorder %v492_v43, 0.0 }
  0xf2   : > { %v871_v44 = vpop.eup %870 }
  0xf3   : > { %v873_v45 = vpop.eup %872  ;;  %v496_v47 = vmul.f32 %v871_v44, %v403_v39 }
  0xf4   : > { %v875_v49 = vpop.eup %874  ;;  %v514_v50 = vmul.f32 %v873_v45, %v490_v41 }
  0xf5   : > { %v877_v1 = vpop.eup %876  ;;  %v498_v53 = vsel %vm497_vm2, %v403_v39, %v496_v47  ;;  %v503_v57 = vmul.f32 %v875_v49, %v405_v42 }
  0xf6   : > { %v501_v62 = vsel %vm499_vm3, %v500_v48, %v498_v53  ;;  %v516_v63 = vsel %vm515_vm4, %v490_v41, %v514_v50  ;;  %v521_v3 = vmul.f32 %v877_v1, %v492_v43 }
  0xf7   : > { %v509_v4 = vadd.f32 1e-10, %v501_v62  ;;  %v519_v10 = vsel %vm517_vm5, %v518_v52, %v516_v63  ;;  %v505_v15 = vsel %vm504_vm6, %v405_v42, %v503_v57 }
  0xf8   : > { %v527_v18 = vadd.f32 1e-10, %v519_v10  ;;  %v508_v22 = vsel %vm506_vm7, %v507_v61, %v505_v15  ;;  %v523_v25 = vsel %vm522_vm8, %v492_v43, %v521_v3 }
  0xf9   : > { %878 = vrcp.f32 %v509_v4  ;;  %v510_v26 = vadd.f32 1e-10, %v508_v22  ;;  %v526_v27 = vsel %vm524_vm9, %v525_v16, %v523_v25 }
  0xfa   : > { %880 = vrcp.f32 %v527_v18  ;;  %v528_v32 = vadd.f32 1e-10, %v526_v27 }
  0xfb   : > { %882 = vrcp.f32 %v510_v26 }
  0xfc   : > { %884 = vrcp.f32 %v528_v32 }
 0x106   : > { %v879_v39 = vpop.eup %878 }
 0x107   : > { %v881_v41 = vpop.eup %880  ;;  %v534_v42 = vrot.slane %v879_v39, %v1125_v38 }
 0x108   : > { %v883_v44 = vpop.eup %882  ;;  %v558_v43 = vrot.slane %v881_v41, %v1125_v38 }
 0x109   : > { %v885_v45 = vpop.eup %884  ;;  %v538_v47 = vrot.slane %v883_v44, %v1125_v38  ;;  %v553_v48 = vmul.f32 %v534_v42, %v981_v8  ;;  %v551_v50 = vmul.f32 %v534_v42, %v990_v13  ;;  %v549_v57 = vmul.f32 %v534_v42, %v1019_v30 }
 0x10a   : > { %v562_v49 = vrot.slane %v885_v45, %v1125_v38  ;;  %v577_v0 = vmul.f32 %v558_v43, %v983_v9  ;;  %v575_v53 = vmul.f32 %v558_v43, %v992_v14  ;;  %v573_v63 = vmul.f32 %v558_v43, %v1021_v31 }
 0x10b   : > { %v554_v52 = vmul.f32 %v538_v47, %v977_v6  ;;  %v552_v1 = vmul.f32 %v538_v47, %v986_v11  ;;  %v550_v8 = vmul.f32 %v538_v47, %v1015_v28  ;;  %v548_v13 = vmul.f32 %v538_v47, %v1024_v33 }
 0x10c   : > { %v578_v61 = vmul.f32 %v562_v49, %v979_v7  ;;  %v576_v62 = vmul.f32 %v562_v49, %v988_v12  ;;  %v593_v3 = vsub.f32 %v553_v48, %v577_v0  ;;  %v574_v9 = vmul.f32 %v562_v49, %v1017_v29 }
 0x10d   : > { %v572_v6 = vmul.f32 %v562_v49, %v1026_v34  ;;  %v591_v14 = vsub.f32 %v551_v50, %v575_v53  ;;  %v547_v30 = vmul.f32 %v534_v42, %v1028_v35  ;;  %v571_v7 = vmul.f32 %v558_v43, %v1030_v36 }
 0x10e   : > { %v594_v11 = vsub.f32 %v554_v52, %v578_v61  ;;  %v592_v4 = vsub.f32 %v552_v1, %v576_v62  ;;  %v590_v12 = vsub.f32 %v550_v8, %v574_v9  ;;  %v546_v28 = vmul.f32 %v538_v47, %v1038_v40  ;;  %v611_v9 = vld [vmem:[#allocation2] sm:$0x3] }
 0x10f   : > { %v570_v31 = vmul.f32 %v562_v49, %v1048_v46  ;;  %v609_v15 = vmul.f32 %v593_v3, %v593_v3  ;;  %v589_v16 = vsub.f32 %v549_v57, %v573_v63  ;;  %v588_v29 = vsub.f32 %v548_v13, %v572_v6 }
 0x110   : > { %v610_v10 = vmul.f32 %v594_v11, %v594_v11  ;;  %v545_v33 = vmul.f32 %v534_v42, %v1057_v51  ;;  %v608_v34 = vmul.f32 %v592_v4, %v592_v4  ;;  %v569_v18 = vmul.f32 %v558_v43, %v1062_v54 }
 0x111   : > { %v544_v22 = vmul.f32 %v538_v47, %v1064_v55  ;;  %v568_v35 = vmul.f32 %v562_v49, %v1066_v56  ;;  %v607_v36 = vmul.f32 %v591_v14, %v591_v14  ;;  %v587_v25 = vsub.f32 %v547_v30, %v571_v7 }
 0x112   : > { %632 = vmatprep.subr.mxu0 %v610_v10  ;;  %v543_v40 = vmul.f32 %v534_v42, %v1070_v58  ;;  %v567_v46 = vmul.f32 %v558_v43, %v1072_v59  ;;  %v606_v26 = vmul.f32 %v590_v12, %v590_v12  ;;  %v586_v27 = vsub.f32 %v546_v28, %v570_v31 }
 0x113   : > { %633 = vmatpush1.msra.mxu0 %v609_v15  ;;  %v542_v51 = vmul.f32 %v538_v47, %v1074_v60  ;;  %v566_v32 = vmul.f32 %v562_v49, %v1084_v5  ;;  %v605_v54 = vmul.f32 %v589_v16, %v589_v16  ;;  %v585_v39 = vsub.f32 %v545_v33, %v569_v18 }
 0x114   : > { %634 = vmatprep.subr.mxu0 %v608_v34  ;;  %v541_v55 = vmul.f32 %v534_v42, %v1092_v17  ;;  %v565_v56 = vmul.f32 %v558_v43, %v1096_v19  ;;  %v604_v41 = vmul.f32 %v588_v29, %v588_v29  ;;  %v584_v44 = vsub.f32 %v544_v22, %v568_v35 }
 0x115   : > { %635 = vmatpush1.msra.mxu0 %v607_v36  ;;  %v540_v58 = vmul.f32 %v538_v47, %v1098_v20  ;;  %v564_v59 = vmul.f32 %v562_v49, %v1100_v21  ;;  %v603_v45 = vmul.f32 %v587_v25, %v587_v25  ;;  %v583_v48 = vsub.f32 %v543_v40, %v567_v46 }
 0x116   : > { %636 = vmatprep.subr.mxu0 %v606_v26  ;;  %v539_v60 = vmul.f32 %v534_v42, %v1104_v23  ;;  %v563_v5 = vmul.f32 %v558_v43, %v1106_v24  ;;  %v602_v0 = vmul.f32 %v586_v27, %v586_v27  ;;  %v582_v50 = vsub.f32 %v542_v51, %v566_v32  ;;  %v612_v42 = vld [vmem:[%s1187_s2] sm:$0x1] }
 0x117   : > { %637 = vmatpush1.msra.mxu0 %v605_v54  ;;  %v601_v17 = vmul.f32 %v585_v39, %v585_v39  ;;  %v581_v19 = vsub.f32 %v541_v55, %v565_v56  ;;  %v600_v52 = vmul.f32 %v584_v44, %v584_v44  ;;  %v580_v1 = vsub.f32 %v540_v58, %v564_v59 }
 0x118   : > { %638 = vmatprep.subr.mxu0 %v604_v41  ;;  %v599_v20 = vmul.f32 %v583_v48, %v583_v48  ;;  %v579_v47 = vsub.f32 %v539_v60, %v563_v5  ;;  %v598_v21 = vmul.f32 %v582_v50, %v582_v50  ;;  %v912_v43 = vmov 1966171168  }
 0x119   : > { %639 = vmatpush1.msra.mxu0 %v603_v45  ;;  %v597_v49 = vmul.f32 %v581_v19, %v581_v19  ;;  %v596_v23 = vmul.f32 %v580_v1, %v580_v1  ;;  %v691_v53 = vunpack.c.l.s4 %v912_v43  ;;  %v722_v11 = vsub.s32 1, %v1122_v37 }
 0x11a   : > { %640 = vmatprep.subr.mxu0 %v602_v0  ;;  %v595_v24 = vmul.f32 %v579_v47, %v579_v47 }
 0x11b   : > { %641 = vmatpush1.msra.mxu0 %v601_v17  ;;  %v692_v57 = vunpack.c.0.s8 %v691_v53 }
 0x11c   : > { %642 = vmatprep.subr.mxu0 %v600_v52 }
 0x11d   : > { %643 = vmatpush1.msra.mxu0 %v599_v20  ;;  %v695_v62 = vsub.s32 %v692_v57, %v1122_v37 }
 0x11e   : > { %644 = vmatprep.subr.mxu0 %v598_v21 }
 0x11f   : > { %645 = vmatpush1.msra.mxu0 %v597_v49 }
 0x120   : > { %646 = vmatprep.subr.mxu0 %v596_v23 }
 0x121   : > { %647 = vmatpush1.msra.mxu0 %v595_v24 }
 0x122   : > { %838 = vmatmul.mubr.msk.f32.vlgmr.msra.gmra.mxu0 %vm333_vm1, %v612_v42 }
 0x1e2   : > { %v682_v61 = vpop.f32.mrf.mxu0 }
 0x1e4   : > { %v684_v8 = vpop.f32.mrf.mxu0 }
 0x1e5   : > { %v689_v63 = vcombine.low %v682_v61, %v684_v8 }
 0x1e7   : > { %v696_v3 = vrot.slane %v689_v63, %v695_v62 }
 0x1e9   : > { %v703_v13 = vrot.slane %v696_v3, %v695_v62 }
 0x1eb   : > { %v705_v6 = vadd.f32 %v703_v13, %v611_v9 }
 0x1ed   : > { %710 = vst.msk [vmem:[#allocation2] sm:$0x3] %vm956_vm0, %v705_v6 }
 0x1f4   : > { %v714_v4 = vld [vmem:[#allocation2] sm:$0x3] }
 0x1f5   : > { %v719_v14 = vrot.slane %v714_v4, %v1125_v38  ;;  %v723_v30 = vrot.slane %v714_v4, %v722_v11 }
 0x1f7   : > { %v727_v7 = vsel %vm726_vm10, %v719_v14, 0.0  ;;  %v728_v10 = vsel %vm726_vm10, %v723_v30, 0.0 }
 0x1f8   : > { %v729_v12 = vadd.f32 %v728_v10, %v727_v7 }
 0x1fa   : > { %730 = vadd.xlane.f32.xlu0 %v729_v12 }
 0x283   : > { %v731_v28 = vpop.xlane.xlu0 %730 }
 0x284   : > { %v732_v31 = vmul.f32 0.00390625, %v731_v28 }
 0x286   : > { %734 = vst.msk [vmem:[%s259_s27] sm:$0x1] %vm733_vm11, %v732_v31 }
 0x287 PF: > { %s13_s14 = sadd.s32 1, %s908_s14   ;;  %s1191_s12 = smov %s904_s13 }
 0x288   : > { %p10_p5 = scmp.ge.s32.totalorder %s13_s14, 4   ;;  %s1192_s13 = smov %s1194_s15 }
 0x28a   :  { %12 = sbr.rel (!%p10_p5) target bundleno = 2 (0x2), region = 73 }

// kernel: pnetlin_forward.6
= control target key start
LH: loop header
LB: loop body
LE: loop exit
PB: predicated region body
PF: predicated region fallthrough
CT: control target
= control target key end

     0   :  { %s1087_s12 = smov 0   ;;  %s1089_s13 = smov 0   ;;  %s1401_s0 = inlined_call_operand.vmem [shape: bf16[2,128,128], index: 0, kind: input, shape index: {}]   ;;  %s1402_s1 = inlined_call_operand.vmem [shape: bf16[2,128,128], index: 1, kind: input, shape index: {}]   ;;  %s1403_s2 = inlined_call_operand.vmem [shape: f32[1,128], index: 2, kind: input, shape index: {}]   ;;  %s1404_s3 = inlined_call_operand.vmem [shape: f32[2,1,1,1], index: 3, kind: output, shape index: {}]  }
   0x1   :  { %s1091_s14 = smov 0  }
   0x2 LB: > { %s32_s15 = sadd.s32 1, %s1058_s13  ;;  %p762_p0 = scmp.ge.s32.totalorder %s1062_s14, 1  ;;  %s1062_s14 = sphi %s1091_s14, %s13_s14   ;;  %s1058_s13 = sphi %s1089_s13, %s1406_s13   ;;  %s1054_s12 = sphi %s1087_s12, %s1405_s12  }
   0x3   : > { %p34_p1 = scmp.ge.s32.totalorder %s32_s15, 2  ;;  %p186_p2 = scmp.lt.s32.totalorder %s1062_s14, 3 }
   0x5   : > { %s1408_s15 = smov (%p34_p1, %s32_s15), 0  ;;  %p187_p3 = pnand %p762_p0, %p186_p2 }
   0x6   : > { %p225_p4 = scmp.lt.s32.totalorder (!%p187_p3), %s1054_s12, 1 }
   0x7   : > { %190 = sbr.rel (%p187_p3) target bundleno = 663 (0x297), region = 32 }
   0xc   : > { %v1064_v0 = vmov 0.0   ;;  %s1410_s12 = smov (!%p225_p4, %s1054_s12), 1  ;;  %vm1065_vm0 = vmmov 0   ;;  %vm659_vm5 = vcmask 1040384   ;;  %vm664_vm6 = vcmask 0  }
   0xd   : > { %900 = vmatprep.subr.mxu0 %v1064_v0  ;;  %254 = vst [vmem:[#allocation2] sm:$0x1] %v1064_v0  ;;  %935 = vmatprep.subr.mxu1 %v1064_v0  ;;  %s769_s16 = sshll.u32 %s1410_s12, 6  ;;  %s249_s27 = scalar_lea.vmem %s1404_s3, %s1410_s12 }
   0xe   : > { %932 = vmatprep.mubr.msk.f32.mxu0 %vm1065_vm0, %v1064_v0  ;;  %967 = vmatprep.mubr.msk.f32.mxu1 %vm1065_vm0, %v1064_v0  ;;  %s1118_s19 = scalar_lea.vmem %s1401_s0, %s769_s16  ;;  %s1123_s22 = scalar_lea.vmem %s1402_s1, %s769_s16 }
   0xf   : > { %v841_v1 = vld [vmem:[%s1118_s19 + $0x38] sm:$0xff]   ;;  %v840_v3 = vld [vmem:[%s1118_s19 + $0x30] sm:$0xff]   ;;  %v839_v13 = vld [vmem:[%s1118_s19 + $0x28] sm:$0xff]  }
  0x10   : > { %v848_v2 = vld [vmem:[%s1123_s22 + $0x38] sm:$0xff]   ;;  %v1128_v4 = vunpack.c.l.bf16 %v841_v1  ;;  %v1130_v5 = vunpack.c.h.bf16 %v841_v1  ;;  %v847_v8 = vld [vmem:[%s1123_s22 + $0x30] sm:$0xff]   ;;  %v1137_v9 = vunpack.c.h.bf16 %v840_v3  ;;  %v1141_v11 = vunpack.c.l.bf16 %v840_v3  ;;  %v846_v14 = vld [vmem:[%s1123_s22 + $0x28] sm:$0xff]  }
  0x11   : > { %v1132_v6 = vunpack.c.l.bf16 %v848_v2  ;;  %v1134_v7 = vunpack.c.h.bf16 %v848_v2  ;;  %v1139_v10 = vunpack.c.h.bf16 %v847_v8  ;;  %v1143_v12 = vunpack.c.l.bf16 %v847_v8  ;;  %v838_v23 = vld [vmem:[%s1118_s19 + $0x20] sm:$0xff]   ;;  %v837_v33 = vld [vmem:[%s1118_s19 + $0x18] sm:$0xff]   ;;  %v836_v43 = vld [vmem:[%s1118_s19 + $0x10] sm:$0xff]  }
  0x12   : > { %v334_v15 = vmul.f32 %v1130_v5, %v1130_v5  ;;  %v333_v17 = vmul.f32 %v1128_v4, %v1128_v4  ;;  %v332_v19 = vmul.f32 %v1137_v9, %v1137_v9  ;;  %v1159_v21 = vunpack.c.h.bf16 %v839_v13  ;;  %v845_v24 = vld [vmem:[%s1123_s22 + $0x20] sm:$0xff]   ;;  %v844_v34 = vld [vmem:[%s1123_s22 + $0x18] sm:$0xff]   ;;  %v843_v44 = vld [vmem:[%s1123_s22 + $0x10] sm:$0xff]  }
  0x13   : > { %v420_v16 = vmul.f32 %v1134_v7, %v1134_v7  ;;  %v419_v18 = vmul.f32 %v1132_v6, %v1132_v6  ;;  %v418_v20 = vmul.f32 %v1139_v10, %v1139_v10  ;;  %v1161_v22 = vunpack.c.h.bf16 %v846_v14  ;;  %v835_v53 = vld [vmem:[%s1118_s19 + $0x8] sm:$0xff]   ;;  %v772_v63 = vld [vmem:[%s1118_s19] sm:$0xff]  }
  0x14   : > { %901 = vmatpush3.msra.mxu0 %v334_v15  ;;  %v331_v25 = vmul.f32 %v1141_v11, %v1141_v11  ;;  %v417_v26 = vmul.f32 %v1143_v12, %v1143_v12  ;;  %v1171_v27 = vunpack.c.l.bf16 %v839_v13  ;;  %v1173_v28 = vunpack.c.l.bf16 %v846_v14  ;;  %v842_v54 = vld [vmem:[%s1123_s22 + $0x8] sm:$0xff]   ;;  %v804_v1 = vld [vmem:[%s1123_s22] sm:$0xff]  }
  0x15   : > { %936 = vmatpush3.msra.mxu1 %v420_v16  ;;  %902 = vmatprep.subr.mxu0 %v1064_v0  ;;  %v330_v29 = vmul.f32 %v1159_v21, %v1159_v21  ;;  %v416_v30 = vmul.f32 %v1161_v22, %v1161_v22  ;;  %v1181_v31 = vunpack.c.h.bf16 %v838_v23  ;;  %v1183_v32 = vunpack.c.h.bf16 %v845_v24 }
  0x16   : > { %937 = vmatprep.subr.mxu1 %v1064_v0  ;;  %903 = vmatpush3.msra.mxu0 %v333_v17  ;;  %v329_v35 = vmul.f32 %v1171_v27, %v1171_v27  ;;  %v415_v36 = vmul.f32 %v1173_v28, %v1173_v28  ;;  %v1193_v37 = vunpack.c.l.bf16 %v838_v23  ;;  %v1195_v38 = vunpack.c.l.bf16 %v845_v24 }
  0x17   : > { %938 = vmatpush3.msra.mxu1 %v419_v18  ;;  %904 = vmatprep.subr.mxu0 %v1064_v0  ;;  %v328_v39 = vmul.f32 %v1181_v31, %v1181_v31  ;;  %v414_v40 = vmul.f32 %v1183_v32, %v1183_v32  ;;  %v1203_v41 = vunpack.c.h.bf16 %v837_v33  ;;  %v1205_v42 = vunpack.c.h.bf16 %v844_v34 }
  0x18   : > { %939 = vmatprep.subr.mxu1 %v1064_v0  ;;  %905 = vmatpush3.msra.mxu0 %v332_v19  ;;  %v327_v45 = vmul.f32 %v1193_v37, %v1193_v37  ;;  %v413_v46 = vmul.f32 %v1195_v38, %v1195_v38  ;;  %v1215_v47 = vunpack.c.l.bf16 %v837_v33  ;;  %v1217_v48 = vunpack.c.l.bf16 %v844_v34 }
  0x19   : > { %940 = vmatpush3.msra.mxu1 %v418_v20  ;;  %906 = vmatprep.subr.mxu0 %v1064_v0  ;;  %v326_v49 = vmul.f32 %v1203_v41, %v1203_v41  ;;  %v412_v50 = vmul.f32 %v1205_v42, %v1205_v42  ;;  %v1225_v51 = vunpack.c.h.bf16 %v836_v43  ;;  %v1227_v52 = vunpack.c.h.bf16 %v843_v44 }
  0x1a   : > { %941 = vmatprep.subr.mxu1 %v1064_v0  ;;  %907 = vmatpush3.msra.mxu0 %v331_v25  ;;  %v325_v55 = vmul.f32 %v1215_v47, %v1215_v47  ;;  %v411_v56 = vmul.f32 %v1217_v48, %v1217_v48  ;;  %v1237_v57 = vunpack.c.l.bf16 %v836_v43  ;;  %v1239_v58 = vunpack.c.l.bf16 %v843_v44 }
  0x1b   : > { %942 = vmatpush3.msra.mxu1 %v417_v26  ;;  %908 = vmatprep.subr.mxu0 %v1064_v0  ;;  %v324_v59 = vmul.f32 %v1225_v51, %v1225_v51  ;;  %v410_v60 = vmul.f32 %v1227_v52, %v1227_v52  ;;  %v1247_v61 = vunpack.c.h.bf16 %v835_v53  ;;  %v1249_v62 = vunpack.c.h.bf16 %v842_v54 }
  0x1c   : > { %943 = vmatprep.subr.mxu1 %v1064_v0  ;;  %909 = vmatpush3.msra.mxu0 %v330_v29  ;;  %v323_v2 = vmul.f32 %v1237_v57, %v1237_v57  ;;  %v409_v3 = vmul.f32 %v1239_v58, %v1239_v58  ;;  %v1259_v8 = vunpack.c.l.bf16 %v835_v53  ;;  %v1261_v13 = vunpack.c.l.bf16 %v842_v54 }
  0x1d   : > { %944 = vmatpush3.msra.mxu1 %v416_v30  ;;  %910 = vmatprep.subr.mxu0 %v1064_v0  ;;  %v322_v14 = vmul.f32 %v1247_v61, %v1247_v61  ;;  %v408_v15 = vmul.f32 %v1249_v62, %v1249_v62  ;;  %v1269_v16 = vunpack.c.h.bf16 %v772_v63  ;;  %v1271_v17 = vunpack.c.h.bf16 %v804_v1 }
  0x1e   : > { %945 = vmatprep.subr.mxu1 %v1064_v0  ;;  %911 = vmatpush3.msra.mxu0 %v329_v35  ;;  %v321_v18 = vmul.f32 %v1259_v8, %v1259_v8  ;;  %v407_v19 = vmul.f32 %v1261_v13, %v1261_v13  ;;  %v1279_v20 = vunpack.c.l.bf16 %v772_v63  ;;  %v1281_v23 = vunpack.c.l.bf16 %v804_v1 }
  0x1f   : > { %946 = vmatpush3.msra.mxu1 %v415_v36  ;;  %912 = vmatprep.subr.mxu0 %v1064_v0  ;;  %v320_v24 = vmul.f32 %v1269_v16, %v1269_v16  ;;  %v406_v25 = vmul.f32 %v1271_v17, %v1271_v17  ;;  %v1066_v30 = vmov 1.0  }
  0x20   : > { %947 = vmatprep.subr.mxu1 %v1064_v0  ;;  %913 = vmatpush3.msra.mxu0 %v328_v39  ;;  %v319_v26 = vmul.f32 %v1279_v20, %v1279_v20  ;;  %v405_v29 = vmul.f32 %v1281_v23, %v1281_v23 }
  0x21   : > { %948 = vmatpush3.msra.mxu1 %v414_v40  ;;  %914 = vmatprep.subr.mxu0 %v1064_v0 }
  0x22   : > { %949 = vmatprep.subr.mxu1 %v1064_v0  ;;  %915 = vmatpush3.msra.mxu0 %v327_v45 }
  0x23   : > { %950 = vmatpush3.msra.mxu1 %v413_v46  ;;  %916 = vmatprep.subr.mxu0 %v1064_v0 }
  0x24   : > { %951 = vmatprep.subr.mxu1 %v1064_v0  ;;  %917 = vmatpush3.msra.mxu0 %v326_v49 }
  0x25   : > { %952 = vmatpush3.msra.mxu1 %v412_v50  ;;  %918 = vmatprep.subr.mxu0 %v1064_v0 }
  0x26   : > { %953 = vmatprep.subr.mxu1 %v1064_v0  ;;  %919 = vmatpush3.msra.mxu0 %v325_v55 }
  0x27   : > { %954 = vmatpush3.msra.mxu1 %v411_v56  ;;  %920 = vmatprep.subr.mxu0 %v1064_v0 }
  0x28   : > { %955 = vmatprep.subr.mxu1 %v1064_v0  ;;  %921 = vmatpush3.msra.mxu0 %v324_v59  ;;  %v509_v59 = vlaneseq }
  0x29   : > { %956 = vmatpush3.msra.mxu1 %v410_v60  ;;  %922 = vmatprep.subr.mxu0 %v1064_v0 }
  0x2a   : > { %957 = vmatprep.subr.mxu1 %v1064_v0  ;;  %923 = vmatpush3.msra.mxu0 %v323_v2  ;;  %v510_v60 = vshrl.u32 %v509_v59, 7 }
  0x2b   : > { %958 = vmatpush3.msra.mxu1 %v409_v3  ;;  %924 = vmatprep.subr.mxu0 %v1064_v0 }
  0x2c   : > { %959 = vmatprep.subr.mxu1 %v1064_v0  ;;  %925 = vmatpush3.msra.mxu0 %v322_v14  ;;  %v511_v63 = vsub.s32 0, %v510_v60 }
  0x2d   : > { %960 = vmatpush3.msra.mxu1 %v408_v15  ;;  %926 = vmatprep.subr.mxu0 %v1064_v0 }
  0x2e   : > { %961 = vmatprep.subr.mxu1 %v1064_v0  ;;  %927 = vmatpush3.msra.mxu0 %v321_v18 }
  0x2f   : > { %962 = vmatpush3.msra.mxu1 %v407_v19  ;;  %928 = vmatprep.subr.mxu0 %v1064_v0 }
  0x30   : > { %963 = vmatprep.subr.mxu1 %v1064_v0  ;;  %929 = vmatpush3.msra.mxu0 %v320_v24 }
  0x31   : > { %964 = vmatpush3.msra.mxu1 %v406_v25  ;;  %930 = vmatprep.subr.mxu0 %v1064_v0 }
  0x32   : > { %965 = vmatprep.subr.mxu1 %v1064_v0  ;;  %931 = vmatpush3.msra.mxu0 %v319_v26 }
  0x33   : > { %966 = vmatpush3.msra.mxu1 %v405_v29  ;;  %933 = vmatmul.mubr.f32.vlgmr.msra.gmra.mxu0 %v1066_v30 }
  0x34   : > { %968 = vmatmul.mubr.f32.vlgmr.msra.gmra.mxu1 %v1066_v30  ;;  %970 = vmatprep.subr.mxu0 %v1064_v0 }
  0x35   : > { %1002 = vmatprep.mubr.msk.f32.mxu0 %vm1065_vm0, %v1064_v0 }
  0xf3   : > { %v401_v33 = vpop.f32.mrf.mxu0 }
  0xf4   : > { %v487_v34 = vpop.f32.mrf.mxu1  ;;  %1032 = vrsqrt.f32 %v401_v33  ;;  %vm493_vm1 = vcmp.eq.f32.partialorder %v401_v33, inf  ;;  %v496_v44 = vand.u32 2147483648, %v401_v33  ;;  %vm495_vm2 = vcmp.eq.f32.partialorder %v401_v33, 0.0 }
  0xf5   : > { %1034 = vrsqrt.f32 %v487_v34  ;;  %v934_v35 = vpop.f32.mrf.mxu0  ;;  %vm502_vm3 = vcmp.eq.f32.partialorder %v487_v34, inf  ;;  %v505_v49 = vand.u32 2147483648, %v487_v34  ;;  %vm504_vm4 = vcmp.eq.f32.partialorder %v487_v34, 0.0 }
  0xf6   : > { %v969_v36 = vpop.f32.mrf.mxu1 }
 0x101   : > { %v1033_v39 = vpop.eup %1032 }
 0x102   : > { %v1035_v40 = vpop.eup %1034  ;;  %v492_v43 = vmul.f32 %v1033_v39, %v401_v33 }
 0x103   : > { %v501_v45 = vmul.f32 %v1035_v40, %v487_v34 }
 0x104   : > { %v494_v46 = vsel %vm493_vm1, %v401_v33, %v492_v43 }
 0x105   : > { %v497_v50 = vsel %vm495_vm2, %v496_v44, %v494_v46  ;;  %v503_v53 = vsel %vm502_vm3, %v487_v34, %v501_v45 }
 0x106   : > { %v498_v54 = vadd.f32 1e-10, %v497_v50  ;;  %v506_v55 = vsel %vm504_vm4, %v505_v49, %v503_v53 }
 0x107   : > { %v507_v56 = vadd.f32 1e-10, %v506_v55 }
 0x108   : > { %1036 = vrcp.f32 %v498_v54 }
 0x109   : > { %1038 = vrcp.f32 %v507_v56 }
 0x115   : > { %v1037_v1 = vpop.eup %1036 }
 0x116   : > { %v1039_v2 = vpop.eup %1038  ;;  %v1302_v3 = vrot.slane %v1037_v1, %v511_v63 }
 0x117   : > { %v1304_v14 = vrot.slane %v1039_v2, %v511_v63 }
 0x118   : > { %v528_v15 = vmul.f32 %v1130_v5, %v1302_v3  ;;  %v527_v18 = vmul.f32 %v1128_v4, %v1302_v3  ;;  %v526_v25 = vmul.f32 %v1137_v9, %v1302_v3  ;;  %v525_v5 = vmul.f32 %v1141_v11, %v1302_v3 }
 0x119   : > { %v548_v19 = vmul.f32 %v1134_v7, %v1304_v14  ;;  %v547_v24 = vmul.f32 %v1132_v6, %v1304_v14  ;;  %v546_v26 = vmul.f32 %v1139_v10, %v1304_v14  ;;  %v545_v4 = vmul.f32 %v1143_v12, %v1304_v14 }
 0x11a   : > { %v524_v7 = vmul.f32 %v1159_v21, %v1302_v3  ;;  %v544_v6 = vmul.f32 %v1161_v22, %v1304_v14  ;;  %v523_v10 = vmul.f32 %v1171_v27, %v1302_v3  ;;  %v543_v11 = vmul.f32 %v1173_v28, %v1304_v14 }
 0x11b   : > { %v564_v29 = vsub.f32 %v528_v15, %v548_v19  ;;  %v563_v30 = vsub.f32 %v527_v18, %v547_v24  ;;  %v562_v34 = vsub.f32 %v526_v25, %v546_v26  ;;  %v561_v35 = vsub.f32 %v525_v5, %v545_v4 }
 0x11c   : > { %v560_v36 = vsub.f32 %v524_v7, %v544_v6  ;;  %v522_v21 = vmul.f32 %v1181_v31, %v1302_v3  ;;  %v542_v22 = vmul.f32 %v1183_v32, %v1304_v14  ;;  %v559_v40 = vsub.f32 %v523_v10, %v543_v11 }
 0x11d   : > { %v580_v33 = vmul.f32 %v564_v29, %v564_v29  ;;  %v579_v9 = vmul.f32 %v563_v30, %v563_v30  ;;  %v578_v12 = vmul.f32 %v562_v34, %v562_v34  ;;  %v577_v39 = vmul.f32 %v561_v35, %v561_v35 }
 0x11e   : > { %v521_v27 = vmul.f32 %v1193_v37, %v1302_v3  ;;  %v541_v28 = vmul.f32 %v1195_v38, %v1304_v14  ;;  %v576_v43 = vmul.f32 %v560_v36, %v560_v36  ;;  %v558_v44 = vsub.f32 %v522_v21, %v542_v22 }
 0x11f   : > { %971 = vmatpush3.msra.mxu0 %v580_v33  ;;  %v520_v31 = vmul.f32 %v1203_v41, %v1302_v3  ;;  %v540_v32 = vmul.f32 %v1205_v42, %v1304_v14  ;;  %v575_v45 = vmul.f32 %v559_v40, %v559_v40  ;;  %v519_v37 = vmul.f32 %v1215_v47, %v1302_v3 }
 0x120   : > { %972 = vmatprep.subr.mxu0 %v1064_v0  ;;  %v557_v46 = vsub.f32 %v521_v27, %v541_v28  ;;  %v539_v38 = vmul.f32 %v1217_v48, %v1304_v14  ;;  %v574_v49 = vmul.f32 %v558_v44, %v558_v44  ;;  %v518_v41 = vmul.f32 %v1225_v51, %v1302_v3 }
 0x121   : > { %973 = vmatpush3.msra.mxu0 %v579_v9  ;;  %v556_v50 = vsub.f32 %v520_v31, %v540_v32  ;;  %v538_v42 = vmul.f32 %v1227_v52, %v1304_v14  ;;  %v517_v47 = vmul.f32 %v1237_v57, %v1302_v3  ;;  %v537_v48 = vmul.f32 %v1239_v58, %v1304_v14 }
 0x122   : > { %974 = vmatprep.subr.mxu0 %v1064_v0  ;;  %v573_v53 = vmul.f32 %v557_v46, %v557_v46  ;;  %v555_v54 = vsub.f32 %v519_v37, %v539_v38  ;;  %v516_v51 = vmul.f32 %v1247_v61, %v1302_v3  ;;  %v536_v52 = vmul.f32 %v1249_v62, %v1304_v14 }
 0x123   : > { %975 = vmatpush3.msra.mxu0 %v578_v12  ;;  %v572_v55 = vmul.f32 %v556_v50, %v556_v50  ;;  %v554_v56 = vsub.f32 %v518_v41, %v538_v42  ;;  %v553_v60 = vsub.f32 %v517_v47, %v537_v48  ;;  %v515_v57 = vmul.f32 %v1259_v8, %v1302_v3 }
 0x124   : > { %976 = vmatprep.subr.mxu0 %v1064_v0  ;;  %v571_v59 = vmul.f32 %v555_v54, %v555_v54  ;;  %v535_v58 = vmul.f32 %v1261_v13, %v1304_v14  ;;  %v552_v1 = vsub.f32 %v516_v51, %v536_v52  ;;  %v514_v61 = vmul.f32 %v1269_v16, %v1302_v3 }
 0x125   : > { %977 = vmatpush3.msra.mxu0 %v577_v39  ;;  %v570_v63 = vmul.f32 %v554_v56, %v554_v56  ;;  %v534_v62 = vmul.f32 %v1271_v17, %v1304_v14  ;;  %v569_v2 = vmul.f32 %v553_v60, %v553_v60  ;;  %v513_v8 = vmul.f32 %v1279_v20, %v1302_v3  ;;  %v581_v3 = vld [vmem:[#allocation2] sm:$0x1] }
 0x126   : > { %978 = vmatprep.subr.mxu0 %v1064_v0  ;;  %v551_v15 = vsub.f32 %v515_v57, %v535_v58  ;;  %v533_v13 = vmul.f32 %v1281_v23, %v1304_v14  ;;  %v568_v18 = vmul.f32 %v552_v1, %v552_v1  ;;  %v582_v23 = vld [vmem:[%s1403_s2] sm:$0x1] }
 0x127   : > { %979 = vmatpush3.msra.mxu0 %v576_v43  ;;  %v550_v19 = vsub.f32 %v514_v61, %v534_v62 }
 0x128   : > { %980 = vmatprep.subr.mxu0 %v1064_v0  ;;  %v567_v16 = vmul.f32 %v551_v15, %v551_v15  ;;  %v549_v17 = vsub.f32 %v513_v8, %v533_v13 }
 0x129   : > { %981 = vmatpush3.msra.mxu0 %v575_v45  ;;  %v566_v24 = vmul.f32 %v550_v19, %v550_v19 }
 0x12a   : > { %982 = vmatprep.subr.mxu0 %v1064_v0  ;;  %v565_v20 = vmul.f32 %v549_v17, %v549_v17 }
 0x12b   : > { %983 = vmatpush3.msra.mxu0 %v574_v49 }
 0x12c   : > { %984 = vmatprep.subr.mxu0 %v1064_v0 }
 0x12d   : > { %985 = vmatpush3.msra.mxu0 %v573_v53 }
 0x12e   : > { %986 = vmatprep.subr.mxu0 %v1064_v0 }
 0x12f   : > { %987 = vmatpush3.msra.mxu0 %v572_v55 }
 0x130   : > { %988 = vmatprep.subr.mxu0 %v1064_v0 }
 0x131   : > { %989 = vmatpush3.msra.mxu0 %v571_v59 }
 0x132   : > { %990 = vmatprep.subr.mxu0 %v1064_v0 }
 0x133   : > { %991 = vmatpush3.msra.mxu0 %v570_v63 }
 0x134   : > { %992 = vmatprep.subr.mxu0 %v1064_v0 }
 0x135   : > { %993 = vmatpush3.msra.mxu0 %v569_v2 }
 0x136   : > { %994 = vmatprep.subr.mxu0 %v1064_v0 }
 0x137   : > { %995 = vmatpush3.msra.mxu0 %v568_v18 }
 0x138   : > { %996 = vmatprep.subr.mxu0 %v1064_v0 }
 0x139   : > { %997 = vmatpush3.msra.mxu0 %v567_v16 }
 0x13a   : > { %998 = vmatprep.subr.mxu0 %v1064_v0 }
 0x13b   : > { %999 = vmatpush3.msra.mxu0 %v566_v24 }
 0x13c   : > { %1000 = vmatprep.subr.mxu0 %v1064_v0 }
 0x13d   : > { %1001 = vmatpush3.msra.mxu0 %v565_v20 }
 0x13e   : > { %1003 = vmatmul.mubr.f32.vlgmr.msra.gmra.mxu0 %v582_v23 }
 0x1fe   : > { %v649_v14 = vpop.f32.mrf.mxu0 }
 0x1ff   : > { %v653_v25 = vadd.f32 %v649_v14, %v581_v3 }
 0x200   : > { %v1004_v26 = vpop.f32.mrf.mxu0 }
 0x201   : > { %654 = vst [vmem:[#allocation2] sm:$0x1] %v653_v25 }
 0x208   : > { %v658_v29 = vld [vmem:[#allocation2] sm:$0x1] }
 0x209   : > { %v660_v30 = vsel %vm659_vm5, %v658_v29, 0.0 }
 0x20a   : > { %661 = vadd.xlane.f32.xlu0 %v660_v30 }
 0x293   : > { %v662_v5 = vpop.xlane.xlu0 %661 }
 0x294   : > { %v663_v4 = vmul.f32 0.015625, %v662_v5 }
 0x296   : > { %665 = vst.msk [vmem:[%s249_s27] sm:$0x1] %vm664_vm6, %v663_v4 }
 0x297 PF: > { %s13_s14 = sadd.s32 1, %s1062_s14   ;;  %s1405_s12 = smov %s1058_s13 }
 0x298   : > { %p10_p5 = scmp.ge.s32.totalorder %s13_s14, 4   ;;  %s1406_s13 = smov %s1408_s15 }
 0x29a   :  { %12 = sbr.rel (!%p10_p5) target bundleno = 2 (0x2), region = 73 }

// kernel: pnetlin_forward.7
= control target key start
LH: loop header
LB: loop body
LE: loop exit
PB: predicated region body
PF: predicated region fallthrough
CT: control target
= control target key end

     0   :  { %s1285_s12 = smov 0   ;;  %s1287_s13 = smov 0   ;;  %s1768_s0 = inlined_call_operand.vmem [shape: bf16[2,256,128], index: 0, kind: input, shape index: {}]   ;;  %s1769_s1 = inlined_call_operand.vmem [shape: bf16[2,256,128], index: 1, kind: input, shape index: {}]   ;;  %s1770_s2 = inlined_call_operand.vmem [shape: f32[1,256], index: 2, kind: input, shape index: {}]   ;;  %s1771_s3 = inlined_call_operand.vmem [shape: f32[2,1,1,1], index: 3, kind: output, shape index: {}]  }
   0x1   :  { %s1289_s14 = smov 0  }
   0x2 LB: > { %s32_s15 = sadd.s32 1, %s1257_s13  ;;  %p933_p0 = scmp.ge.s32.totalorder %s1261_s14, 1  ;;  %s1261_s14 = sphi %s1289_s14, %s13_s14   ;;  %s1257_s13 = sphi %s1287_s13, %s1837_s13   ;;  %s1253_s12 = sphi %s1285_s12, %s1836_s12  }
   0x3   : > { %p34_p1 = scmp.ge.s32.totalorder %s32_s15, 2  ;;  %p186_p2 = scmp.lt.s32.totalorder %s1261_s14, 3 }
   0x5   : > { %s1839_s15 = smov (%p34_p1, %s32_s15), 0  ;;  %p187_p3 = pnand %p933_p0, %p186_p2 }
   0x7   : > { %190 = sbr.rel (%p187_p3) target bundleno = 676 (0x2a4), region = 32 }
   0xc   : > { %p225_p4 = scmp.lt.s32.totalorder %s1253_s12, 1  ;;  %v1772_v0 = vmov 1.0   ;;  %vm830_vm4 = vcmask 1040384   ;;  %vm835_vm5 = vcmask 0  }
   0xd   : > { %479 = vmatprep.mubr.f32.mxu0 %v1772_v0  ;;  %581 = vmatprep.mubr.f32.mxu1 %v1772_v0 }
   0xe   : > { %s1841_s12 = smov (!%p225_p4, %s1253_s12), 1 }
   0xf   : > { %s940_s16 = sshll.u32 %s1841_s12, 7  ;;  %s249_s27 = scalar_lea.vmem %s1771_s3, %s1841_s12 }
  0x10   : > { %s1311_s19 = scalar_lea.vmem %s1768_s0, %s940_s16  ;;  %s1316_s22 = scalar_lea.vmem %s1769_s1, %s940_s16 }
  0x11   : > { %v1084_v1 = vld [vmem:[%s1311_s19 + $0x78] sm:$0xff]   ;;  %v1083_v9 = vld [vmem:[%s1311_s19 + $0x70] sm:$0xff]   ;;  %v1082_v25 = vld [vmem:[%s1311_s19 + $0x68] sm:$0xff]  }
  0x12   : > { %v1099_v2 = vld [vmem:[%s1316_s22 + $0x78] sm:$0xff]   ;;  %v1321_v4 = vunpack.c.l.bf16 %v1084_v1  ;;  %v1323_v5 = vunpack.c.h.bf16 %v1084_v1  ;;  %v1098_v14 = vld [vmem:[%s1316_s22 + $0x70] sm:$0xff]   ;;  %v1359_v26 = vunpack.c.h.bf16 %v1083_v9  ;;  %v1097_v30 = vld [vmem:[%s1316_s22 + $0x68] sm:$0xff]   ;;  %v1368_v31 = vunpack.c.l.bf16 %v1083_v9 }
  0x13   : > { %v1076_v3 = vld [vmem:[%s1311_s19 + $0x38] sm:$0xff]   ;;  %v1325_v6 = vunpack.c.l.bf16 %v1099_v2  ;;  %v1327_v7 = vunpack.c.h.bf16 %v1099_v2  ;;  %v1075_v15 = vld [vmem:[%s1311_s19 + $0x30] sm:$0xff]   ;;  %v1361_v27 = vunpack.c.h.bf16 %v1098_v14  ;;  %v1370_v32 = vunpack.c.l.bf16 %v1098_v14  ;;  %v1074_v35 = vld [vmem:[%s1311_s19 + $0x28] sm:$0xff]  }
  0x14   : > { %v1091_v8 = vld [vmem:[%s1316_s22 + $0x38] sm:$0xff]   ;;  %v1331_v10 = vunpack.c.l.bf16 %v1076_v3  ;;  %v1333_v11 = vunpack.c.h.bf16 %v1076_v3  ;;  %v1090_v16 = vld [vmem:[%s1316_s22 + $0x30] sm:$0xff]   ;;  %v414_v17 = vmul.f32 %v1323_v5, %v1323_v5  ;;  %v413_v19 = vmul.f32 %v1321_v4, %v1321_v4  ;;  %v1089_v40 = vld [vmem:[%s1316_s22 + $0x28] sm:$0xff]  }
  0x15   : > { %v1335_v12 = vunpack.c.l.bf16 %v1091_v8  ;;  %v1337_v13 = vunpack.c.h.bf16 %v1091_v8  ;;  %v516_v18 = vmul.f32 %v1327_v7, %v1327_v7  ;;  %v515_v20 = vmul.f32 %v1325_v6, %v1325_v6  ;;  %v1081_v45 = vld [vmem:[%s1311_s19 + $0x60] sm:$0xff]   ;;  %v1080_v2 = vld [vmem:[%s1311_s19 + $0x58] sm:$0xff]   ;;  %v1085_v0 = vld [vmem:[%s1316_s22 + $0x8] sm:$0xff]  }
  0x16   : > { %v398_v21 = vmul.f32 %v1333_v11, %v1333_v11  ;;  %v397_v23 = vmul.f32 %v1331_v10, %v1331_v10  ;;  %1100 = vmatprep.subr.mxu0 %v414_v17  ;;  %v1363_v28 = vunpack.c.h.bf16 %v1075_v15  ;;  %v1365_v29 = vunpack.c.h.bf16 %v1090_v16  ;;  %v1096_v50 = vld [vmem:[%s1316_s22 + $0x60] sm:$0xff]  }
  0x17   : > { %v500_v22 = vmul.f32 %v1337_v13, %v1337_v13  ;;  %v499_v24 = vmul.f32 %v1335_v12, %v1335_v12  ;;  %1135 = vmatprep.subr.mxu1 %v516_v18  ;;  %v1372_v33 = vunpack.c.l.bf16 %v1075_v15  ;;  %v1374_v34 = vunpack.c.l.bf16 %v1090_v16  ;;  %v1073_v55 = vld [vmem:[%s1311_s19 + $0x20] sm:$0xff]   ;;  %v1095_v15 = vld [vmem:[%s1316_s22 + $0x58] sm:$0xff]  }
  0x18   : > { %1101 = vmatpush3.msra.mxu0 %v398_v21  ;;  %v412_v36 = vmul.f32 %v1359_v26, %v1359_v26  ;;  %v514_v37 = vmul.f32 %v1361_v27, %v1361_v27  ;;  %v396_v38 = vmul.f32 %v1363_v28, %v1363_v28  ;;  %v1383_v39 = vunpack.c.h.bf16 %v1082_v25  ;;  %v1088_v60 = vld [vmem:[%s1316_s22 + $0x20] sm:$0xff]  }
  0x19   : > { %1136 = vmatpush3.msra.mxu1 %v500_v22  ;;  %1102 = vmatprep.subr.mxu0 %v413_v19  ;;  %v498_v41 = vmul.f32 %v1365_v29, %v1365_v29  ;;  %v411_v42 = vmul.f32 %v1368_v31, %v1368_v31  ;;  %v513_v43 = vmul.f32 %v1370_v32, %v1370_v32  ;;  %v1392_v44 = vunpack.c.h.bf16 %v1097_v30 }
  0x1a   : > { %1137 = vmatprep.subr.mxu1 %v515_v20  ;;  %1103 = vmatpush3.msra.mxu0 %v397_v23  ;;  %v395_v46 = vmul.f32 %v1372_v33, %v1372_v33  ;;  %v497_v47 = vmul.f32 %v1374_v34, %v1374_v34  ;;  %v410_v48 = vmul.f32 %v1383_v39, %v1383_v39  ;;  %v1401_v49 = vunpack.c.h.bf16 %v1074_v35  ;;  %v1072_v20 = vld [vmem:[%s1311_s19 + $0x18] sm:$0xff]  }
  0x1b   : > { %1138 = vmatpush3.msra.mxu1 %v499_v24  ;;  %1104 = vmatprep.subr.mxu0 %v412_v36  ;;  %v512_v51 = vmul.f32 %v1392_v44, %v1392_v44  ;;  %v1406_v52 = vunpack.c.h.bf16 %v1089_v40  ;;  %v1408_v53 = vunpack.c.l.bf16 %v1082_v25  ;;  %v1410_v54 = vunpack.c.l.bf16 %v1097_v30  ;;  %v1087_v25 = vld [vmem:[%s1316_s22 + $0x18] sm:$0xff]  }
  0x1c   : > { %1139 = vmatprep.subr.mxu1 %v514_v37  ;;  %1105 = vmatpush3.msra.mxu0 %v396_v38  ;;  %v394_v56 = vmul.f32 %v1401_v49, %v1401_v49  ;;  %v1415_v57 = vunpack.c.l.bf16 %v1074_v35  ;;  %v1417_v58 = vunpack.c.l.bf16 %v1089_v40  ;;  %v1419_v59 = vunpack.c.h.bf16 %v1081_v45  ;;  %v1079_v38 = vld [vmem:[%s1311_s19 + $0x50] sm:$0xff]  }
  0x1d   : > { %1140 = vmatpush3.msra.mxu1 %v498_v41  ;;  %1106 = vmatprep.subr.mxu0 %v411_v42  ;;  %v496_v61 = vmul.f32 %v1406_v52, %v1406_v52  ;;  %v409_v62 = vmul.f32 %v1408_v53, %v1408_v53  ;;  %v511_v63 = vmul.f32 %v1410_v54, %v1410_v54  ;;  %v1428_v1 = vunpack.c.h.bf16 %v1096_v50 }
  0x1e   : > { %1141 = vmatprep.subr.mxu1 %v513_v43  ;;  %1107 = vmatpush3.msra.mxu0 %v395_v46  ;;  %v393_v3 = vmul.f32 %v1415_v57, %v1415_v57  ;;  %v495_v8 = vmul.f32 %v1417_v58, %v1417_v58  ;;  %v408_v9 = vmul.f32 %v1419_v59, %v1419_v59  ;;  %v1437_v14 = vunpack.c.h.bf16 %v1073_v55 }
  0x1f   : > { %1142 = vmatpush3.msra.mxu1 %v497_v47  ;;  %1108 = vmatprep.subr.mxu0 %v410_v48  ;;  %v510_v16 = vmul.f32 %v1428_v1, %v1428_v1  ;;  %v1442_v17 = vunpack.c.h.bf16 %v1088_v60  ;;  %v1444_v18 = vunpack.c.l.bf16 %v1081_v45  ;;  %v1446_v19 = vunpack.c.l.bf16 %v1096_v50  ;;  %v1094_v45 = vld [vmem:[%s1316_s22 + $0x50] sm:$0xff]  }
  0x20   : > { %1143 = vmatprep.subr.mxu1 %v512_v51  ;;  %1109 = vmatpush3.msra.mxu0 %v394_v56  ;;  %v392_v21 = vmul.f32 %v1437_v14, %v1437_v14  ;;  %v1451_v22 = vunpack.c.l.bf16 %v1073_v55  ;;  %v1453_v23 = vunpack.c.l.bf16 %v1088_v60  ;;  %v1455_v24 = vunpack.c.h.bf16 %v1080_v2  ;;  %v1071_v51 = vld [vmem:[%s1311_s19 + $0x10] sm:$0xff]  }
  0x21   : > { %1144 = vmatpush3.msra.mxu1 %v496_v61  ;;  %1110 = vmatprep.subr.mxu0 %v409_v62  ;;  %v494_v30 = vmul.f32 %v1442_v17, %v1442_v17  ;;  %v407_v35 = vmul.f32 %v1444_v18, %v1444_v18  ;;  %v509_v36 = vmul.f32 %v1446_v19, %v1446_v19  ;;  %v1464_v37 = vunpack.c.h.bf16 %v1095_v15  ;;  %v1086_v62 = vld [vmem:[%s1316_s22 + $0x10] sm:$0xff]  }
  0x22   : > { %1145 = vmatprep.subr.mxu1 %v511_v63  ;;  %1111 = vmatpush3.msra.mxu0 %v393_v3  ;;  %v391_v40 = vmul.f32 %v1451_v22, %v1451_v22  ;;  %v493_v41 = vmul.f32 %v1453_v23, %v1453_v23  ;;  %v406_v42 = vmul.f32 %v1455_v24, %v1455_v24  ;;  %v1473_v43 = vunpack.c.h.bf16 %v1072_v20 }
  0x23   : > { %1146 = vmatpush3.msra.mxu1 %v495_v8  ;;  %1112 = vmatprep.subr.mxu0 %v408_v9  ;;  %v508_v46 = vmul.f32 %v1464_v37, %v1464_v37  ;;  %v1478_v47 = vunpack.c.h.bf16 %v1087_v25  ;;  %v1480_v48 = vunpack.c.l.bf16 %v1080_v2  ;;  %v1482_v50 = vunpack.c.l.bf16 %v1095_v15  ;;  %v1078_v9 = vld [vmem:[%s1311_s19 + $0x48] sm:$0xff]  }
  0x24   : > { %1147 = vmatprep.subr.mxu1 %v510_v16  ;;  %1113 = vmatpush3.msra.mxu0 %v392_v21  ;;  %v390_v55 = vmul.f32 %v1473_v43, %v1473_v43  ;;  %v1487_v56 = vunpack.c.l.bf16 %v1072_v20  ;;  %v1489_v60 = vunpack.c.l.bf16 %v1087_v25  ;;  %v1491_v61 = vunpack.c.h.bf16 %v1079_v38  ;;  %v1093_v25 = vld [vmem:[%s1316_s22 + $0x48] sm:$0xff]  }
  0x25   : > { %1148 = vmatpush3.msra.mxu1 %v494_v30  ;;  %1114 = vmatprep.subr.mxu0 %v407_v35  ;;  %v492_v63 = vmul.f32 %v1478_v47, %v1478_v47  ;;  %v405_v2 = vmul.f32 %v1480_v48, %v1480_v48  ;;  %v507_v3 = vmul.f32 %v1482_v50, %v1482_v50  ;;  %v1500_v8 = vunpack.c.h.bf16 %v1094_v45 }
  0x26   : > { %1149 = vmatprep.subr.mxu1 %v509_v36  ;;  %1115 = vmatpush3.msra.mxu0 %v391_v40  ;;  %v389_v15 = vmul.f32 %v1487_v56, %v1487_v56  ;;  %v491_v16 = vmul.f32 %v1489_v60, %v1489_v60  ;;  %v404_v20 = vmul.f32 %v1491_v61, %v1491_v61  ;;  %v1509_v21 = vunpack.c.h.bf16 %v1071_v51 }
  0x27   : > { %1150 = vmatpush3.msra.mxu1 %v493_v41  ;;  %1794 = vst [vmem:[#allocation3_spill] sm:$0xff] %v1500_v8  ;;  %1116 = vmatprep.subr.mxu0 %v406_v42  ;;  %v506_v30 = vmul.f32 %v1500_v8, %v1500_v8  ;;  %v1514_v35 = vunpack.c.h.bf16 %v1086_v62  ;;  %v1516_v36 = vunpack.c.l.bf16 %v1079_v38  ;;  %v1518_v40 = vunpack.c.l.bf16 %v1094_v45  ;;  %v1070_v41 = vld [vmem:[%s1311_s19 + $0x8] sm:$0xff]  }
  0x28   : > { %1151 = vmatprep.subr.mxu1 %v508_v46  ;;  %1795 = vst [vmem:[#allocation4_spill] sm:$0xff] %v1509_v21  ;;  %1117 = vmatpush3.msra.mxu0 %v390_v55  ;;  %v388_v42 = vmul.f32 %v1509_v21, %v1509_v21  ;;  %v1523_v46 = vunpack.c.l.bf16 %v1071_v51  ;;  %v1525_v55 = vunpack.c.l.bf16 %v1086_v62  ;;  %v1536_v51 = vunpack.c.h.bf16 %v1093_v25  ;;  %v1077_v62 = vld [vmem:[%s1311_s19 + $0x40] sm:$0xff]  }
  0x29   : > { %1152 = vmatpush3.msra.mxu1 %v492_v63  ;;  %1796 = vst [vmem:[#allocation5_spill] sm:$0xff] %v1514_v35  ;;  %1797 = vst [vmem:[#allocation6_spill] sm:$0xff] %v1516_v36  ;;  %1118 = vmatprep.subr.mxu0 %v405_v2  ;;  %v1527_v63 = vunpack.c.h.bf16 %v1078_v9  ;;  %v490_v38 = vmul.f32 %v1514_v35, %v1514_v35  ;;  %v403_v45 = vmul.f32 %v1516_v36, %v1516_v36  ;;  %v1092_v35 = vld [vmem:[%s1316_s22 + $0x40] sm:$0xff]  }
  0x2a   : > { %1798 = vst [vmem:[#allocation7_spill] sm:$0xff] %v1518_v40  ;;  %1153 = vmatprep.subr.mxu1 %v507_v3  ;;  %1799 = vst [vmem:[#allocation8_spill] sm:$0xff] %v1523_v46  ;;  %1119 = vmatpush3.msra.mxu0 %v389_v15  ;;  %v505_v2 = vmul.f32 %v1518_v40, %v1518_v40  ;;  %v387_v3 = vmul.f32 %v1523_v46, %v1523_v46  ;;  %v1545_v36 = vunpack.c.h.bf16 %v1070_v41  ;;  %v943_v21 = vld [vmem:[%s1311_s19] sm:$0xff]  }
  0x2b   : > { %1800 = vst [vmem:[#allocation9_spill] sm:$0xff] %v1525_v55  ;;  %1801 = vst [vmem:[#allocation10_spill] sm:$0xff] %v1527_v63  ;;  %1154 = vmatpush3.msra.mxu1 %v491_v16  ;;  %1120 = vmatprep.subr.mxu0 %v404_v20  ;;  %v489_v15 = vmul.f32 %v1525_v55, %v1525_v55  ;;  %v402_v16 = vmul.f32 %v1527_v63, %v1527_v63  ;;  %v1550_v20 = vunpack.c.h.bf16 %v1085_v0 }
  0x2c   : > { %1155 = vmatprep.subr.mxu1 %v506_v30  ;;  %1121 = vmatpush3.msra.mxu0 %v388_v42  ;;  %v504_v40 = vmul.f32 %v1536_v51, %v1536_v51  ;;  %v1552_v30 = vunpack.c.l.bf16 %v1078_v9  ;;  %v1554_v46 = vunpack.c.l.bf16 %v1093_v25  ;;  %v386_v63 = vmul.f32 %v1545_v36, %v1545_v36 }
  0x2d   : > { %1156 = vmatpush3.msra.mxu1 %v490_v38  ;;  %1122 = vmatprep.subr.mxu0 %v403_v45  ;;  %v1559_v55 = vunpack.c.l.bf16 %v1070_v41  ;;  %v1561_v8 = vunpack.c.l.bf16 %v1085_v0  ;;  %v1563_v42 = vunpack.c.h.bf16 %v1077_v62  ;;  %v1007_v38 = vld [vmem:[%s1316_s22] sm:$0xff]   ;;  %v488_v9 = vmul.f32 %v1550_v20, %v1550_v20 }
  0x2e   : > { %1802 = vst [vmem:[#allocation11_spill] sm:$0xff] %v1552_v30  ;;  %1803 = vst [vmem:[#allocation12_spill] sm:$0xff] %v1554_v46  ;;  %1157 = vmatprep.subr.mxu1 %v505_v2  ;;  %1123 = vmatpush3.msra.mxu0 %v387_v3  ;;  %v401_v25 = vmul.f32 %v1552_v30, %v1552_v30  ;;  %v503_v45 = vmul.f32 %v1554_v46, %v1554_v46  ;;  %v1572_v2 = vunpack.c.h.bf16 %v1092_v35 }
  0x2f   : > { %1804 = vst [vmem:[#allocation13_spill] sm:$0xff] %v1559_v55  ;;  %1805 = vst [vmem:[#allocation14_spill] sm:$0xff] %v1561_v8  ;;  %1158 = vmatpush3.msra.mxu1 %v489_v15  ;;  %1124 = vmatprep.subr.mxu0 %v402_v16  ;;  %v385_v0 = vmul.f32 %v1559_v55, %v1559_v55  ;;  %v487_v41 = vmul.f32 %v1561_v8, %v1561_v8  ;;  %v1580_v15 = vunpack.c.h.bf16 %v943_v21 }
  0x30   : > { %1806 = vst [vmem:[#allocation15_spill] sm:$0xff] %v1563_v42  ;;  %1159 = vmatprep.subr.mxu1 %v504_v40  ;;  %v400_v3 = vmul.f32 %v1563_v42, %v1563_v42  ;;  %1125 = vmatpush3.msra.mxu0 %v386_v63  ;;  %v502_v46 = vmul.f32 %v1572_v2, %v1572_v2  ;;  %v1584_v30 = vunpack.c.h.bf16 %v1007_v38  ;;  %v1586_v16 = vunpack.c.l.bf16 %v1077_v62 }
  0x31   : > { %1807 = vst [vmem:[#allocation16_spill] sm:$0xff] %v1580_v15  ;;  %1160 = vmatpush3.msra.mxu1 %v488_v9  ;;  %v1588_v40 = vunpack.c.l.bf16 %v1092_v35  ;;  %1126 = vmatprep.subr.mxu0 %v401_v25  ;;  %v384_v8 = vmul.f32 %v1580_v15, %v1580_v15  ;;  %v1592_v55 = vunpack.c.l.bf16 %v943_v21  ;;  %v1594_v42 = vunpack.c.l.bf16 %v1007_v38 }
  0x32   : > { %1808 = vst [vmem:[#allocation17_spill] sm:$0xff] %v1584_v30  ;;  %1809 = vst [vmem:[#allocation18_spill] sm:$0xff] %v1586_v16  ;;  %1161 = vmatprep.subr.mxu1 %v503_v45  ;;  %1127 = vmatpush3.msra.mxu0 %v385_v0  ;;  %v486_v63 = vmul.f32 %v1584_v30, %v1584_v30  ;;  %v399_v62 = vmul.f32 %v1586_v16, %v1586_v16  ;;  %v1813_v38 = vmov 1.0   ;;  %v605_v25 = vlaneseq }
  0x33   : > { %1810 = vst [vmem:[#allocation19_spill] sm:$0xff] %v1588_v40  ;;  %1811 = vst [vmem:[#allocation20_spill] sm:$0xff] %v1592_v55  ;;  %1162 = vmatpush3.msra.mxu1 %v487_v41  ;;  %v501_v35 = vmul.f32 %v1588_v40, %v1588_v40  ;;  %1128 = vmatprep.subr.mxu0 %v400_v3  ;;  %v383_v9 = vmul.f32 %v1592_v55, %v1592_v55 }
  0x34   : > { %1812 = vst [vmem:[#allocation21_spill] sm:$0xff] %v1594_v42  ;;  %1163 = vmatprep.subr.mxu1 %v502_v46  ;;  %v485_v21 = vmul.f32 %v1594_v42, %v1594_v42  ;;  %1129 = vmatpush3.msra.mxu0 %v384_v8  ;;  %v606_v45 = vshrl.u32 %v605_v25, 7  ;;  %v1613_v46 = vld [vmem:[%s1770_s2] sm:$0x3] }
  0x35   : > { %1164 = vmatpush3.msra.mxu1 %v486_v63  ;;  %1130 = vmatprep.subr.mxu0 %v399_v62  ;;  %1814 = vst [vmem:[#allocation22_spill] sm:$0xff] %v1613_v46 }
  0x36   : > { %1165 = vmatprep.subr.mxu1 %v501_v35  ;;  %1131 = vmatpush3.msra.mxu0 %v383_v9  ;;  %v1608_v0 = vsub.s32 0, %v606_v45  ;;  %v750_v41 = vsub.s32 1, %v606_v45 }
  0x37   : > { %1166 = vmatpush3.msra.mxu1 %v485_v21  ;;  %480 = vmatmul.mubr.f32.vlgmr.msra.gmra.mxu0 %v1813_v38 }
  0x38   : > { %582 = vmatmul.mubr.f32.vlgmr.msra.gmra.mxu1 %v1813_v38  ;;  %v751_v3 = vrot.slane %v1613_v46, %v750_v41 }
  0x3a   : > { %818 = vmatprep.mubr.f32.mxu0 %v751_v3 }
  0xf7   : > { %v1132_v63 = vpop.f32.mrf.mxu0 }
  0xf8   : > { %v1167_v62 = vpop.f32.mrf.mxu1 }
  0xf9   : > { %v1133_v35 = vpop.f32.mrf.mxu0 }
  0xfa   : > { %v1168_v9 = vpop.f32.mrf.mxu1  ;;  %v1134_v21 = vadd.f32 %v1133_v35, %v1132_v63 }
  0xfb   : > { %v1169_v38 = vadd.f32 %v1168_v9, %v1167_v62 }
  0xfc   : > { %1231 = vrsqrt.f32 %v1134_v21  ;;  %vm589_vm0 = vcmp.eq.f32.partialorder %v1134_v21, inf  ;;  %v592_v40 = vand.u32 2147483648, %v1134_v21  ;;  %vm591_vm1 = vcmp.eq.f32.partialorder %v1134_v21, 0.0 }
  0xfd   : > { %1233 = vrsqrt.f32 %v1169_v38  ;;  %vm598_vm2 = vcmp.eq.f32.partialorder %v1169_v38, inf  ;;  %v601_v8 = vand.u32 2147483648, %v1169_v38  ;;  %vm600_vm3 = vcmp.eq.f32.partialorder %v1169_v38, 0.0 }
 0x109   : > { %v1232_v25 = vpop.eup %1231 }
 0x10a   : > { %v1234_v42 = vpop.eup %1233  ;;  %v588_v55 = vmul.f32 %v1232_v25, %v1134_v21 }
 0x10b   : > { %v597_v45 = vmul.f32 %v1234_v42, %v1169_v38 }
 0x10c   : > { %v590_v16 = vsel %vm589_vm0, %v1134_v21, %v588_v55 }
 0x10d   : > { %v593_v41 = vsel %vm591_vm1, %v592_v40, %v590_v16  ;;  %v599_v3 = vsel %vm598_vm2, %v1169_v38, %v597_v45 }
 0x10e   : > { %v594_v46 = vadd.f32 1e-10, %v593_v41  ;;  %v602_v30 = vsel %vm600_vm3, %v601_v8, %v599_v3 }
 0x10f   : > { %v603_v15 = vadd.f32 1e-10, %v602_v30 }
 0x110   : > { %1235 = vrcp.f32 %v594_v46 }
 0x111   : > { %1237 = vrcp.f32 %v603_v15 }
 0x11d   : > { %v1236_v63 = vpop.eup %1235 }
 0x11e   : > { %v1238_v62 = vpop.eup %1237  ;;  %v1619_v35 = vrot.slane %v1236_v63, %v1608_v0 }
 0x11f   : > { %v1622_v9 = vrot.slane %v1238_v62, %v1608_v0 }
 0x120   : > { %v624_v55 = vmul.f32 %v1333_v11, %v1619_v35  ;;  %v639_v42 = vmul.f32 %v1321_v4, %v1619_v35  ;;  %v640_v16 = vmul.f32 %v1323_v5, %v1619_v35  ;;  %v623_v30 = vmul.f32 %v1331_v10, %v1619_v35 }
 0x121   : > { %v659_v15 = vmul.f32 %v1335_v12, %v1622_v9  ;;  %v660_v40 = vmul.f32 %v1337_v13, %v1622_v9  ;;  %v675_v46 = vmul.f32 %v1325_v6, %v1622_v9  ;;  %v676_v11 = vmul.f32 %v1327_v7, %v1622_v9 }
 0x122   : > { %v622_v4 = vmul.f32 %v1363_v28, %v1619_v35  ;;  %v658_v5 = vmul.f32 %v1365_v29, %v1622_v9  ;;  %v638_v10 = vmul.f32 %v1359_v26, %v1619_v35  ;;  %v674_v12 = vmul.f32 %v1361_v27, %v1622_v9 }
 0x123   : > { %v692_v8 = vsub.f32 %v624_v55, %v660_v40  ;;  %v708_v13 = vsub.f32 %v640_v16, %v676_v11  ;;  %v707_v21 = vsub.f32 %v639_v42, %v675_v46  ;;  %v637_v6 = vmul.f32 %v1368_v31, %v1619_v35 }
 0x124   : > { %v621_v7 = vmul.f32 %v1372_v33, %v1619_v35  ;;  %v657_v28 = vmul.f32 %v1374_v34, %v1622_v9  ;;  %v691_v38 = vsub.f32 %v623_v30, %v659_v15  ;;  %v673_v29 = vmul.f32 %v1370_v32, %v1622_v9 }
 0x125   : > { %v620_v26 = vmul.f32 %v1401_v49, %v1619_v35  ;;  %v740_v27 = vmul.f32 %v708_v13, %v708_v13  ;;  %v724_v25 = vmul.f32 %v692_v8, %v692_v8  ;;  %v706_v45 = vsub.f32 %v638_v10, %v674_v12 }
 0x126   : > { %v656_v41 = vmul.f32 %v1406_v52, %v1622_v9  ;;  %v739_v31 = vmul.f32 %v707_v21, %v707_v21  ;;  %v690_v3 = vsub.f32 %v622_v4, %v658_v5  ;;  %v636_v33 = vmul.f32 %v1383_v39, %v1619_v35 }
 0x127   : > { %1170 = vmatprep.subr.mxu0 %v740_v27  ;;  %v705_v34 = vsub.f32 %v637_v6, %v673_v29  ;;  %v672_v63 = vmul.f32 %v1392_v44, %v1622_v9  ;;  %v635_v32 = vmul.f32 %v1408_v53, %v1619_v35  ;;  %v671_v49 = vmul.f32 %v1410_v54, %v1622_v9 }
 0x128   : > { %v619_v62 = vmul.f32 %v1415_v57, %v1619_v35  ;;  %v655_v52 = vmul.f32 %v1417_v58, %v1622_v9  ;;  %1171 = vmatpush3.msra.mxu0 %v724_v25  ;;  %v723_v55 = vmul.f32 %v691_v38, %v691_v38  ;;  %v689_v39 = vsub.f32 %v621_v7, %v657_v28 }
 0x129   : > { %1172 = vmatprep.subr.mxu0 %v739_v31  ;;  %v738_v42 = vmul.f32 %v706_v45, %v706_v45  ;;  %v704_v16 = vsub.f32 %v636_v33, %v672_v63  ;;  %v634_v44 = vmul.f32 %v1419_v59, %v1619_v35  ;;  %v670_v53 = vmul.f32 %v1428_v1, %v1622_v9  ;;  %v1818_v31 = vld [vmem:[#allocation6_spill] sm:$0xff] }
 0x12a   : > { %v618_v54 = vmul.f32 %v1437_v14, %v1619_v35  ;;  %v654_v57 = vmul.f32 %v1442_v17, %v1622_v9  ;;  %1173 = vmatpush3.msra.mxu0 %v723_v55  ;;  %v722_v58 = vmul.f32 %v690_v3, %v690_v3  ;;  %v688_v30 = vsub.f32 %v620_v26, %v656_v41 }
 0x12b   : > { %1174 = vmatprep.subr.mxu0 %v738_v42  ;;  %v737_v15 = vmul.f32 %v705_v34, %v705_v34  ;;  %v703_v40 = vsub.f32 %v635_v32, %v671_v49  ;;  %v633_v46 = vmul.f32 %v1444_v18, %v1619_v35  ;;  %v669_v59 = vmul.f32 %v1446_v19, %v1622_v9  ;;  %v1820_v34 = vld [vmem:[#allocation8_spill] sm:$0xff]  ;;  %v1821_v32 = vld [vmem:[#allocation9_spill] sm:$0xff]  ;;  %v1822_v42 = vld [vmem:[#allocation10_spill] sm:$0xff] }
 0x12c   : > { %v617_v1 = vmul.f32 %v1451_v22, %v1619_v35  ;;  %v653_v14 = vmul.f32 %v1453_v23, %v1622_v9  ;;  %1175 = vmatpush3.msra.mxu0 %v722_v58  ;;  %v721_v17 = vmul.f32 %v689_v39, %v689_v39  ;;  %v687_v11 = vsub.f32 %v619_v62, %v655_v52 }
 0x12d   : > { %1176 = vmatprep.subr.mxu0 %v737_v15  ;;  %v736_v4 = vmul.f32 %v704_v16, %v704_v16  ;;  %v702_v5 = vsub.f32 %v634_v44, %v670_v53  ;;  %v632_v10 = vmul.f32 %v1455_v24, %v1619_v35  ;;  %v668_v18 = vmul.f32 %v1464_v37, %v1622_v9 }
 0x12e   : > { %v616_v19 = vmul.f32 %v1473_v43, %v1619_v35  ;;  %v652_v22 = vmul.f32 %v1478_v47, %v1622_v9  ;;  %1177 = vmatpush3.msra.mxu0 %v721_v17  ;;  %v720_v23 = vmul.f32 %v688_v30, %v688_v30  ;;  %v686_v12 = vsub.f32 %v618_v54, %v654_v57 }
 0x12f   : > { %1178 = vmatprep.subr.mxu0 %v736_v4  ;;  %v735_v8 = vmul.f32 %v703_v40, %v703_v40  ;;  %v701_v13 = vsub.f32 %v633_v46, %v669_v59  ;;  %v631_v21 = vmul.f32 %v1480_v48, %v1619_v35  ;;  %v667_v24 = vmul.f32 %v1482_v50, %v1622_v9  ;;  %v1815_v48 = vld [vmem:[#allocation3_spill] sm:$0xff]  ;;  %v1816_v50 = vld [vmem:[#allocation4_spill] sm:$0xff] }
 0x130   : > { %v615_v37 = vmul.f32 %v1487_v56, %v1619_v35  ;;  %v651_v43 = vmul.f32 %v1489_v60, %v1622_v9  ;;  %1179 = vmatpush3.msra.mxu0 %v720_v23  ;;  %v719_v47 = vmul.f32 %v687_v11, %v687_v11  ;;  %v685_v6 = vsub.f32 %v617_v1, %v653_v14  ;;  %v1817_v56 = vld [vmem:[#allocation5_spill] sm:$0xff]  ;;  %v1823_v40 = vld [vmem:[#allocation11_spill] sm:$0xff]  ;;  %v1824_v59 = vld [vmem:[#allocation12_spill] sm:$0xff] }
 0x131   : > { %1180 = vmatprep.subr.mxu0 %v735_v8  ;;  %v734_v7 = vmul.f32 %v702_v5, %v702_v5  ;;  %v700_v28 = vsub.f32 %v632_v10, %v668_v18  ;;  %v630_v38 = vmul.f32 %v1491_v61, %v1619_v35  ;;  %v666_v29 = vmul.f32 %v1815_v48, %v1622_v9  ;;  %v1819_v61 = vld [vmem:[#allocation7_spill] sm:$0xff] }
 0x132   : > { %v614_v26 = vmul.f32 %v1816_v50, %v1619_v35  ;;  %v650_v27 = vmul.f32 %v1817_v56, %v1622_v9  ;;  %1181 = vmatpush3.msra.mxu0 %v719_v47  ;;  %v718_v60 = vmul.f32 %v686_v12, %v686_v12  ;;  %v684_v25 = vsub.f32 %v616_v19, %v652_v22  ;;  %v1827_v10 = vld [vmem:[#allocation15_spill] sm:$0xff]  ;;  %v1828_v22 = vld [vmem:[#allocation16_spill] sm:$0xff]  ;;  %v1829_v12 = vld [vmem:[#allocation17_spill] sm:$0xff] }
 0x133   : > { %1182 = vmatprep.subr.mxu0 %v734_v7  ;;  %v733_v45 = vmul.f32 %v701_v13, %v701_v13  ;;  %v699_v41 = vsub.f32 %v631_v21, %v667_v24  ;;  %v629_v3 = vmul.f32 %v1818_v31, %v1619_v35  ;;  %v665_v33 = vmul.f32 %v1819_v61, %v1622_v9 }
 0x134   : > { %v613_v63 = vmul.f32 %v1820_v34, %v1619_v35  ;;  %v649_v49 = vmul.f32 %v1821_v32, %v1622_v9  ;;  %1183 = vmatpush3.msra.mxu0 %v718_v60  ;;  %v717_v62 = vmul.f32 %v685_v6, %v685_v6  ;;  %v683_v52 = vsub.f32 %v615_v37, %v651_v43  ;;  %v1830_v43 = vld [vmem:[#allocation18_spill] sm:$0xff]  ;;  %v1831_v6 = vld [vmem:[#allocation19_spill] sm:$0xff] }
 0x135   : > { %1184 = vmatprep.subr.mxu0 %v733_v45  ;;  %v732_v55 = vmul.f32 %v700_v28, %v700_v28  ;;  %v698_v39 = vsub.f32 %v630_v38, %v666_v29  ;;  %v628_v16 = vmul.f32 %v1822_v42, %v1619_v35  ;;  %v664_v44 = vmul.f32 %v1536_v51, %v1622_v9  ;;  %v1825_v51 = vld [vmem:[#allocation13_spill] sm:$0xff] }
 0x136   : > { %v612_v53 = vmul.f32 %v1545_v36, %v1619_v35  ;;  %v648_v54 = vmul.f32 %v1550_v20, %v1622_v9  ;;  %1185 = vmatpush3.msra.mxu0 %v717_v62  ;;  %v716_v57 = vmul.f32 %v684_v25, %v684_v25  ;;  %v682_v58 = vsub.f32 %v614_v26, %v650_v27  ;;  %v1826_v36 = vld [vmem:[#allocation14_spill] sm:$0xff]  ;;  %v1833_v38 = vld [vmem:[#allocation21_spill] sm:$0xff] }
 0x137   : > { %1186 = vmatprep.subr.mxu0 %v732_v55  ;;  %v731_v30 = vmul.f32 %v699_v41, %v699_v41  ;;  %v697_v15 = vsub.f32 %v629_v3, %v665_v33  ;;  %v627_v46 = vmul.f32 %v1823_v40, %v1619_v35  ;;  %v663_v1 = vmul.f32 %v1824_v59, %v1622_v9  ;;  %v1834_v33 = vld [vmem:[#allocation22_spill] sm:$0xff] }
 0x138   : > { %v611_v14 = vmul.f32 %v1825_v51, %v1619_v35  ;;  %v647_v17 = vmul.f32 %v1826_v36, %v1622_v9  ;;  %1187 = vmatpush3.msra.mxu0 %v716_v57  ;;  %v715_v20 = vmul.f32 %v683_v52, %v683_v52  ;;  %v681_v11 = vsub.f32 %v613_v63, %v649_v49 }
 0x139   : > { %1188 = vmatprep.subr.mxu0 %v731_v30  ;;  %v730_v4 = vmul.f32 %v698_v39, %v698_v39  ;;  %v696_v5 = vsub.f32 %v628_v16, %v664_v44  ;;  %v626_v18 = vmul.f32 %v1827_v10, %v1619_v35  ;;  %v662_v19 = vmul.f32 %v1572_v2, %v1622_v9  ;;  %v1832_v2 = vld [vmem:[#allocation20_spill] sm:$0xff] }
 0x13a   : > { %v610_v23 = vmul.f32 %v1828_v22, %v1619_v35  ;;  %v646_v8 = vmul.f32 %v1829_v12, %v1622_v9  ;;  %1189 = vmatpush3.msra.mxu0 %v715_v20  ;;  %v714_v13 = vmul.f32 %v682_v58, %v682_v58  ;;  %v680_v21 = vsub.f32 %v612_v53, %v648_v54 }
 0x13b   : > { %1190 = vmatprep.subr.mxu0 %v730_v4  ;;  %v729_v24 = vmul.f32 %v697_v15, %v697_v15  ;;  %v695_v37 = vsub.f32 %v627_v46, %v663_v1  ;;  %v625_v47 = vmul.f32 %v1830_v43, %v1619_v35  ;;  %v661_v7 = vmul.f32 %v1831_v6, %v1622_v9 }
 0x13c   : > { %v609_v28 = vmul.f32 %v1832_v2, %v1619_v35  ;;  %v645_v48 = vmul.f32 %v1833_v38, %v1622_v9  ;;  %1191 = vmatpush3.msra.mxu0 %v714_v13  ;;  %v713_v29 = vmul.f32 %v681_v11, %v681_v11  ;;  %v679_v50 = vsub.f32 %v611_v14, %v647_v17 }
 0x13d   : > { %1192 = vmatprep.subr.mxu0 %v729_v24  ;;  %v728_v26 = vmul.f32 %v696_v5, %v696_v5  ;;  %v694_v56 = vsub.f32 %v626_v18, %v662_v19  ;;  %v712_v27 = vmul.f32 %v680_v21, %v680_v21  ;;  %v678_v60 = vsub.f32 %v610_v23, %v646_v8 }
 0x13e   : > { %1193 = vmatpush3.msra.mxu0 %v713_v29  ;;  %v727_v25 = vmul.f32 %v695_v37, %v695_v37  ;;  %v693_v45 = vsub.f32 %v625_v47, %v661_v7  ;;  %v711_v41 = vmul.f32 %v679_v50, %v679_v50  ;;  %v677_v31 = vsub.f32 %v609_v28, %v645_v48 }
 0x13f   : > { %1194 = vmatprep.subr.mxu0 %v728_v26  ;;  %v726_v35 = vmul.f32 %v694_v56, %v694_v56  ;;  %v710_v3 = vmul.f32 %v678_v60, %v678_v60  ;;  %v1835_v34 = vrot.slane %v1834_v33, %v1608_v0  ;;  %v1264_v63 = vmov 0.0  }
 0x140   : > { %1195 = vmatpush3.msra.mxu0 %v712_v27  ;;  %v725_v9 = vmul.f32 %v693_v45, %v693_v45  ;;  %v709_v61 = vmul.f32 %v677_v31, %v677_v31  ;;  %254 = vst [vmem:[#allocation2] sm:$0x1] %v1264_v63 }
 0x141   : > { %1196 = vmatprep.subr.mxu0 %v727_v25 }
 0x142   : > { %1197 = vmatpush3.msra.mxu0 %v711_v41 }
 0x143   : > { %1198 = vmatprep.subr.mxu0 %v726_v35 }
 0x144   : > { %1199 = vmatpush3.msra.mxu0 %v710_v3 }
 0x145   : > { %1200 = vmatprep.subr.mxu0 %v725_v9 }
 0x146   : > { %1201 = vmatpush3.msra.mxu0 %v709_v61 }
 0x147   : > { %819 = vmatmul.mubr.f32.vlgmr.msra.gmra.mxu0 %v1835_v34  ;;  %v741_v49 = vld [vmem:[#allocation2] sm:$0x1] }
 0x207   : > { %v1202_v32 = vpop.f32.mrf.mxu0 }
 0x209   : > { %v1203_v62 = vpop.f32.mrf.mxu0 }
 0x20a   : > { %v1204_v52 = vadd.f32 %v1203_v62, %v1202_v32 }
 0x20c   : > { %v824_v55 = vadd.f32 %v1204_v52, %v741_v49 }
 0x20e   : > { %825 = vst [vmem:[#allocation2] sm:$0x1] %v824_v55 }
 0x215   : > { %v829_v39 = vld [vmem:[#allocation2] sm:$0x1] }
 0x216   : > { %v831_v42 = vsel %vm830_vm4, %v829_v39, 0.0 }
 0x217   : > { %832 = vadd.xlane.f32.xlu0 %v831_v42 }
 0x2a0   : > { %v833_v16 = vpop.xlane.xlu0 %832 }
 0x2a1   : > { %v834_v0 = vmul.f32 0.0625, %v833_v16 }
 0x2a3   : > { %836 = vst.msk [vmem:[%s249_s27] sm:$0x1] %vm835_vm5, %v834_v0 }
 0x2a4 PF: > { %s13_s14 = sadd.s32 1, %s1261_s14   ;;  %s1836_s12 = smov %s1257_s13 }
 0x2a5   : > { %p10_p5 = scmp.ge.s32.totalorder %s13_s14, 4   ;;  %s1837_s13 = smov %s1839_s15 }
 0x2a7   :  { %12 = sbr.rel (!%p10_p5) target bundleno = 2 (0x2), region = 73 }

// kernel: reverse
= control target key start
LH: loop header
LB: loop body
LE: loop exit
PB: predicated region body
PF: predicated region fallthrough
CT: control target
= control target key end

     0   :  { %s1790_s6 = smov 0   ;;  %s1792_s7 = smov 0   ;;  %s2287_s0 = inlined_call_operand.vmem [shape: f32[512,512,3,3], index: 0, kind: input, shape index: {}]   ;;  %s2288_s1 = inlined_call_operand.vmem [shape: bf16[512,512,3,3], index: 1, kind: output, shape index: {}]  }
   0x1   :  { %s1794_s8 = smov 0   ;;  %s1796_s9 = smov 0  }
   0x2   :  { %s1798_s10 = smov 0   ;;  %s1800_s11 = smov 0  }
   0x3   :  { %s1802_s12 = smov 0   ;;  %s1804_s13 = smov 0  }
   0x4   :  { %s1806_s14 = smov 0   ;;  %s1808_s15 = smov 0  }
   0x5   :  { %s1810_s16 = smov 0   ;;  %s1812_s17 = smov 0  }
   0x6   :  { %s1814_s18 = smov 0   ;;  %s1816_s19 = smov 0  }
   0x7   :  { %s1818_s20 = smov 0   ;;  %s1820_s21 = smov 0  }
   0x8   :  { %s1822_s22 = smov 0   ;;  %s1824_s23 = smov 0  }
   0x9   :  { %s1826_s24 = smov 0  }
   0xa LB: > { %s65_s25 = sadd.s32 1, %s1766_s21  ;;  %s69_s26 = sadd.s32 1, %s1770_s22  ;;  %s1778_s24 = sphi %s1826_s24, %s7_s24   ;;  %s1774_s23 = sphi %s1824_s23, %s2307_s23   ;;  %s1770_s22 = sphi %s1822_s22, %s2306_s22   ;;  %s1766_s21 = sphi %s1820_s21, %s2305_s21   ;;  %s1762_s20 = sphi %s1818_s20, %s2304_s20   ;;  %s1758_s19 = sphi %s1816_s19, %s2303_s19   ;;  %s1754_s18 = sphi %s1814_s18, %s2302_s18   ;;  %s1750_s17 = sphi %s1812_s17, %s2301_s17   ;;  %s1746_s16 = sphi %s1810_s16, %s2300_s16   ;;  %s1742_s15 = sphi %s1808_s15, %s2299_s15   ;;  %s1738_s14 = sphi %s1806_s14, %s2298_s14   ;;  %s1734_s13 = sphi %s1804_s13, %s2297_s13   ;;  %s1730_s12 = sphi %s1802_s12, %s2296_s12   ;;  %s1726_s11 = sphi %s1800_s11, %s2295_s11   ;;  %s1722_s10 = sphi %s1798_s10, %s2294_s10   ;;  %s1718_s9 = sphi %s1796_s9, %s2293_s9   ;;  %s1714_s8 = sphi %s1794_s8, %s2292_s8   ;;  %s1710_s7 = sphi %s1792_s7, %s2291_s7   ;;  %s1706_s6 = sphi %s1790_s6, %s2290_s6  }
   0xb   : > { %p67_p0 = scmp.ge.s32.totalorder %s65_s25, 2  ;;  %p1208_p1 = scmp.ge.s32.totalorder %s1778_s24, 5 }
   0xc   : > { %p113_p2 = scmp.lt.s32.totalorder %s1778_s24, 23  ;;  %s73_s27 = sadd.s32 1, %s1774_s23 }
   0xd   : > { %s2309_s25 = smov (%p67_p0, %s65_s25), 0  ;;  %s2311_s26 = smov (!%p67_p0, %s69_s26), %s1770_s22 }
   0xe   : > { %p114_p3 = pnand %p1208_p1, %p113_p2  ;;  %p71_p4 = scmp.ge.s32.totalorder %s2311_s26, 3 }
   0xf   : > { %s159_s28 = ssub.s32 (!%p114_p3), 2, %s1714_s8  ;;  %s160_s29 = ssub.s32 (!%p114_p3), 2, %s1710_s7 }
  0x10   : > { %s2313_s26 = smov (%p71_p4, %s2311_s26), 0  ;;  %s2315_s27 = smov (!%p71_p4, %s73_s27), %s1774_s23 }
  0x11   : > { %p75_p5 = scmp.ge.s32.totalorder %s2315_s27, 3  ;;  %117 = sbr.rel (%p114_p3) target bundleno = 90 (0x5a), region = 20 }
  0x12   : > { %s1209_s30 = sshll.u32 (!%p114_p3), %s1706_s6, 5  ;;  %p163_p6 = scmp.lt.s32.totalorder (!%p114_p3), %s159_s28, 2 }
  0x13   : > { %s2317_s27 = smov (%p75_p5, %s2315_s27), 0  ;;  %p165_p7 = scmp.lt.s32.totalorder (!%p114_p3), %s160_s29, 2 }
  0x14   : > { %p167_p8 = scmp.lt.s32.totalorder (!%p114_p3), %s1209_s30, 63  ;;  %p185_p9 = scmp.lt.s32.totalorder (!%p114_p3), %s1714_s8, 2 }
  0x15   : > { %p187_p10 = scmp.lt.s32.totalorder (!%p114_p3), %s1710_s7, 2 }
  0x16   : > { %s2319_s28 = smov (!%p163_p6, %s159_s28), 2  ;;  %s2321_s29 = smov (!%p165_p7, %s160_s29), 2 }
  0x17   : > { %s2323_s30 = smov (!%p167_p8, %s1209_s30), 63  ;;  %s1211_s2 = sshll.u32 %s2321_s29, 8 }
  0x18   : > { %s1474_s3 = smul.u32 768, %s2319_s28  ;;  %s1210_s4 = sshll.u32 %s2323_s30, 2 }
  0x19   : > { %s174_s5 = sadd.s32 %s1211_s2, %s1210_s4  ;;  %s2325_s8 = smov (!%p185_p9, %s1714_s8), 2 }
  0x1a   : > { %s176_s6 = sadd.s32 %s1474_s3, %s174_s5  ;;  %s2327_s7 = smov (!%p187_p10, %s1710_s7), 2 }
  0x1b   : > { %s1212_s28 = sshll.u32 %s176_s6, 3  ;;  %s1475_s8 = smul.u32 768, %s2325_s8 }
  0x1c   : > { %s1908_s2 = scalar_lea.vmem %s2287_s0, %s1212_s28  ;;  %s1215_s7 = sshll.u32 %s2327_s7, 8 }
  0x1d   : > { %s196_s3 = sadd.s32 %s1215_s7, %s1210_s4  ;;  %v203_v0 = vld [vmem:[%s1908_s2] sm:$0xff]  ;;  %v1248_v13 = vld [vmem:[%s1908_s2 + $0x8] sm:$0xff] }
  0x1e   : > { %s198_s4 = sadd.s32 %s1475_s8, %s196_s3  ;;  %v1217_v1 = vld [vmem:[%s1908_s2 + $0x20] sm:$0xff]  ;;  %v303_v17 = vpack.c.bf16 %v1248_v13, %v203_v0  ;;  %v1251_v18 = vld [vmem:[%s1908_s2 + $0x28] sm:$0xff] }
  0x1f   : > { %s1216_s5 = sshll.u32 %s198_s4, 2  ;;  %v1218_v2 = vld [vmem:[%s1908_s2 + $0x40] sm:$0xff]  ;;  %v1254_v19 = vld [vmem:[%s1908_s2 + $0x48] sm:$0xff]  ;;  %v311_v24 = vpack.c.bf16 %v1251_v18, %v1217_v1 }
  0x20   : > { %v1219_v3 = vld [vmem:[%s1908_s2 + $0x60] sm:$0xff]  ;;  %s1923_s8 = scalar_lea.vmem %s2288_s1, %s1216_s5  ;;  %v1257_v20 = vld [vmem:[%s1908_s2 + $0x68] sm:$0xff]  ;;  %v319_v25 = vpack.c.bf16 %v1254_v19, %v1218_v2 }
  0x21   : > { %v1220_v4 = vld [vmem:[%s1908_s2 + $0x80] sm:$0xff]  ;;  %v327_v26 = vpack.c.bf16 %v1257_v20, %v1219_v3  ;;  %v1260_v27 = vld [vmem:[%s1908_s2 + $0x88] sm:$0xff]  ;;  %1250 = vst [vmem:[%s1923_s8] sm:$0xff] %v303_v17  ;;  %1253 = vst [vmem:[%s1923_s8 + $0x10] sm:$0xff] %v311_v24 }
  0x22   : > { %v1221_v5 = vld [vmem:[%s1908_s2 + $0xa0] sm:$0xff]  ;;  %v1263_v28 = vld [vmem:[%s1908_s2 + $0xa8] sm:$0xff]  ;;  %v335_v33 = vpack.c.bf16 %v1260_v27, %v1220_v4  ;;  %1256 = vst [vmem:[%s1923_s8 + $0x20] sm:$0xff] %v319_v25 }
  0x23   : > { %v1222_v6 = vld [vmem:[%s1908_s2 + $0xc0] sm:$0xff]  ;;  %v1266_v29 = vld [vmem:[%s1908_s2 + $0xc8] sm:$0xff]  ;;  %v343_v34 = vpack.c.bf16 %v1263_v28, %v1221_v5  ;;  %1259 = vst [vmem:[%s1923_s8 + $0x30] sm:$0xff] %v327_v26 }
  0x24   : > { %v1223_v7 = vld [vmem:[%s1908_s2 + $0xe0] sm:$0xff]  ;;  %v351_v35 = vpack.c.bf16 %v1266_v29, %v1222_v6  ;;  %v1269_v36 = vld [vmem:[%s1908_s2 + $0xe8] sm:$0xff]  ;;  %1262 = vst [vmem:[%s1923_s8 + $0x40] sm:$0xff] %v335_v33  ;;  %v1345_v33 = vld [vmem:[%s1908_s2 + $0x30] sm:$0xff] }
  0x25   : > { %v1224_v8 = vld [vmem:[%s1908_s2 + $0x100] sm:$0xff]  ;;  %v1272_v37 = vld [vmem:[%s1908_s2 + $0x108] sm:$0xff]  ;;  %v359_v42 = vpack.c.bf16 %v1269_v36, %v1223_v7  ;;  %1265 = vst [vmem:[%s1923_s8 + $0x50] sm:$0xff] %v343_v34  ;;  %v1346_v34 = vld [vmem:[%s1908_s2 + $0x50] sm:$0xff] }
  0x26   : > { %v1225_v9 = vld [vmem:[%s1908_s2 + $0x120] sm:$0xff]  ;;  %v1275_v38 = vld [vmem:[%s1908_s2 + $0x128] sm:$0xff]  ;;  %v367_v43 = vpack.c.bf16 %v1272_v37, %v1224_v8  ;;  %1268 = vst [vmem:[%s1923_s8 + $0x60] sm:$0xff] %v351_v35  ;;  %v1347_v35 = vld [vmem:[%s1908_s2 + $0x70] sm:$0xff] }
  0x27   : > { %v1926_v10 = vld [vmem:[%s1908_s2 + $0x140] sm:$0xff]  ;;  %v375_v44 = vpack.c.bf16 %v1275_v38, %v1225_v9  ;;  %v1278_v45 = vld [vmem:[%s1908_s2 + $0x148] sm:$0xff]  ;;  %1271 = vst [vmem:[%s1923_s8 + $0x70] sm:$0xff] %v359_v42  ;;  %v1348_v36 = vld [vmem:[%s1908_s2 + $0x90] sm:$0xff] }
  0x28   : > { %v1929_v11 = vld [vmem:[%s1908_s2 + $0x160] sm:$0xff]  ;;  %v1281_v46 = vld [vmem:[%s1908_s2 + $0x168] sm:$0xff]  ;;  %v383_v51 = vpack.c.bf16 %v1278_v45, %v1926_v10  ;;  %1274 = vst [vmem:[%s1923_s8 + $0x80] sm:$0xff] %v367_v43  ;;  %v1349_v37 = vld [vmem:[%s1908_s2 + $0xb0] sm:$0xff] }
  0x29   : > { %v1932_v12 = vld [vmem:[%s1908_s2 + $0x180] sm:$0xff]  ;;  %v1284_v47 = vld [vmem:[%s1908_s2 + $0x188] sm:$0xff]  ;;  %v391_v52 = vpack.c.bf16 %v1281_v46, %v1929_v11  ;;  %1277 = vst [vmem:[%s1923_s8 + $0x90] sm:$0xff] %v375_v44  ;;  %v1350_v38 = vld [vmem:[%s1908_s2 + $0xd0] sm:$0xff] }
  0x2a   : > { %v1936_v14 = vld [vmem:[%s1908_s2 + $0x1a0] sm:$0xff]  ;;  %v399_v53 = vpack.c.bf16 %v1284_v47, %v1932_v12  ;;  %v1287_v54 = vld [vmem:[%s1908_s2 + $0x1a8] sm:$0xff]  ;;  %1280 = vst [vmem:[%s1923_s8 + $0xa0] sm:$0xff] %v383_v51  ;;  %v2078_v42 = vld [vmem:[%s1908_s2 + $0x150] sm:$0xff] }
  0x2b   : > { %v1939_v15 = vld [vmem:[%s1908_s2 + $0x1c0] sm:$0xff]  ;;  %v1290_v55 = vld [vmem:[%s1908_s2 + $0x1c8] sm:$0xff]  ;;  %v407_v60 = vpack.c.bf16 %v1287_v54, %v1936_v14  ;;  %1283 = vst [vmem:[%s1923_s8 + $0xb0] sm:$0xff] %v391_v52  ;;  %v2081_v43 = vld [vmem:[%s1908_s2 + $0x170] sm:$0xff] }
  0x2c   : > { %v1942_v16 = vld [vmem:[%s1908_s2 + $0x1e0] sm:$0xff]  ;;  %v1293_v56 = vld [vmem:[%s1908_s2 + $0x1e8] sm:$0xff]  ;;  %v415_v61 = vpack.c.bf16 %v1290_v55, %v1939_v15  ;;  %1286 = vst [vmem:[%s1923_s8 + $0xc0] sm:$0xff] %v399_v53  ;;  %v2084_v44 = vld [vmem:[%s1908_s2 + $0x190] sm:$0xff] }
  0x2d   : > { %v1948_v21 = vld [vmem:[%s1908_s2 + $0x200] sm:$0xff]  ;;  %v423_v62 = vpack.c.bf16 %v1293_v56, %v1942_v16  ;;  %v1296_v63 = vld [vmem:[%s1908_s2 + $0x208] sm:$0xff]  ;;  %1289 = vst [vmem:[%s1923_s8 + $0xd0] sm:$0xff] %v407_v60  ;;  %v2087_v45 = vld [vmem:[%s1908_s2 + $0x1b0] sm:$0xff] }
  0x2e   : > { %v1951_v22 = vld [vmem:[%s1908_s2 + $0x220] sm:$0xff]  ;;  %v1299_v0 = vld [vmem:[%s1908_s2 + $0x228] sm:$0xff]  ;;  %v431_v3 = vpack.c.bf16 %v1296_v63, %v1948_v21  ;;  %1292 = vst [vmem:[%s1923_s8 + $0xe0] sm:$0xff] %v415_v61  ;;  %v2090_v46 = vld [vmem:[%s1908_s2 + $0x1d0] sm:$0xff] }
  0x2f   : > { %v1954_v23 = vld [vmem:[%s1908_s2 + $0x240] sm:$0xff]  ;;  %v1302_v1 = vld [vmem:[%s1908_s2 + $0x248] sm:$0xff]  ;;  %v439_v4 = vpack.c.bf16 %v1299_v0, %v1951_v22  ;;  %1295 = vst [vmem:[%s1923_s8 + $0xf0] sm:$0xff] %v423_v62  ;;  %v1376_v47 = vld [vmem:[%s1908_s2 + $0x18] sm:$0xff] }
  0x30   : > { %v1960_v30 = vld [vmem:[%s1908_s2 + $0x260] sm:$0xff]  ;;  %v447_v5 = vpack.c.bf16 %v1302_v1, %v1954_v23  ;;  %v1305_v6 = vld [vmem:[%s1908_s2 + $0x268] sm:$0xff]  ;;  %1298 = vst [vmem:[%s1923_s8 + $0x100] sm:$0xff] %v431_v3  ;;  %v2099_v51 = vld [vmem:[%s1908_s2 + $0x210] sm:$0xff] }
  0x31   : > { %v1963_v31 = vld [vmem:[%s1908_s2 + $0x280] sm:$0xff]  ;;  %v1308_v7 = vld [vmem:[%s1908_s2 + $0x288] sm:$0xff]  ;;  %v455_v9 = vpack.c.bf16 %v1305_v6, %v1960_v30  ;;  %1301 = vst [vmem:[%s1923_s8 + $0x110] sm:$0xff] %v439_v4  ;;  %v2102_v52 = vld [vmem:[%s1908_s2 + $0x230] sm:$0xff] }
  0x32   : > { %v1966_v32 = vld [vmem:[%s1908_s2 + $0x2a0] sm:$0xff]  ;;  %v1311_v8 = vld [vmem:[%s1908_s2 + $0x2a8] sm:$0xff]  ;;  %v463_v10 = vpack.c.bf16 %v1308_v7, %v1963_v31  ;;  %1304 = vst [vmem:[%s1923_s8 + $0x120] sm:$0xff] %v447_v5  ;;  %v1385_v56 = vld [vmem:[%s1908_s2 + $0x78] sm:$0xff] }
  0x33   : > { %v1973_v39 = vld [vmem:[%s1908_s2 + $0x2c0] sm:$0xff]  ;;  %v471_v11 = vpack.c.bf16 %v1311_v8, %v1966_v32  ;;  %v1314_v12 = vld [vmem:[%s1908_s2 + $0x2c8] sm:$0xff]  ;;  %1307 = vst [vmem:[%s1923_s8 + $0x130] sm:$0xff] %v455_v9  ;;  %v1344_v32 = vld [vmem:[%s1908_s2 + $0x10] sm:$0xff]  ;;  %v679_v62 = vpack.c.bf16 %v1385_v56, %v1347_v35 }
  0x34   : > { %v1976_v40 = vld [vmem:[%s1908_s2 + $0x2e0] sm:$0xff]  ;;  %v1317_v13 = vld [vmem:[%s1908_s2 + $0x2e8] sm:$0xff]  ;;  %v479_v15 = vpack.c.bf16 %v1314_v12, %v1973_v39  ;;  %1310 = vst [vmem:[%s1923_s8 + $0x140] sm:$0xff] %v463_v10  ;;  %v1351_v39 = vld [vmem:[%s1908_s2 + $0xf0] sm:$0xff]  ;;  %v655_v53 = vpack.c.bf16 %v1376_v47, %v1344_v32 }
  0x35   : > { %v1979_v41 = vld [vmem:[%s1908_s2 + $0x300] sm:$0xff]  ;;  %v1320_v14 = vld [vmem:[%s1908_s2 + $0x308] sm:$0xff]  ;;  %v487_v16 = vpack.c.bf16 %v1317_v13, %v1976_v40  ;;  %1313 = vst [vmem:[%s1923_s8 + $0x150] sm:$0xff] %v471_v11  ;;  %v1352_v40 = vld [vmem:[%s1908_s2 + $0x110] sm:$0xff] }
  0x36   : > { %v1988_v48 = vld [vmem:[%s1908_s2 + $0x320] sm:$0xff]  ;;  %v495_v17 = vpack.c.bf16 %v1320_v14, %v1979_v41  ;;  %v1323_v18 = vld [vmem:[%s1908_s2 + $0x328] sm:$0xff]  ;;  %1316 = vst [vmem:[%s1923_s8 + $0x160] sm:$0xff] %v479_v15  ;;  %v2075_v41 = vld [vmem:[%s1908_s2 + $0x130] sm:$0xff] }
  0x37   : > { %v1991_v49 = vld [vmem:[%s1908_s2 + $0x340] sm:$0xff]  ;;  %v1326_v19 = vld [vmem:[%s1908_s2 + $0x348] sm:$0xff]  ;;  %v503_v21 = vpack.c.bf16 %v1323_v18, %v1988_v48  ;;  %1319 = vst [vmem:[%s1923_s8 + $0x170] sm:$0xff] %v487_v16  ;;  %v1379_v48 = vld [vmem:[%s1908_s2 + $0x38] sm:$0xff] }
  0x38   : > { %v1994_v50 = vld [vmem:[%s1908_s2 + $0x360] sm:$0xff]  ;;  %v1329_v20 = vld [vmem:[%s1908_s2 + $0x368] sm:$0xff]  ;;  %v511_v22 = vpack.c.bf16 %v1326_v19, %v1991_v49  ;;  %1322 = vst [vmem:[%s1923_s8 + $0x180] sm:$0xff] %v495_v17  ;;  %v1382_v49 = vld [vmem:[%s1908_s2 + $0x58] sm:$0xff]  ;;  %v663_v54 = vpack.c.bf16 %v1379_v48, %v1345_v33 }
  0x39   : > { %v1244_v57 = vld [vmem:[%s1908_s2 + $0x380] sm:$0xff]  ;;  %v519_v23 = vpack.c.bf16 %v1329_v20, %v1994_v50  ;;  %v1332_v24 = vld [vmem:[%s1908_s2 + $0x388] sm:$0xff]  ;;  %1325 = vst [vmem:[%s1923_s8 + $0x190] sm:$0xff] %v503_v21  ;;  %v2096_v50 = vld [vmem:[%s1908_s2 + $0x1f0] sm:$0xff]  ;;  %v671_v55 = vpack.c.bf16 %v1382_v49, %v1346_v34 }
  0x3a   : > { %v1245_v58 = vld [vmem:[%s1908_s2 + $0x3a0] sm:$0xff]  ;;  %v1335_v25 = vld [vmem:[%s1908_s2 + $0x3a8] sm:$0xff]  ;;  %v527_v27 = vpack.c.bf16 %v1332_v24, %v1244_v57  ;;  %1328 = vst [vmem:[%s1923_s8 + $0x1a0] sm:$0xff] %v511_v22  ;;  %v1388_v57 = vld [vmem:[%s1908_s2 + $0x98] sm:$0xff] }
  0x3b   : > { %v1246_v59 = vld [vmem:[%s1908_s2 + $0x3c0] sm:$0xff]  ;;  %v1338_v26 = vld [vmem:[%s1908_s2 + $0x3c8] sm:$0xff]  ;;  %v535_v28 = vpack.c.bf16 %v1335_v25, %v1245_v58  ;;  %1331 = vst [vmem:[%s1923_s8 + $0x1b0] sm:$0xff] %v519_v23  ;;  %v1391_v58 = vld [vmem:[%s1908_s2 + $0xb8] sm:$0xff]  ;;  %v687_v63 = vpack.c.bf16 %v1388_v57, %v1348_v36 }
  0x3c   : > { %v1247_v2 = vld [vmem:[%s1908_s2 + $0x3e0] sm:$0xff]  ;;  %v543_v29 = vpack.c.bf16 %v1338_v26, %v1246_v59  ;;  %v1341_v30 = vld [vmem:[%s1908_s2 + $0x3e8] sm:$0xff]  ;;  %1334 = vst [vmem:[%s1923_s8 + $0x1c0] sm:$0xff] %v527_v27  ;;  %v2108_v59 = vld [vmem:[%s1908_s2 + $0x250] sm:$0xff]  ;;  %v695_v0 = vpack.c.bf16 %v1391_v58, %v1349_v37 }
  0x3d   : > { %v551_v31 = vpack.c.bf16 %v1341_v30, %v1247_v2  ;;  %1337 = vst [vmem:[%s1923_s8 + $0x1d0] sm:$0xff] %v535_v28  ;;  %v2111_v60 = vld [vmem:[%s1908_s2 + $0x270] sm:$0xff]  ;;  %v1394_v1 = vld [vmem:[%s1908_s2 + $0xd8] sm:$0xff]  ;;  %1378 = vst [vmem:[%s1923_s8 + $0x8] sm:$0xff] %v655_v53 }
  0x3e   : > { %1340 = vst [vmem:[%s1923_s8 + $0x1e0] sm:$0xff] %v543_v29  ;;  %v2114_v61 = vld [vmem:[%s1908_s2 + $0x290] sm:$0xff]  ;;  %v1397_v2 = vld [vmem:[%s1908_s2 + $0xf8] sm:$0xff]  ;;  %1381 = vst [vmem:[%s1923_s8 + $0x18] sm:$0xff] %v663_v54  ;;  %v703_v7 = vpack.c.bf16 %v1394_v1, %v1350_v38 }
  0x3f   : > { %1343 = vst [vmem:[%s1923_s8 + $0x1f0] sm:$0xff] %v551_v31  ;;  %v1400_v3 = vld [vmem:[%s1908_s2 + $0x118] sm:$0xff]  ;;  %v2120_v4 = vld [vmem:[%s1908_s2 + $0x2b0] sm:$0xff]  ;;  %1384 = vst [vmem:[%s1923_s8 + $0x28] sm:$0xff] %v671_v55  ;;  %v711_v8 = vpack.c.bf16 %v1397_v2, %v1351_v39 }
  0x40   : > { %v2123_v5 = vld [vmem:[%s1908_s2 + $0x2d0] sm:$0xff]  ;;  %v719_v9 = vpack.c.bf16 %v1400_v3, %v1352_v40  ;;  %v1403_v10 = vld [vmem:[%s1908_s2 + $0x138] sm:$0xff]  ;;  %1387 = vst [vmem:[%s1923_s8 + $0x38] sm:$0xff] %v679_v62  ;;  %1390 = vst [vmem:[%s1923_s8 + $0x48] sm:$0xff] %v687_v63 }
  0x41   : > { %v2126_v6 = vld [vmem:[%s1908_s2 + $0x2f0] sm:$0xff]  ;;  %v1406_v11 = vld [vmem:[%s1908_s2 + $0x158] sm:$0xff]  ;;  %1393 = vst [vmem:[%s1923_s8 + $0x58] sm:$0xff] %v695_v0  ;;  %v727_v16 = vpack.c.bf16 %v1403_v10, %v2075_v41  ;;  %1396 = vst [vmem:[%s1923_s8 + $0x68] sm:$0xff] %v703_v7 }
  0x42   : > { %v1409_v12 = vld [vmem:[%s1908_s2 + $0x178] sm:$0xff]  ;;  %v2135_v13 = vld [vmem:[%s1908_s2 + $0x310] sm:$0xff]  ;;  %v735_v17 = vpack.c.bf16 %v1406_v11, %v2078_v42  ;;  %1399 = vst [vmem:[%s1923_s8 + $0x78] sm:$0xff] %v711_v8  ;;  %1402 = vst [vmem:[%s1923_s8 + $0x88] sm:$0xff] %v719_v9 }
  0x43   : > { %v2138_v14 = vld [vmem:[%s1908_s2 + $0x330] sm:$0xff]  ;;  %v743_v18 = vpack.c.bf16 %v1409_v12, %v2081_v43  ;;  %v1412_v19 = vld [vmem:[%s1908_s2 + $0x198] sm:$0xff]  ;;  %1405 = vst [vmem:[%s1923_s8 + $0x98] sm:$0xff] %v727_v16 }
  0x44   : > { %v2141_v15 = vld [vmem:[%s1908_s2 + $0x350] sm:$0xff]  ;;  %v1415_v20 = vld [vmem:[%s1908_s2 + $0x1b8] sm:$0xff]  ;;  %v751_v25 = vpack.c.bf16 %v1412_v19, %v2084_v44  ;;  %1408 = vst [vmem:[%s1923_s8 + $0xa8] sm:$0xff] %v735_v17 }
  0x45   : > { %v1418_v21 = vld [vmem:[%s1908_s2 + $0x1d8] sm:$0xff]  ;;  %v2153_v22 = vld [vmem:[%s1908_s2 + $0x370] sm:$0xff]  ;;  %v759_v26 = vpack.c.bf16 %v1415_v20, %v2087_v45  ;;  %1411 = vst [vmem:[%s1923_s8 + $0xb8] sm:$0xff] %v743_v18 }
  0x46   : > { %v2156_v23 = vld [vmem:[%s1908_s2 + $0x390] sm:$0xff]  ;;  %v767_v27 = vpack.c.bf16 %v1418_v21, %v2090_v46  ;;  %v1421_v28 = vld [vmem:[%s1908_s2 + $0x1f8] sm:$0xff]  ;;  %1414 = vst [vmem:[%s1923_s8 + $0xc8] sm:$0xff] %v751_v25 }
  0x47   : > { %v2159_v24 = vld [vmem:[%s1908_s2 + $0x3b0] sm:$0xff]  ;;  %v1424_v29 = vld [vmem:[%s1908_s2 + $0x218] sm:$0xff]  ;;  %v775_v33 = vpack.c.bf16 %v1421_v28, %v2096_v50  ;;  %1417 = vst [vmem:[%s1923_s8 + $0xd8] sm:$0xff] %v759_v26 }
  0x48   : > { %v1427_v30 = vld [vmem:[%s1908_s2 + $0x238] sm:$0xff]  ;;  %v1374_v31 = vld [vmem:[%s1908_s2 + $0x3d0] sm:$0xff]  ;;  %v783_v34 = vpack.c.bf16 %v1424_v29, %v2099_v51  ;;  %1420 = vst [vmem:[%s1923_s8 + $0xe8] sm:$0xff] %v767_v27 }
  0x49   : > { %v1375_v32 = vld [vmem:[%s1908_s2 + $0x3f0] sm:$0xff]  ;;  %v791_v35 = vpack.c.bf16 %v1427_v30, %v2102_v52  ;;  %v1430_v36 = vld [vmem:[%s1908_s2 + $0x258] sm:$0xff]  ;;  %1423 = vst [vmem:[%s1923_s8 + $0xf8] sm:$0xff] %v775_v33 }
  0x4a   : > { %v1433_v37 = vld [vmem:[%s1908_s2 + $0x278] sm:$0xff]  ;;  %v799_v39 = vpack.c.bf16 %v1430_v36, %v2108_v59  ;;  %1426 = vst [vmem:[%s1923_s8 + $0x108] sm:$0xff] %v783_v34 }
  0x4b   : > { %v1436_v38 = vld [vmem:[%s1908_s2 + $0x298] sm:$0xff]  ;;  %v807_v40 = vpack.c.bf16 %v1433_v37, %v2111_v60  ;;  %1429 = vst [vmem:[%s1923_s8 + $0x118] sm:$0xff] %v791_v35 }
  0x4c   : > { %v815_v41 = vpack.c.bf16 %v1436_v38, %v2114_v61  ;;  %v1439_v42 = vld [vmem:[%s1908_s2 + $0x2b8] sm:$0xff]  ;;  %1432 = vst [vmem:[%s1923_s8 + $0x128] sm:$0xff] %v799_v39 }
  0x4d   : > { %v1442_v43 = vld [vmem:[%s1908_s2 + $0x2d8] sm:$0xff]  ;;  %v823_v45 = vpack.c.bf16 %v1439_v42, %v2120_v4  ;;  %1435 = vst [vmem:[%s1923_s8 + $0x138] sm:$0xff] %v807_v40 }
  0x4e   : > { %v1445_v44 = vld [vmem:[%s1908_s2 + $0x2f8] sm:$0xff]  ;;  %v831_v46 = vpack.c.bf16 %v1442_v43, %v2123_v5  ;;  %1438 = vst [vmem:[%s1923_s8 + $0x148] sm:$0xff] %v815_v41 }
  0x4f   : > { %v839_v47 = vpack.c.bf16 %v1445_v44, %v2126_v6  ;;  %v1448_v48 = vld [vmem:[%s1908_s2 + $0x318] sm:$0xff]  ;;  %1441 = vst [vmem:[%s1923_s8 + $0x158] sm:$0xff] %v823_v45 }
  0x50   : > { %v1451_v49 = vld [vmem:[%s1908_s2 + $0x338] sm:$0xff]  ;;  %v847_v51 = vpack.c.bf16 %v1448_v48, %v2135_v13  ;;  %1444 = vst [vmem:[%s1923_s8 + $0x168] sm:$0xff] %v831_v46 }
  0x51   : > { %v1454_v50 = vld [vmem:[%s1908_s2 + $0x358] sm:$0xff]  ;;  %v855_v52 = vpack.c.bf16 %v1451_v49, %v2138_v14  ;;  %1447 = vst [vmem:[%s1923_s8 + $0x178] sm:$0xff] %v839_v47 }
  0x52   : > { %v863_v53 = vpack.c.bf16 %v1454_v50, %v2141_v15  ;;  %v1457_v54 = vld [vmem:[%s1908_s2 + $0x378] sm:$0xff]  ;;  %1450 = vst [vmem:[%s1923_s8 + $0x188] sm:$0xff] %v847_v51 }
  0x53   : > { %v1460_v55 = vld [vmem:[%s1908_s2 + $0x398] sm:$0xff]  ;;  %v871_v57 = vpack.c.bf16 %v1457_v54, %v2153_v22  ;;  %1453 = vst [vmem:[%s1923_s8 + $0x198] sm:$0xff] %v855_v52 }
  0x54   : > { %v1463_v56 = vld [vmem:[%s1908_s2 + $0x3b8] sm:$0xff]  ;;  %v879_v58 = vpack.c.bf16 %v1460_v55, %v2156_v23  ;;  %1456 = vst [vmem:[%s1923_s8 + $0x1a8] sm:$0xff] %v863_v53 }
  0x55   : > { %v887_v59 = vpack.c.bf16 %v1463_v56, %v2159_v24  ;;  %v1466_v60 = vld [vmem:[%s1908_s2 + $0x3d8] sm:$0xff]  ;;  %1459 = vst [vmem:[%s1923_s8 + $0x1b8] sm:$0xff] %v871_v57 }
  0x56   : > { %v1469_v61 = vld [vmem:[%s1908_s2 + $0x3f8] sm:$0xff]  ;;  %v895_v62 = vpack.c.bf16 %v1466_v60, %v1374_v31  ;;  %1462 = vst [vmem:[%s1923_s8 + $0x1c8] sm:$0xff] %v879_v58 }
  0x57   : > { %v903_v63 = vpack.c.bf16 %v1469_v61, %v1375_v32  ;;  %1465 = vst [vmem:[%s1923_s8 + $0x1d8] sm:$0xff] %v887_v59 }
  0x58   : > { %1468 = vst [vmem:[%s1923_s8 + $0x1e8] sm:$0xff] %v895_v62 }
  0x59   : > { %1471 = vst [vmem:[%s1923_s8 + $0x1f8] sm:$0xff] %v903_v63 }
  0x5a PF: > { %s7_s24 = sadd.s32 1, %s1778_s24   ;;  %s2290_s6 = smov %s1718_s9 }
  0x5b   : > { %p2225_p11 = scmp.ge.s32.totalorder %s7_s24, 28   ;;  %s2291_s7 = smov %s1722_s10 }
  0x5c   : > { %s2292_s8 = smov %s1726_s11  ;;  %s2293_s9 = smov %s1730_s12 }
  0x5d   : > { %s2294_s10 = smov %s1734_s13  ;;  %s2295_s11 = smov %s1738_s14 }
  0x5e   : > { %s2296_s12 = smov %s1742_s15  ;;  %s2297_s13 = smov %s1746_s16 }
  0x5f   : > { %s2298_s14 = smov %s1750_s17  ;;  %s2299_s15 = smov %s1754_s18 }
  0x60   : > { %s2300_s16 = smov %s1758_s19  ;;  %s2301_s17 = smov %s1762_s20 }
  0x61   : > { %s2302_s18 = smov %s1766_s21  ;;  %s2303_s19 = smov %s1770_s22 }
  0x62   : > { %s2304_s20 = smov %s1774_s23  ;;  %s2305_s21 = smov %s2309_s25 }
  0x63   : > { %s2306_s22 = smov %s2313_s26  ;;  %s2307_s23 = smov %s2317_s27 }
  0x64   :  { %6 = sbr.rel (!%p2225_p11) target bundleno = 10 (0xa), region = 359 }

// kernel: pnetlin_forward.8
= control target key start
LH: loop header
LB: loop body
LE: loop exit
PB: predicated region body
PF: predicated region fallthrough
CT: control target
= control target key end

     0   :  { %s2090_s12 = smov 0   ;;  %s2092_s13 = smov 0   ;;  %s3177_s0 = inlined_call_operand.vmem [shape: bf16[2,512,128], index: 0, kind: input, shape index: {}]   ;;  %s3178_s1 = inlined_call_operand.vmem [shape: bf16[2,512,128], index: 1, kind: input, shape index: {}]   ;;  %s3179_s2 = inlined_call_operand.vmem [shape: f32[1,512], index: 2, kind: input, shape index: {}]   ;;  %s3180_s3 = inlined_call_operand.vmem [shape: f32[2,1,1,1], index: 3, kind: output, shape index: {}]  }
   0x1   :  { %s2094_s14 = smov 0  }
   0x2 LB: > { %s32_s15 = sadd.s32 1, %s2062_s13  ;;  %p1473_p0 = scmp.ge.s32.totalorder %s2066_s14, 1  ;;  %s2066_s14 = sphi %s2094_s14, %s13_s14   ;;  %s2062_s13 = sphi %s2092_s13, %s3523_s13   ;;  %s2058_s12 = sphi %s2090_s12, %s3522_s12  }
   0x3   : > { %p34_p1 = scmp.ge.s32.totalorder %s32_s15, 2  ;;  %p186_p2 = scmp.lt.s32.totalorder %s2066_s14, 3 }
   0x5   : > { %s3525_s15 = smov (%p34_p1, %s32_s15), 0  ;;  %p187_p3 = pnand %p1473_p0, %p186_p2 }
   0x7   : > { %190 = sbr.rel (%p187_p3) target bundleno = 735 (0x2df), region = 32 }
   0xc   : > { %p225_p4 = scmp.lt.s32.totalorder %s2058_s12, 1  ;;  %v3181_v0 = vmov 1.0   ;;  %vm1370_vm4 = vcmask 1040384   ;;  %vm1375_vm5 = vcmask 0  }
   0xd   : > { %639 = vmatprep.mubr.f32.mxu0 %v3181_v0  ;;  %709 = vmatprep.mubr.f32.mxu1 %v3181_v0 }
   0xe   : > { %s3527_s12 = smov (!%p225_p4, %s2058_s12), 1 }
   0xf   : > { %s1480_s16 = sshll.u32 %s3527_s12, 8  ;;  %s249_s27 = scalar_lea.vmem %s3180_s3, %s3527_s12 }
  0x10   : > { %s2116_s19 = scalar_lea.vmem %s3177_s0, %s1480_s16  ;;  %s2121_s22 = scalar_lea.vmem %s3178_s1, %s1480_s16 }
  0x11   : > { %v1752_v1 = vld [vmem:[%s2116_s19 + $0x78] sm:$0xff]   ;;  %v1751_v15 = vld [vmem:[%s2116_s19 + $0x70] sm:$0xff]   ;;  %v1750_v31 = vld [vmem:[%s2116_s19 + $0x68] sm:$0xff]  }
  0x12   : > { %v1768_v2 = vld [vmem:[%s2116_s19 + $0xf8] sm:$0xff]   ;;  %v2126_v4 = vunpack.c.l.bf16 %v1752_v1  ;;  %v2128_v5 = vunpack.c.h.bf16 %v1752_v1  ;;  %v1767_v16 = vld [vmem:[%s2116_s19 + $0xf0] sm:$0xff]   ;;  %v2175_v29 = vunpack.c.h.bf16 %v1751_v15  ;;  %v2184_v34 = vunpack.c.l.bf16 %v1751_v15  ;;  %v1766_v36 = vld [vmem:[%s2116_s19 + $0xe8] sm:$0xff]  }
  0x13   : > { %v1744_v3 = vld [vmem:[%s2116_s19 + $0x38] sm:$0xff]   ;;  %v2130_v6 = vunpack.c.l.bf16 %v1768_v2  ;;  %v2132_v7 = vunpack.c.h.bf16 %v1768_v2  ;;  %v1743_v21 = vld [vmem:[%s2116_s19 + $0x30] sm:$0xff]   ;;  %v2177_v30 = vunpack.c.h.bf16 %v1767_v16  ;;  %v2186_v35 = vunpack.c.l.bf16 %v1767_v16  ;;  %v1742_v41 = vld [vmem:[%s2116_s19 + $0x28] sm:$0xff]  }
  0x14   : > { %v2135_v8 = vld [vmem:[%s2121_s22 + $0x38] sm:$0xff]   ;;  %v2141_v11 = vunpack.c.l.bf16 %v1744_v3  ;;  %v2143_v12 = vunpack.c.h.bf16 %v1744_v3  ;;  %v542_v17 = vmul.f32 %v2128_v5, %v2128_v5  ;;  %v1759_v22 = vld [vmem:[%s2116_s19 + $0xb0] sm:$0xff]   ;;  %v541_v24 = vmul.f32 %v2126_v4, %v2126_v4  ;;  %3281 = vst [vmem:[#allocation5_spill] sm:$0xff] %v2175_v29  ;;  %3283 = vst [vmem:[#allocation7_spill] sm:$0xff] %v2184_v34 }
  0x15   : > { %v1760_v9 = vld [vmem:[%s2116_s19 + $0xb8] sm:$0xff]   ;;  %v2146_v13 = vunpack.c.h.bf16 %v2135_v8  ;;  %v574_v18 = vmul.f32 %v2132_v7, %v2132_v7  ;;  %v573_v25 = vmul.f32 %v2130_v6, %v2130_v6  ;;  %3282 = vst [vmem:[#allocation6_spill] sm:$0xff] %v2177_v30  ;;  %v2180_v32 = vunpack.c.h.bf16 %v1743_v21  ;;  %3284 = vst [vmem:[#allocation8_spill] sm:$0xff] %v2186_v35  ;;  %v1758_v42 = vld [vmem:[%s2116_s19 + $0xa8] sm:$0xff]  }
  0x16   : > { %v2139_v10 = vld [vmem:[%s2121_s22 + $0xb8] sm:$0xff]   ;;  %v2148_v14 = vunpack.c.l.bf16 %v1760_v9  ;;  %v2156_v19 = vunpack.c.h.bf16 %v1760_v9  ;;  %v526_v23 = vmul.f32 %v2143_v12, %v2143_v12  ;;  %v525_v26 = vmul.f32 %v2141_v11, %v2141_v11  ;;  %1800 = vmatprep.subr.mxu0 %v542_v17  ;;  %v1749_v51 = vld [vmem:[%s2116_s19 + $0x60] sm:$0xff]  }
  0x17   : > { %3279 = vst [vmem:[#allocation3_spill] sm:$0xff] %v2146_v13  ;;  %v2159_v20 = vunpack.c.h.bf16 %v2139_v10  ;;  %1835 = vmatprep.subr.mxu1 %v574_v18  ;;  %v2182_v33 = vunpack.c.h.bf16 %v1759_v22  ;;  %v540_v37 = vmul.f32 %v2175_v29, %v2175_v29  ;;  %v572_v38 = vmul.f32 %v2177_v30, %v2177_v30  ;;  %v1765_v56 = vld [vmem:[%s2116_s19 + $0xe0] sm:$0xff]   ;;  %v1748_v18 = vld [vmem:[%s2116_s19 + $0x58] sm:$0xff]  }
  0x18   : > { %v558_v27 = vmul.f32 %v2156_v19, %v2156_v19  ;;  %v557_v28 = vmul.f32 %v2148_v14, %v2148_v14  ;;  %1801 = vmatpush3.msra.mxu0 %v526_v23  ;;  %v2193_v39 = vunpack.c.l.bf16 %v1743_v21  ;;  %v2195_v40 = vunpack.c.l.bf16 %v1759_v22  ;;  %v1741_v61 = vld [vmem:[%s2116_s19 + $0x20] sm:$0xff]  }
  0x19   : > { %3280 = vst [vmem:[#allocation4_spill] sm:$0xff] %v2159_v20  ;;  %1802 = vmatprep.subr.mxu0 %v541_v24  ;;  %v524_v43 = vmul.f32 %v2180_v32, %v2180_v32  ;;  %v556_v44 = vmul.f32 %v2182_v33, %v2182_v33  ;;  %v539_v45 = vmul.f32 %v2184_v34, %v2184_v34  ;;  %v2205_v46 = vunpack.c.h.bf16 %v1750_v31  ;;  %v1757_v62 = vld [vmem:[%s2116_s19 + $0xa0] sm:$0xff]  }
  0x1a   : > { %1836 = vmatpush3.msra.mxu1 %v558_v27  ;;  %1803 = vmatpush3.msra.mxu0 %v525_v26  ;;  %v571_v47 = vmul.f32 %v2186_v35, %v2186_v35  ;;  %v523_v48 = vmul.f32 %v2193_v39, %v2193_v39  ;;  %v555_v49 = vmul.f32 %v2195_v40, %v2195_v40  ;;  %v2213_v50 = vunpack.c.h.bf16 %v1766_v36 }
  0x1b   : > { %1837 = vmatprep.subr.mxu1 %v573_v25  ;;  %3285 = vst [vmem:[#allocation9_spill] sm:$0xff] %v2205_v46  ;;  %1804 = vmatprep.subr.mxu0 %v540_v37  ;;  %v538_v52 = vmul.f32 %v2205_v46, %v2205_v46  ;;  %v2218_v53 = vunpack.c.h.bf16 %v1742_v41  ;;  %v2220_v54 = vunpack.c.h.bf16 %v1758_v42  ;;  %v2222_v55 = vunpack.c.l.bf16 %v1750_v31  ;;  %v1764_v25 = vld [vmem:[%s2116_s19 + $0xd8] sm:$0xff]  }
  0x1c   : > { %1838 = vmatpush3.msra.mxu1 %v557_v28  ;;  %3286 = vst [vmem:[#allocation10_spill] sm:$0xff] %v2213_v50  ;;  %1805 = vmatpush3.msra.mxu0 %v524_v43  ;;  %v570_v57 = vmul.f32 %v2213_v50, %v2213_v50  ;;  %v2227_v58 = vunpack.c.l.bf16 %v1766_v36  ;;  %v2229_v59 = vunpack.c.l.bf16 %v1742_v41  ;;  %v2231_v60 = vunpack.c.l.bf16 %v1758_v42  ;;  %v1740_v36 = vld [vmem:[%s2116_s19 + $0x18] sm:$0xff]   ;;  %v1790_v50 = vld [vmem:[%s2121_s22 + $0xb0] sm:$0xff]  }
  0x1d   : > { %1839 = vmatprep.subr.mxu1 %v572_v38  ;;  %3287 = vst [vmem:[#allocation11_spill] sm:$0xff] %v2222_v55  ;;  %1806 = vmatprep.subr.mxu0 %v539_v45  ;;  %v522_v63 = vmul.f32 %v2218_v53, %v2218_v53  ;;  %v554_v1 = vmul.f32 %v2220_v54, %v2220_v54  ;;  %v2241_v3 = vunpack.c.h.bf16 %v1749_v51  ;;  %v2249_v17 = vunpack.c.h.bf16 %v1765_v56  ;;  %v1756_v37 = vld [vmem:[%s2116_s19 + $0x98] sm:$0xff]  }
  0x1e   : > { %1840 = vmatpush3.msra.mxu1 %v556_v44  ;;  %3288 = vst [vmem:[#allocation12_spill] sm:$0xff] %v2227_v58  ;;  %1807 = vmatpush3.msra.mxu0 %v523_v48  ;;  %v537_v2 = vmul.f32 %v2222_v55, %v2222_v55  ;;  %v569_v9 = vmul.f32 %v2227_v58, %v2227_v58  ;;  %v2254_v22 = vunpack.c.h.bf16 %v1741_v61  ;;  %v2256_v23 = vunpack.c.h.bf16 %v1757_v62  ;;  %v1774_v55 = vld [vmem:[%s2121_s22 + $0x30] sm:$0xff]  }
  0x1f   : > { %1841 = vmatprep.subr.mxu1 %v571_v47  ;;  %3289 = vst [vmem:[#allocation13_spill] sm:$0xff] %v2241_v3  ;;  %1808 = vmatprep.subr.mxu0 %v538_v52  ;;  %v521_v15 = vmul.f32 %v2229_v59, %v2229_v59  ;;  %v553_v16 = vmul.f32 %v2231_v60, %v2231_v60  ;;  %3290 = vst [vmem:[#allocation14_spill] sm:$0xff] %v2249_v17  ;;  %v2258_v24 = vunpack.c.l.bf16 %v1749_v51 }
  0x20   : > { %1842 = vmatpush3.msra.mxu1 %v555_v49  ;;  %1809 = vmatpush3.msra.mxu0 %v522_v63  ;;  %v536_v21 = vmul.f32 %v2241_v3, %v2241_v3  ;;  %v568_v26 = vmul.f32 %v2249_v17, %v2249_v17  ;;  %v2263_v27 = vunpack.c.l.bf16 %v1765_v56  ;;  %v2265_v28 = vunpack.c.l.bf16 %v1741_v61  ;;  %v1747_v49 = vld [vmem:[%s2116_s19 + $0x50] sm:$0xff]  }
  0x21   : > { %1843 = vmatprep.subr.mxu1 %v570_v57  ;;  %3291 = vst [vmem:[#allocation15_spill] sm:$0xff] %v2258_v24  ;;  %1810 = vmatprep.subr.mxu0 %v537_v2  ;;  %v2267_v31 = vunpack.c.l.bf16 %v1757_v62  ;;  %v520_v38 = vmul.f32 %v2254_v22, %v2254_v22  ;;  %v552_v41 = vmul.f32 %v2256_v23, %v2256_v23  ;;  %v2277_v43 = vunpack.c.h.bf16 %v1748_v18  ;;  %v1763_v61 = vld [vmem:[%s2116_s19 + $0xd0] sm:$0xff]  }
  0x22   : > { %1844 = vmatpush3.msra.mxu1 %v554_v1  ;;  %3292 = vst [vmem:[#allocation16_spill] sm:$0xff] %v2263_v27  ;;  %1811 = vmatpush3.msra.mxu0 %v521_v15  ;;  %v535_v42 = vmul.f32 %v2258_v24, %v2258_v24  ;;  %v567_v44 = vmul.f32 %v2263_v27, %v2263_v27  ;;  %v2285_v48 = vunpack.c.h.bf16 %v1764_v25  ;;  %v2290_v52 = vunpack.c.h.bf16 %v1740_v36  ;;  %v1755_v15 = vld [vmem:[%s2116_s19 + $0x90] sm:$0xff]  }
  0x23   : > { %1845 = vmatprep.subr.mxu1 %v569_v9  ;;  %3293 = vst [vmem:[#allocation17_spill] sm:$0xff] %v2277_v43  ;;  %1812 = vmatprep.subr.mxu0 %v536_v21  ;;  %v519_v45 = vmul.f32 %v2265_v28, %v2265_v28  ;;  %v551_v47 = vmul.f32 %v2267_v31, %v2267_v31  ;;  %v2292_v56 = vunpack.c.h.bf16 %v1756_v37  ;;  %v2294_v57 = vunpack.c.l.bf16 %v1748_v18  ;;  %v1739_v9 = vld [vmem:[%s2116_s19 + $0x10] sm:$0xff]  }
  0x24   : > { %1846 = vmatpush3.msra.mxu1 %v553_v16  ;;  %3294 = vst [vmem:[#allocation18_spill] sm:$0xff] %v2285_v48  ;;  %1813 = vmatpush3.msra.mxu0 %v520_v38  ;;  %v534_v51 = vmul.f32 %v2277_v43, %v2277_v43  ;;  %v566_v62 = vmul.f32 %v2285_v48, %v2285_v48  ;;  %v2299_v63 = vunpack.c.l.bf16 %v1764_v25  ;;  %v2301_v1 = vunpack.c.l.bf16 %v1740_v36  ;;  %v1761_v48 = vld [vmem:[%s2116_s19 + $0xc0] sm:$0xff]  }
  0x25   : > { %1847 = vmatprep.subr.mxu1 %v568_v26  ;;  %3295 = vst [vmem:[#allocation19_spill] sm:$0xff] %v2294_v57  ;;  %1814 = vmatprep.subr.mxu0 %v535_v42  ;;  %v2303_v2 = vunpack.c.l.bf16 %v1756_v37  ;;  %v518_v16 = vmul.f32 %v2290_v52, %v2290_v52  ;;  %v550_v18 = vmul.f32 %v2292_v56, %v2292_v56  ;;  %v2313_v25 = vunpack.c.h.bf16 %v1747_v49 }
  0x26   : > { %1848 = vmatpush3.msra.mxu1 %v552_v41  ;;  %3296 = vst [vmem:[#allocation20_spill] sm:$0xff] %v2299_v63  ;;  %1815 = vmatpush3.msra.mxu0 %v519_v45  ;;  %v533_v21 = vmul.f32 %v2294_v57, %v2294_v57  ;;  %v565_v26 = vmul.f32 %v2299_v63, %v2299_v63  ;;  %v2321_v38 = vunpack.c.h.bf16 %v1763_v61  ;;  %v1746_v41 = vld [vmem:[%s2116_s19 + $0x48] sm:$0xff]   ;;  %v2328_v45 = vunpack.c.h.bf16 %v1755_v15 }
  0x27   : > { %1849 = vmatprep.subr.mxu1 %v567_v44  ;;  %3297 = vst [vmem:[#allocation21_spill] sm:$0xff] %v2313_v25  ;;  %1816 = vmatprep.subr.mxu0 %v534_v51  ;;  %v517_v36 = vmul.f32 %v2301_v1, %v2301_v1  ;;  %v549_v37 = vmul.f32 %v2303_v2, %v2303_v2  ;;  %v2326_v44 = vunpack.c.h.bf16 %v1739_v9  ;;  %v1762_v51 = vld [vmem:[%s2116_s19 + $0xc8] sm:$0xff]   ;;  %v2335_v63 = vunpack.c.l.bf16 %v1763_v61 }
  0x28   : > { %1850 = vmatpush3.msra.mxu1 %v551_v47  ;;  %3298 = vst [vmem:[#allocation22_spill] sm:$0xff] %v2321_v38  ;;  %1817 = vmatpush3.msra.mxu0 %v518_v16  ;;  %v532_v42 = vmul.f32 %v2313_v25, %v2313_v25  ;;  %v2330_v47 = vunpack.c.l.bf16 %v1747_v49  ;;  %v564_v0 = vmul.f32 %v2321_v38, %v2321_v38  ;;  %v2337_v57 = vunpack.c.l.bf16 %v1739_v9  ;;  %v1738_v16 = vld [vmem:[%s2116_s19 + $0x8] sm:$0xff]   ;;  %v1745_v38 = vld [vmem:[%s2116_s19 + $0x40] sm:$0xff]  }
  0x29   : > { %1851 = vmatprep.subr.mxu1 %v566_v62  ;;  %1818 = vmatprep.subr.mxu0 %v533_v21  ;;  %3300 = vst [vmem:[#allocation24_spill] sm:$0xff] %v2335_v63  ;;  %v2339_v62 = vunpack.c.l.bf16 %v1755_v15  ;;  %v1754_v25 = vld [vmem:[%s2116_s19 + $0x88] sm:$0xff]   ;;  %v516_v49 = vmul.f32 %v2326_v44, %v2326_v44  ;;  %v2349_v21 = vunpack.c.h.bf16 %v1746_v41  ;;  %v563_v9 = vmul.f32 %v2335_v63, %v2335_v63 }
  0x2a   : > { %3299 = vst [vmem:[#allocation23_spill] sm:$0xff] %v2330_v47  ;;  %1852 = vmatpush3.msra.mxu1 %v550_v18  ;;  %1819 = vmatpush3.msra.mxu0 %v517_v36  ;;  %v548_v18 = vmul.f32 %v2328_v45, %v2328_v45  ;;  %v531_v61 = vmul.f32 %v2330_v47, %v2330_v47  ;;  %v2357_v36 = vunpack.c.h.bf16 %v1762_v51  ;;  %v2364_v47 = vunpack.c.h.bf16 %v1754_v25 }
  0x2b   : > { %1853 = vmatprep.subr.mxu1 %v565_v26  ;;  %3301 = vst [vmem:[#allocation25_spill] sm:$0xff] %v2349_v21  ;;  %1820 = vmatprep.subr.mxu0 %v532_v42  ;;  %v515_v15 = vmul.f32 %v2337_v57, %v2337_v57  ;;  %v547_v26 = vmul.f32 %v2339_v62, %v2339_v62  ;;  %v2362_v42 = vunpack.c.h.bf16 %v1738_v16  ;;  %v2366_v63 = vunpack.c.l.bf16 %v1746_v41 }
  0x2c   : > { %1854 = vmatpush3.msra.mxu1 %v549_v37  ;;  %3302 = vst [vmem:[#allocation26_spill] sm:$0xff] %v2357_v36  ;;  %1821 = vmatpush3.msra.mxu0 %v516_v49  ;;  %v530_v37 = vmul.f32 %v2349_v21, %v2349_v21  ;;  %v562_v43 = vmul.f32 %v2357_v36, %v2357_v36  ;;  %v2371_v27 = vunpack.c.l.bf16 %v1762_v51  ;;  %v2373_v24 = vunpack.c.l.bf16 %v1738_v16  ;;  %v1483_v49 = vld [vmem:[%s2116_s19] sm:$0xff]   ;;  %v1783_v36 = vld [vmem:[%s2121_s22 + $0x78] sm:$0xff]  }
  0x2d   : > { %1855 = vmatprep.subr.mxu1 %v564_v0  ;;  %3303 = vst [vmem:[#allocation27_spill] sm:$0xff] %v2366_v63  ;;  %1822 = vmatprep.subr.mxu0 %v531_v61  ;;  %v2375_v0 = vunpack.c.l.bf16 %v1754_v25  ;;  %v1753_v21 = vld [vmem:[%s2116_s19 + $0x80] sm:$0xff]   ;;  %v514_v41 = vmul.f32 %v2362_v42, %v2362_v42  ;;  %v529_v51 = vmul.f32 %v2366_v63, %v2366_v63  ;;  %v2385_v61 = vunpack.c.h.bf16 %v1745_v38 }
  0x2e   : > { %1856 = vmatpush3.msra.mxu1 %v548_v18  ;;  %3304 = vst [vmem:[#allocation28_spill] sm:$0xff] %v2371_v27  ;;  %1823 = vmatpush3.msra.mxu0 %v515_v15  ;;  %v546_v18 = vmul.f32 %v2364_v47, %v2364_v47  ;;  %v561_v25 = vmul.f32 %v2371_v27, %v2371_v27  ;;  %v2393_v15 = vunpack.c.h.bf16 %v1761_v48  ;;  %v2398_v17 = vunpack.c.h.bf16 %v1483_v49  ;;  %v1799_v27 = vld [vmem:[%s2121_s22 + $0xf8] sm:$0xff]  }
  0x2f   : > { %1857 = vmatprep.subr.mxu1 %v563_v9  ;;  %3305 = vst [vmem:[#allocation29_spill] sm:$0xff] %v2385_v61  ;;  %1824 = vmatprep.subr.mxu0 %v530_v37  ;;  %v513_v16 = vmul.f32 %v2373_v24, %v2373_v24  ;;  %v545_v9 = vmul.f32 %v2375_v0, %v2375_v0  ;;  %v2402_v37 = vunpack.c.l.bf16 %v1745_v38  ;;  %v2407_v58 = vunpack.c.l.bf16 %v1761_v48 }
  0x30   : > { %1858 = vmatpush3.msra.mxu1 %v547_v26  ;;  %3306 = vst [vmem:[#allocation30_spill] sm:$0xff] %v2393_v15  ;;  %1825 = vmatpush3.msra.mxu0 %v514_v41  ;;  %v528_v63 = vmul.f32 %v2385_v61, %v2385_v61  ;;  %v2400_v26 = vunpack.c.h.bf16 %v1753_v21  ;;  %v560_v3 = vmul.f32 %v2393_v15, %v2393_v15  ;;  %v2411_v41 = vunpack.c.l.bf16 %v1753_v21  ;;  %v1798_v61 = vld [vmem:[%s2121_s22 + $0xf0] sm:$0xff]  }
  0x31   : > { %1859 = vmatprep.subr.mxu1 %v562_v43  ;;  %3307 = vst [vmem:[#allocation31_spill] sm:$0xff] %v2402_v37  ;;  %1826 = vmatprep.subr.mxu0 %v529_v51  ;;  %3308 = vst [vmem:[#allocation32_spill] sm:$0xff] %v2407_v58  ;;  %v2409_v43 = vunpack.c.l.bf16 %v1483_v49  ;;  %v512_v38 = vmul.f32 %v2398_v17, %v2398_v17  ;;  %v527_v51 = vmul.f32 %v2402_v37, %v2402_v37 }
  0x32   : > { %1860 = vmatpush3.msra.mxu1 %v546_v18  ;;  %1827 = vmatpush3.msra.mxu0 %v513_v16  ;;  %v544_v18 = vmul.f32 %v2400_v26, %v2400_v26  ;;  %v2419_v15 = vunpack.c.h.bf16 %v1783_v36  ;;  %v559_v48 = vmul.f32 %v2407_v58, %v2407_v58  ;;  %v543_v49 = vmul.f32 %v2411_v41, %v2411_v41  ;;  %v1782_v16 = vld [vmem:[%s2121_s22 + $0x70] sm:$0xff]  }
  0x33   : > { %1861 = vmatprep.subr.mxu1 %v561_v25  ;;  %1828 = vmatprep.subr.mxu0 %v528_v63  ;;  %v511_v21 = vmul.f32 %v2409_v43, %v2409_v43  ;;  %v2427_v25 = vunpack.c.h.bf16 %v1799_v27  ;;  %v730_v63 = vmul.f32 %v2146_v13, %v2146_v13  ;;  %v762_v58 = vmul.f32 %v2159_v20, %v2159_v20  ;;  %v1797_v20 = vld [vmem:[%s2121_s22 + $0xe8] sm:$0xff]  }
  0x34   : > { %3309 = vst [vmem:[#allocation33_spill] sm:$0xff] %v2419_v15  ;;  %1862 = vmatpush3.msra.mxu1 %v545_v9  ;;  %1829 = vmatpush3.msra.mxu0 %v512_v38  ;;  %v746_v9 = vmul.f32 %v2419_v15, %v2419_v15  ;;  %v2438_v37 = vunpack.c.l.bf16 %v1783_v36  ;;  %v2446_v38 = vunpack.c.l.bf16 %v2135_v8  ;;  %v2449_v15 = vunpack.c.l.bf16 %v2139_v10  ;;  %v1773_v13 = vld [vmem:[%s2121_s22 + $0x28] sm:$0xff]  }
  0x35   : > { %3310 = vst [vmem:[#allocation34_spill] sm:$0xff] %v2427_v25  ;;  %1863 = vmatprep.subr.mxu1 %v560_v3  ;;  %1830 = vmatprep.subr.mxu0 %v527_v51  ;;  %v778_v46 = vmul.f32 %v2427_v25, %v2427_v25  ;;  %v2443_v3 = vunpack.c.l.bf16 %v1799_v27  ;;  %v2455_v51 = vunpack.c.h.bf16 %v1798_v61  ;;  %v2457_v25 = vunpack.c.h.bf16 %v1774_v55 }
  0x36   : > { %3311 = vst [vmem:[#allocation35_spill] sm:$0xff] %v2438_v37  ;;  %1864 = vmatpush3.msra.mxu1 %v544_v18  ;;  %3313 = vst [vmem:[#allocation37_spill] sm:$0xff] %v2446_v38  ;;  %1831 = vmatpush3.msra.mxu0 %v511_v21  ;;  %v745_v36 = vmul.f32 %v2438_v37, %v2438_v37  ;;  %v2453_v18 = vunpack.c.h.bf16 %v1782_v16  ;;  %v3318_v27 = vmov 1.0   ;;  %v729_v10 = vmul.f32 %v2446_v38, %v2446_v38  ;;  %v1781_v37 = vld [vmem:[%s2121_s22 + $0x68] sm:$0xff]  }
  0x37   : > { %3312 = vst [vmem:[#allocation36_spill] sm:$0xff] %v2443_v3  ;;  %3314 = vst [vmem:[#allocation38_spill] sm:$0xff] %v2449_v15  ;;  %1865 = vmatprep.subr.mxu1 %v559_v48  ;;  %640 = vmatmul.mubr.f32.vlgmr.msra.gmra.mxu0 %v3318_v27  ;;  %v777_v8 = vmul.f32 %v2443_v3, %v2443_v3  ;;  %v761_v48 = vmul.f32 %v2449_v15, %v2449_v15  ;;  %v2466_v21 = vunpack.c.h.bf16 %v1790_v50  ;;  %v1789_v15 = vld [vmem:[%s2121_s22 + $0xa8] sm:$0xff]  }
  0x38   : > { %3315 = vst [vmem:[#allocation39_spill] sm:$0xff] %v2453_v18  ;;  %3316 = vst [vmem:[#allocation40_spill] sm:$0xff] %v2455_v51  ;;  %1866 = vmatpush3.msra.mxu1 %v543_v49  ;;  %1870 = vmatprep.subr.mxu0 %v746_v9  ;;  %v744_v49 = vmul.f32 %v2453_v18, %v2453_v18  ;;  %v776_v3 = vmul.f32 %v2455_v51, %v2455_v51  ;;  %v2478_v35 = vunpack.c.l.bf16 %v1782_v16  ;;  %v1788_v51 = vld [vmem:[%s2121_s22 + $0xa0] sm:$0xff]  }
  0x39   : > { %3317 = vst [vmem:[#allocation41_spill] sm:$0xff] %v2457_v25  ;;  %3319 = vst [vmem:[#allocation42_spill] sm:$0xff] %v2466_v21  ;;  %710 = vmatmul.mubr.f32.vlgmr.msra.gmra.mxu1 %v3318_v27  ;;  %v728_v38 = vmul.f32 %v2457_v25, %v2457_v25  ;;  %1905 = vmatprep.subr.mxu1 %v778_v46  ;;  %v760_v34 = vmul.f32 %v2466_v21, %v2466_v21  ;;  %v2483_v30 = vunpack.c.l.bf16 %v1798_v61  ;;  %v1772_v21 = vld [vmem:[%s2121_s22 + $0x20] sm:$0xff]  }
  0x3a   : > { %3320 = vst [vmem:[#allocation43_spill] sm:$0xff] %v2478_v35  ;;  %1871 = vmatpush3.msra.mxu0 %v730_v63  ;;  %v2485_v9 = vunpack.c.l.bf16 %v1774_v55  ;;  %v2487_v18 = vunpack.c.l.bf16 %v1790_v50  ;;  %1906 = vmatpush3.msra.mxu1 %v762_v58  ;;  %v743_v16 = vmul.f32 %v2478_v35, %v2478_v35  ;;  %v2491_v25 = vunpack.c.h.bf16 %v1781_v37  ;;  %v1796_v35 = vld [vmem:[%s2121_s22 + $0xe0] sm:$0xff]  }
  0x3b   : > { %3321 = vst [vmem:[#allocation44_spill] sm:$0xff] %v2483_v30  ;;  %1872 = vmatprep.subr.mxu0 %v745_v36  ;;  %v2493_v46 = vunpack.c.h.bf16 %v1797_v20  ;;  %v2495_v63 = vunpack.c.h.bf16 %v1773_v13  ;;  %1907 = vmatprep.subr.mxu1 %v777_v8  ;;  %v775_v55 = vmul.f32 %v2483_v30, %v2483_v30  ;;  %v2503_v61 = vunpack.c.h.bf16 %v1789_v15  ;;  %v1780_v36 = vld [vmem:[%s2121_s22 + $0x60] sm:$0xff]  }
  0x3c   : > { %3322 = vst [vmem:[#allocation45_spill] sm:$0xff] %v2485_v9  ;;  %3323 = vst [vmem:[#allocation46_spill] sm:$0xff] %v2487_v18  ;;  %1873 = vmatpush3.msra.mxu0 %v729_v10  ;;  %v727_v50 = vmul.f32 %v2485_v9, %v2485_v9  ;;  %v759_v58 = vmul.f32 %v2487_v18, %v2487_v18  ;;  %1908 = vmatpush3.msra.mxu1 %v761_v48  ;;  %v2514_v9 = vunpack.c.l.bf16 %v1781_v37 }
  0x3d   : > { %3324 = vst [vmem:[#allocation47_spill] sm:$0xff] %v2491_v25  ;;  %3325 = vst [vmem:[#allocation48_spill] sm:$0xff] %v2493_v46  ;;  %1874 = vmatprep.subr.mxu0 %v744_v49  ;;  %v742_v8 = vmul.f32 %v2491_v25, %v2491_v25  ;;  %v774_v10 = vmul.f32 %v2493_v46, %v2493_v46  ;;  %v726_v30 = vmul.f32 %v2495_v63, %v2495_v63  ;;  %v1787_v46 = vld [vmem:[%s2121_s22 + $0x98] sm:$0xff]  }
  0x3e   : > { %3326 = vst [vmem:[#allocation49_spill] sm:$0xff] %v2495_v63  ;;  %3327 = vst [vmem:[#allocation50_spill] sm:$0xff] %v2503_v61  ;;  %1909 = vmatprep.subr.mxu1 %v776_v3  ;;  %1875 = vmatpush3.msra.mxu0 %v728_v38  ;;  %v758_v18 = vmul.f32 %v2503_v61, %v2503_v61  ;;  %v2519_v48 = vunpack.c.l.bf16 %v1797_v20  ;;  %v2521_v49 = vunpack.c.l.bf16 %v1773_v13  ;;  %v2523_v25 = vunpack.c.l.bf16 %v1789_v15  ;;  %v1771_v61 = vld [vmem:[%s2121_s22 + $0x18] sm:$0xff]  }
  0x3f   : > { %3328 = vst [vmem:[#allocation51_spill] sm:$0xff] %v2514_v9  ;;  %1910 = vmatpush3.msra.mxu1 %v760_v34  ;;  %1876 = vmatprep.subr.mxu0 %v743_v16  ;;  %v741_v37 = vmul.f32 %v2514_v9, %v2514_v9  ;;  %v2527_v63 = vunpack.c.h.bf16 %v1780_v36  ;;  %v2529_v3 = vunpack.c.h.bf16 %v1796_v35  ;;  %v2531_v38 = vunpack.c.h.bf16 %v1772_v21  ;;  %v1779_v16 = vld [vmem:[%s2121_s22 + $0x58] sm:$0xff]  }
  0x40   : > { %3329 = vst [vmem:[#allocation52_spill] sm:$0xff] %v2519_v48  ;;  %3330 = vst [vmem:[#allocation53_spill] sm:$0xff] %v2521_v49  ;;  %1911 = vmatprep.subr.mxu1 %v775_v55  ;;  %1877 = vmatpush3.msra.mxu0 %v727_v50  ;;  %v773_v13 = vmul.f32 %v2519_v48, %v2519_v48  ;;  %v725_v20 = vmul.f32 %v2521_v49, %v2521_v49  ;;  %v2539_v15 = vunpack.c.h.bf16 %v1788_v51  ;;  %v1795_v9 = vld [vmem:[%s2121_s22 + $0xd8] sm:$0xff]  }
  0x41   : > { %3331 = vst [vmem:[#allocation54_spill] sm:$0xff] %v2523_v25  ;;  %3332 = vst [vmem:[#allocation55_spill] sm:$0xff] %v2527_v63  ;;  %v757_v34 = vmul.f32 %v2523_v25, %v2523_v25  ;;  %1912 = vmatpush3.msra.mxu1 %v759_v58  ;;  %1878 = vmatprep.subr.mxu0 %v742_v8  ;;  %v740_v55 = vmul.f32 %v2527_v63, %v2527_v63  ;;  %v2550_v49 = vunpack.c.l.bf16 %v1780_v36 }
  0x42   : > { %3333 = vst [vmem:[#allocation56_spill] sm:$0xff] %v2529_v3  ;;  %3334 = vst [vmem:[#allocation57_spill] sm:$0xff] %v2531_v38  ;;  %v772_v50 = vmul.f32 %v2529_v3, %v2529_v3  ;;  %v724_v48 = vmul.f32 %v2531_v38, %v2531_v38  ;;  %1913 = vmatprep.subr.mxu1 %v774_v10  ;;  %1879 = vmatpush3.msra.mxu0 %v726_v30  ;;  %v2555_v58 = vunpack.c.l.bf16 %v1796_v35  ;;  %v1786_v3 = vld [vmem:[%s2121_s22 + $0x90] sm:$0xff]  }
  0x43   : > { %3335 = vst [vmem:[#allocation58_spill] sm:$0xff] %v2539_v15  ;;  %3336 = vst [vmem:[#allocation59_spill] sm:$0xff] %v2550_v49  ;;  %v756_v25 = vmul.f32 %v2539_v15, %v2539_v15  ;;  %v2557_v8 = vunpack.c.l.bf16 %v1772_v21  ;;  %v2559_v63 = vunpack.c.l.bf16 %v1788_v51  ;;  %1914 = vmatpush3.msra.mxu1 %v758_v18  ;;  %1880 = vmatprep.subr.mxu0 %v741_v37  ;;  %v2563_v38 = vunpack.c.h.bf16 %v1779_v16  ;;  %v1778_v37 = vld [vmem:[%s2121_s22 + $0x50] sm:$0xff]  }
  0x44   : > { %3337 = vst [vmem:[#allocation60_spill] sm:$0xff] %v2555_v58  ;;  %v739_v36 = vmul.f32 %v2550_v49, %v2550_v49  ;;  %v2565_v30 = vunpack.c.h.bf16 %v1795_v9  ;;  %v2567_v10 = vunpack.c.h.bf16 %v1771_v61  ;;  %1915 = vmatprep.subr.mxu1 %v773_v13  ;;  %1881 = vmatpush3.msra.mxu0 %v725_v20  ;;  %v771_v35 = vmul.f32 %v2555_v58, %v2555_v58  ;;  %v1794_v49 = vld [vmem:[%s2121_s22 + $0xd0] sm:$0xff]  }
  0x45   : > { %3338 = vst [vmem:[#allocation61_spill] sm:$0xff] %v2557_v8  ;;  %3339 = vst [vmem:[#allocation62_spill] sm:$0xff] %v2559_v63  ;;  %v723_v51 = vmul.f32 %v2557_v8, %v2557_v8  ;;  %v755_v18 = vmul.f32 %v2559_v63, %v2559_v63  ;;  %v2575_v21 = vunpack.c.h.bf16 %v1787_v46  ;;  %v1770_v15 = vld [vmem:[%s2121_s22 + $0x10] sm:$0xff]   ;;  %1916 = vmatpush3.msra.mxu1 %v757_v34  ;;  %1882 = vmatprep.subr.mxu0 %v740_v55 }
  0x46   : > { %3340 = vst [vmem:[#allocation63_spill] sm:$0xff] %v2563_v38  ;;  %3341 = vst [vmem:[#allocation64_spill] sm:$0xff] %v2565_v30  ;;  %v738_v13 = vmul.f32 %v2563_v38, %v2563_v38  ;;  %v770_v20 = vmul.f32 %v2565_v30, %v2565_v30  ;;  %v722_v58 = vmul.f32 %v2567_v10, %v2567_v10  ;;  %v2586_v8 = vunpack.c.l.bf16 %v1779_v16  ;;  %v1785_v30 = vld [vmem:[%s2121_s22 + $0x88] sm:$0xff]  }
  0x47   : > { %3342 = vst [vmem:[#allocation65_spill] sm:$0xff] %v2567_v10  ;;  %3343 = vst [vmem:[#allocation66_spill] sm:$0xff] %v2575_v21  ;;  %1917 = vmatprep.subr.mxu1 %v772_v50  ;;  %1883 = vmatpush3.msra.mxu0 %v724_v48  ;;  %v754_v63 = vmul.f32 %v2575_v21, %v2575_v21  ;;  %v2591_v34 = vunpack.c.l.bf16 %v1795_v9  ;;  %v2593_v55 = vunpack.c.l.bf16 %v1771_v61  ;;  %v2595_v38 = vunpack.c.l.bf16 %v1787_v46  ;;  %v1769_v21 = vld [vmem:[%s2121_s22 + $0x8] sm:$0xff]  }
  0x48   : > { %3344 = vst [vmem:[#allocation67_spill] sm:$0xff] %v2586_v8  ;;  %1918 = vmatpush3.msra.mxu1 %v756_v25  ;;  %1884 = vmatprep.subr.mxu0 %v739_v36  ;;  %v737_v16 = vmul.f32 %v2586_v8, %v2586_v8  ;;  %v2599_v10 = vunpack.c.h.bf16 %v1778_v37  ;;  %v2601_v48 = vunpack.c.h.bf16 %v1794_v49  ;;  %v2603_v50 = vunpack.c.h.bf16 %v1770_v15  ;;  %v1777_v36 = vld [vmem:[%s2121_s22 + $0x48] sm:$0xff]  }
  0x49   : > { %3345 = vst [vmem:[#allocation68_spill] sm:$0xff] %v2591_v34  ;;  %3346 = vst [vmem:[#allocation69_spill] sm:$0xff] %v2593_v55  ;;  %1919 = vmatprep.subr.mxu1 %v771_v35  ;;  %1885 = vmatpush3.msra.mxu0 %v723_v51  ;;  %v769_v9 = vmul.f32 %v2591_v34, %v2591_v34  ;;  %v721_v46 = vmul.f32 %v2593_v55, %v2593_v55  ;;  %v2611_v61 = vunpack.c.h.bf16 %v1786_v3  ;;  %v1793_v8 = vld [vmem:[%s2121_s22 + $0xc8] sm:$0xff]  }
  0x4a   : > { %3347 = vst [vmem:[#allocation70_spill] sm:$0xff] %v2595_v38  ;;  %3348 = vst [vmem:[#allocation71_spill] sm:$0xff] %v2599_v10  ;;  %v753_v25 = vmul.f32 %v2595_v38, %v2595_v38  ;;  %1920 = vmatpush3.msra.mxu1 %v755_v18  ;;  %1886 = vmatprep.subr.mxu0 %v738_v13  ;;  %v736_v35 = vmul.f32 %v2599_v10, %v2599_v10  ;;  %v2622_v55 = vunpack.c.l.bf16 %v1778_v37 }
  0x4b   : > { %3349 = vst [vmem:[#allocation72_spill] sm:$0xff] %v2601_v48  ;;  %3350 = vst [vmem:[#allocation73_spill] sm:$0xff] %v2603_v50  ;;  %v768_v51 = vmul.f32 %v2601_v48, %v2601_v48  ;;  %v720_v34 = vmul.f32 %v2603_v50, %v2603_v50  ;;  %1921 = vmatprep.subr.mxu1 %v770_v20  ;;  %1887 = vmatpush3.msra.mxu0 %v722_v58  ;;  %v2627_v18 = vunpack.c.l.bf16 %v1794_v49  ;;  %v1784_v48 = vld [vmem:[%s2121_s22 + $0x80] sm:$0xff]  }
  0x4c   : > { %3351 = vst [vmem:[#allocation74_spill] sm:$0xff] %v2611_v61  ;;  %3352 = vst [vmem:[#allocation75_spill] sm:$0xff] %v2622_v55  ;;  %v752_v38 = vmul.f32 %v2611_v61, %v2611_v61  ;;  %v2629_v13 = vunpack.c.l.bf16 %v1770_v15  ;;  %v2631_v10 = vunpack.c.l.bf16 %v1786_v3  ;;  %1922 = vmatpush3.msra.mxu1 %v754_v63  ;;  %1888 = vmatprep.subr.mxu0 %v737_v16  ;;  %v2635_v50 = vunpack.c.h.bf16 %v1777_v36  ;;  %v1776_v16 = vld [vmem:[%s2121_s22 + $0x40] sm:$0xff]  }
  0x4d   : > { %3353 = vst [vmem:[#allocation76_spill] sm:$0xff] %v2627_v18  ;;  %v735_v37 = vmul.f32 %v2622_v55, %v2622_v55  ;;  %v2637_v58 = vunpack.c.h.bf16 %v1793_v8  ;;  %v2639_v20 = vunpack.c.h.bf16 %v1769_v21  ;;  %1923 = vmatprep.subr.mxu1 %v769_v9  ;;  %1889 = vmatpush3.msra.mxu0 %v721_v46  ;;  %v767_v49 = vmul.f32 %v2627_v18, %v2627_v18  ;;  %v1792_v55 = vld [vmem:[%s2121_s22 + $0xc0] sm:$0xff]  }
  0x4e   : > { %3354 = vst [vmem:[#allocation77_spill] sm:$0xff] %v2629_v13  ;;  %3355 = vst [vmem:[#allocation78_spill] sm:$0xff] %v2631_v10  ;;  %v719_v3 = vmul.f32 %v2629_v13, %v2629_v13  ;;  %v751_v63 = vmul.f32 %v2631_v10, %v2631_v10  ;;  %v2647_v15 = vunpack.c.h.bf16 %v1785_v30  ;;  %v1611_v61 = vld [vmem:[%s2121_s22] sm:$0xff]   ;;  %1924 = vmatpush3.msra.mxu1 %v753_v25  ;;  %1890 = vmatprep.subr.mxu0 %v736_v35 }
  0x4f   : > { %3356 = vst [vmem:[#allocation79_spill] sm:$0xff] %v2635_v50  ;;  %3357 = vst [vmem:[#allocation80_spill] sm:$0xff] %v2637_v58  ;;  %v734_v9 = vmul.f32 %v2635_v50, %v2635_v50  ;;  %v766_v46 = vmul.f32 %v2637_v58, %v2637_v58  ;;  %v718_v18 = vmul.f32 %v2639_v20, %v2639_v20  ;;  %v2658_v13 = vunpack.c.l.bf16 %v1777_v36 }
  0x50   : > { %3358 = vst [vmem:[#allocation81_spill] sm:$0xff] %v2639_v20  ;;  %3359 = vst [vmem:[#allocation82_spill] sm:$0xff] %v2647_v15  ;;  %1925 = vmatprep.subr.mxu1 %v768_v51  ;;  %1891 = vmatpush3.msra.mxu0 %v720_v34  ;;  %v750_v10 = vmul.f32 %v2647_v15, %v2647_v15  ;;  %v2663_v29 = vunpack.c.l.bf16 %v1793_v8  ;;  %v2665_v25 = vunpack.c.l.bf16 %v1769_v21  ;;  %v2667_v35 = vunpack.c.l.bf16 %v1785_v30  ;;  %v3427_v15 = vld [vmem:[#allocation32_spill] sm:$0xff] }
  0x51   : > { %3360 = vst [vmem:[#allocation83_spill] sm:$0xff] %v2658_v13  ;;  %1926 = vmatpush3.msra.mxu1 %v752_v38  ;;  %1892 = vmatprep.subr.mxu0 %v735_v37  ;;  %v733_v58 = vmul.f32 %v2658_v13, %v2658_v13  ;;  %v2671_v20 = vunpack.c.h.bf16 %v1776_v16  ;;  %v2673_v36 = vunpack.c.h.bf16 %v1792_v55  ;;  %v2675_v51 = vunpack.c.h.bf16 %v1611_v61 }
  0x52   : > { %3361 = vst [vmem:[#allocation84_spill] sm:$0xff] %v2663_v29  ;;  %3362 = vst [vmem:[#allocation85_spill] sm:$0xff] %v2665_v25  ;;  %1927 = vmatprep.subr.mxu1 %v767_v49  ;;  %1893 = vmatpush3.msra.mxu0 %v719_v3  ;;  %v765_v8 = vmul.f32 %v2663_v29, %v2663_v29  ;;  %v717_v30 = vmul.f32 %v2665_v25, %v2665_v25  ;;  %v2681_v21 = vunpack.c.h.bf16 %v1784_v48 }
  0x53   : > { %3363 = vst [vmem:[#allocation86_spill] sm:$0xff] %v2667_v35  ;;  %3364 = vst [vmem:[#allocation87_spill] sm:$0xff] %v2671_v20  ;;  %1928 = vmatpush3.msra.mxu1 %v751_v63  ;;  %1894 = vmatprep.subr.mxu0 %v734_v9  ;;  %v749_v38 = vmul.f32 %v2667_v35, %v2667_v35  ;;  %v732_v34 = vmul.f32 %v2671_v20, %v2671_v20  ;;  %v2689_v49 = vunpack.c.l.bf16 %v1776_v16  ;;  %v3415_v35 = vld [vmem:[#allocation26_spill] sm:$0xff] }
  0x54   : > { %3365 = vst [vmem:[#allocation88_spill] sm:$0xff] %v2673_v36  ;;  %3366 = vst [vmem:[#allocation89_spill] sm:$0xff] %v2675_v51  ;;  %v764_v37 = vmul.f32 %v2673_v36, %v2673_v36  ;;  %1929 = vmatprep.subr.mxu1 %v766_v46  ;;  %1895 = vmatpush3.msra.mxu0 %v718_v18  ;;  %v716_v3 = vmul.f32 %v2675_v51, %v2675_v51  ;;  %v2693_v25 = vunpack.c.l.bf16 %v1792_v55 }
  0x55   : > { %3367 = vst [vmem:[#allocation90_spill] sm:$0xff] %v2681_v21  ;;  %3368 = vst [vmem:[#allocation91_spill] sm:$0xff] %v2689_v49  ;;  %v2695_v63 = vunpack.c.l.bf16 %v1611_v61  ;;  %v2697_v9 = vunpack.c.l.bf16 %v1784_v48  ;;  %1930 = vmatpush3.msra.mxu1 %v750_v10  ;;  %1896 = vmatprep.subr.mxu0 %v733_v58  ;;  %v748_v20 = vmul.f32 %v2681_v21, %v2681_v21  ;;  %v937_v48 = vlaneseq }
  0x56   : > { %3369 = vst [vmem:[#allocation92_spill] sm:$0xff] %v2693_v25  ;;  %v731_v16 = vmul.f32 %v2689_v49, %v2689_v49  ;;  %1931 = vmatprep.subr.mxu1 %v765_v8  ;;  %1897 = vmatpush3.msra.mxu0 %v717_v30  ;;  %v763_v18 = vmul.f32 %v2693_v25, %v2693_v25 }
  0x57   : > { %3370 = vst [vmem:[#allocation93_spill] sm:$0xff] %v2695_v63  ;;  %3371 = vst [vmem:[#allocation94_spill] sm:$0xff] %v2697_v9  ;;  %v715_v55 = vmul.f32 %v2695_v63, %v2695_v63  ;;  %1932 = vmatpush3.msra.mxu1 %v749_v38  ;;  %1898 = vmatprep.subr.mxu0 %v732_v34  ;;  %v747_v10 = vmul.f32 %v2697_v9, %v2697_v9  ;;  %v2713_v8 = vshrl.u32 %v937_v48, 7  ;;  %v2718_v34 = vld [vmem:[%s3179_s2] sm:$0xf] }
  0x58   : > { %1933 = vmatprep.subr.mxu1 %v764_v37  ;;  %1899 = vmatpush3.msra.mxu0 %v716_v3  ;;  %3373 = vst [vmem:[#allocation96_spill] sm:$0xff] %v2718_v34 }
  0x59   : > { %1934 = vmatpush3.msra.mxu1 %v748_v20  ;;  %1900 = vmatprep.subr.mxu0 %v731_v16  ;;  %3372 = vst [vmem:[#allocation95_spill] sm:$0xff] %v2713_v8  ;;  %v1210_v37 = vsub.s32 1, %v2713_v8  ;;  %v1218_v3 = vsub.s32 3, %v2713_v8 }
  0x5a   : > { %1935 = vmatprep.subr.mxu1 %v763_v18  ;;  %1901 = vmatpush3.msra.mxu0 %v715_v55 }
  0x5b   : > { %843 = vmatprep.mubr.f32.mxu0 %v3318_v27  ;;  %1936 = vmatpush3.msra.mxu1 %v747_v10  ;;  %v1219_v18 = vrot.slane %v2718_v34, %v1218_v3 }
  0x5c   : > { %913 = vmatprep.mubr.f32.mxu1 %v3318_v27  ;;  %844 = vmatmul.mubr.f32.vlgmr.msra.gmra.mxu0 %v3318_v27 }
  0x5d   : > { %914 = vmatmul.mubr.f32.vlgmr.msra.gmra.mxu1 %v3318_v27  ;;  %v1211_v27 = vrot.slane %v2718_v34, %v1210_v37  ;;  %v3400_v34 = vld [vmem:[#allocation16_spill] sm:$0xff] }
  0x5e   : > { %1358 = vmatprep.mubr.f32.mxu1 %v1219_v18 }
  0x5f   : > { %1288 = vmatprep.mubr.f32.mxu0 %v1211_v27 }
  0xf7   : > { %v1832_v61 = vpop.f32.mrf.mxu0 }
  0xf9   : > { %v1867_v58 = vpop.f32.mrf.mxu1  ;;  %v1833_v46 = vpop.f32.mrf.mxu0 }
  0xfa   : > { %v1834_v30 = vadd.f32 %v1833_v46, %v1832_v61 }
  0xfb   : > { %v1868_v20 = vpop.f32.mrf.mxu1 }
  0xfc   : > { %v1869_v38 = vadd.f32 %v1868_v20, %v1867_v58 }
  0xfe   : > { %v712_v16 = vadd.f32 %v1869_v38, %v1834_v30  ;;  %v2725_v38 = vsub.s32 0, %v2713_v8  ;;  %v3405_v8 = vld [vmem:[#allocation21_spill] sm:$0xff] }
 0x100   : > { %2036 = vrsqrt.f32 %v712_v16  ;;  %vm921_vm0 = vcmp.eq.f32.partialorder %v712_v16, inf  ;;  %v924_v61 = vand.u32 2147483648, %v712_v16  ;;  %vm923_vm1 = vcmp.eq.f32.partialorder %v712_v16, 0.0  ;;  %3374 = vst [vmem:[#allocation97_spill] sm:$0xff] %v2725_v38 }
 0x10d   : > { %v2037_v55 = vpop.eup %2036 }
 0x10e   : > { %v920_v10 = vmul.f32 %v2037_v55, %v712_v16 }
 0x110   : > { %v922_v48 = vsel %vm921_vm0, %v712_v16, %v920_v10 }
 0x111   : > { %v925_v58 = vsel %vm923_vm1, %v924_v61, %v922_v48 }
 0x112   : > { %v926_v63 = vadd.f32 1e-10, %v925_v58 }
 0x114   : > { %2038 = vrcp.f32 %v926_v63 }
 0x11c   : > { %v1902_v46 = vpop.f32.mrf.mxu0 }
 0x11d   : > { %v1937_v20 = vpop.f32.mrf.mxu1 }
 0x11e   : > { %v1903_v9 = vpop.f32.mrf.mxu0 }
 0x11f   : > { %v1904_v25 = vadd.f32 %v1903_v9, %v1902_v46  ;;  %v1938_v49 = vpop.f32.mrf.mxu1 }
 0x120   : > { %v1939_v37 = vadd.f32 %v1938_v49, %v1937_v20  ;;  %v3389_v20 = vld [vmem:[#allocation5_spill] sm:$0xff] }
 0x121   : > { %v2039_v3 = vpop.eup %2038 }
 0x122   : > { %v916_v30 = vadd.f32 %v1939_v37, %v1904_v25  ;;  %v2728_v55 = vrot.slane %v2039_v3, %v2725_v38  ;;  %v3390_v37 = vld [vmem:[#allocation6_spill] sm:$0xff] }
 0x124   : > { %2040 = vrsqrt.f32 %v916_v30  ;;  %vm930_vm2 = vcmp.eq.f32.partialorder %v916_v30, inf  ;;  %v933_v16 = vand.u32 2147483648, %v916_v30  ;;  %vm932_vm3 = vcmp.eq.f32.partialorder %v916_v30, 0.0 }
 0x125   : > { %v2732_v25 = vmul.f32 %v2409_v43, %v2728_v55  ;;  %v2736_v49 = vmul.f32 %v2398_v17, %v2728_v55  ;;  %v2740_v63 = vmul.f32 %v2373_v24, %v2728_v55  ;;  %v2744_v61 = vmul.f32 %v2362_v42, %v2728_v55 }
 0x126   : > { %v2748_v58 = vmul.f32 %v2337_v57, %v2728_v55  ;;  %v2752_v43 = vmul.f32 %v2326_v44, %v2728_v55  ;;  %v2756_v17 = vmul.f32 %v2301_v1, %v2728_v55  ;;  %v2760_v24 = vmul.f32 %v2290_v52, %v2728_v55 }
 0x127   : > { %3375 = vst [vmem:[#allocation98_spill] sm:$0xff] %v2732_v25  ;;  %3376 = vst [vmem:[#allocation99_spill] sm:$0xff] %v2736_v49  ;;  %v2764_v42 = vmul.f32 %v2265_v28, %v2728_v55  ;;  %v2768_v57 = vmul.f32 %v2254_v22, %v2728_v55  ;;  %v2772_v44 = vmul.f32 %v2229_v59, %v2728_v55  ;;  %v3402_v25 = vld [vmem:[#allocation18_spill] sm:$0xff]  ;;  %v3404_v49 = vld [vmem:[#allocation20_spill] sm:$0xff] }
 0x128   : > { %3377 = vst [vmem:[#allocation100_spill] sm:$0xff] %v2740_v63  ;;  %3378 = vst [vmem:[#allocation101_spill] sm:$0xff] %v2744_v61  ;;  %v2776_v1 = vmul.f32 %v2218_v53, %v2728_v55  ;;  %v2780_v52 = vmul.f32 %v2193_v39, %v2728_v55  ;;  %v2784_v28 = vmul.f32 %v2180_v32, %v2728_v55 }
 0x129   : > { %3379 = vst [vmem:[#allocation102_spill] sm:$0xff] %v2748_v58  ;;  %3380 = vst [vmem:[#allocation103_spill] sm:$0xff] %v2752_v43  ;;  %v2788_v22 = vmul.f32 %v2141_v11, %v2728_v55  ;;  %v956_v59 = vmul.f32 %v2143_v12, %v2728_v55  ;;  %v971_v46 = vmul.f32 %v2126_v4, %v2728_v55 }
 0x12a   : > { %3381 = vst [vmem:[#allocation104_spill] sm:$0xff] %v2756_v17  ;;  %v972_v53 = vmul.f32 %v2128_v5, %v2728_v55  ;;  %v2798_v39 = vmul.f32 %v2411_v41, %v2728_v55  ;;  %v2802_v32 = vmul.f32 %v2400_v26, %v2728_v55  ;;  %v2806_v11 = vmul.f32 %v2375_v0, %v2728_v55 }
 0x12b   : > { %v2810_v12 = vmul.f32 %v2364_v47, %v2728_v55  ;;  %v2814_v4 = vmul.f32 %v2339_v62, %v2728_v55  ;;  %v2818_v5 = vmul.f32 %v2328_v45, %v2728_v55  ;;  %v2822_v26 = vmul.f32 %v2303_v2, %v2728_v55 }
 0x12c   : > { %3382 = vst [vmem:[#allocation105_spill] sm:$0xff] %v2798_v39  ;;  %3383 = vst [vmem:[#allocation106_spill] sm:$0xff] %v2802_v32  ;;  %v2826_v0 = vmul.f32 %v2292_v56, %v2728_v55  ;;  %v2830_v47 = vmul.f32 %v2267_v31, %v2728_v55  ;;  %v2834_v62 = vmul.f32 %v2256_v23, %v2728_v55  ;;  %v3401_v39 = vld [vmem:[#allocation17_spill] sm:$0xff]  ;;  %v3403_v32 = vld [vmem:[#allocation19_spill] sm:$0xff] }
 0x12d   : > { %3384 = vst [vmem:[#allocation107_spill] sm:$0xff] %v2806_v11  ;;  %3385 = vst [vmem:[#allocation108_spill] sm:$0xff] %v2810_v12  ;;  %v2838_v45 = vmul.f32 %v2231_v60, %v2728_v55  ;;  %v2842_v2 = vmul.f32 %v2220_v54, %v2728_v55  ;;  %v2846_v56 = vmul.f32 %v2195_v40, %v2728_v55 }
 0x12e   : > { %3386 = vst [vmem:[#allocation109_spill] sm:$0xff] %v2814_v4  ;;  %3387 = vst [vmem:[#allocation110_spill] sm:$0xff] %v2818_v5  ;;  %v2850_v31 = vmul.f32 %v2182_v33, %v2728_v55  ;;  %v987_v23 = vmul.f32 %v2148_v14, %v2728_v55  ;;  %v988_v41 = vmul.f32 %v2156_v19, %v2728_v55  ;;  %v3392_v19 = vld [vmem:[#allocation8_spill] sm:$0xff] }
 0x12f   : > { %3388 = vst [vmem:[#allocation111_spill] sm:$0xff] %v2822_v26  ;;  %v1003_v60 = vmul.f32 %v2130_v6, %v2728_v55  ;;  %v1004_v54 = vmul.f32 %v2132_v7, %v2728_v55  ;;  %v2862_v40 = vmul.f32 %v3389_v20, %v2728_v55  ;;  %v2866_v33 = vmul.f32 %v3390_v37, %v2728_v55  ;;  %v3393_v6 = vld [vmem:[#allocation9_spill] sm:$0xff]  ;;  %v3394_v7 = vld [vmem:[#allocation10_spill] sm:$0xff] }
 0x130   : > { %v2874_v3 = vmul.f32 %v3392_v19, %v2728_v55  ;;  %v3397_v20 = vld [vmem:[#allocation13_spill] sm:$0xff]  ;;  %v2949_v12 = vmul.f32 %v3415_v35, %v2728_v55 }
 0x131   : > { %v2041_v27 = vpop.eup %2040  ;;  %v2894_v37 = vmul.f32 %v3397_v20, %v2728_v55  ;;  %v2914_v20 = vmul.f32 %v3402_v25, %v2728_v55  ;;  %v3409_v25 = vld [vmem:[#allocation23_spill] sm:$0xff] }
 0x132   : > { %v929_v18 = vmul.f32 %v2041_v27, %v916_v30  ;;  %v2878_v27 = vmul.f32 %v3393_v6, %v2728_v55  ;;  %v3399_v6 = vld [vmem:[#allocation15_spill] sm:$0xff]  ;;  %v2934_v36 = vmul.f32 %v3409_v25, %v2728_v55  ;;  %3416 = vst [vmem:[#allocation10_spill] sm:$0xff] %v2949_v12  ;;  %v3419_v25 = vld [vmem:[#allocation28_spill] sm:$0xff] }
 0x133   : > { %v2957_v61 = vmul.f32 %v3419_v25, %v2728_v55 }
 0x134   : > { %v931_v10 = vsel %vm930_vm2, %v916_v30, %v929_v18  ;;  %v3391_v30 = vld [vmem:[#allocation7_spill] sm:$0xff]  ;;  %v2882_v18 = vmul.f32 %v3394_v7, %v2728_v55  ;;  %v2902_v7 = vmul.f32 %v3399_v6, %v2728_v55  ;;  %v2922_v6 = vmul.f32 %v3404_v49, %v2728_v55  ;;  %v3413_v49 = vld [vmem:[#allocation25_spill] sm:$0xff] }
 0x135   : > { %v934_v48 = vsel %vm932_vm3, %v933_v16, %v931_v10  ;;  %v2870_v14 = vmul.f32 %v3391_v30, %v2728_v55  ;;  %v3395_v16 = vld [vmem:[#allocation11_spill] sm:$0xff]  ;;  %v3398_v30 = vld [vmem:[#allocation14_spill] sm:$0xff]  ;;  %3410 = vst [vmem:[#allocation7_spill] sm:$0xff] %v2934_v36  ;;  %v2942_v63 = vmul.f32 %v3413_v49, %v2728_v55 }
 0x136   : > { %v935_v9 = vadd.f32 1e-10, %v934_v48  ;;  %v2886_v10 = vmul.f32 %v3395_v16, %v2728_v55  ;;  %v3396_v48 = vld [vmem:[#allocation12_spill] sm:$0xff]  ;;  %v2898_v19 = vmul.f32 %v3398_v30, %v2728_v55  ;;  %v2906_v16 = vmul.f32 %v3400_v34, %v2728_v55  ;;  %v3423_v49 = vld [vmem:[#allocation30_spill] sm:$0xff] }
 0x137   : > { %v2918_v30 = vmul.f32 %v3403_v32, %v2728_v55  ;;  %v2926_v34 = vmul.f32 %v3405_v8, %v2728_v55  ;;  %v3411_v32 = vld [vmem:[#allocation24_spill] sm:$0xff]  ;;  %3414 = vst [vmem:[#allocation9_spill] sm:$0xff] %v2942_v63  ;;  %3420 = vst [vmem:[#allocation12_spill] sm:$0xff] %v2957_v61  ;;  %v3433_v63 = vld [vmem:[#allocation35_spill] sm:$0xff] }
 0x138   : > { %2042 = vrcp.f32 %v935_v9  ;;  %v2890_v9 = vmul.f32 %v3396_v48, %v2728_v55  ;;  %v2910_v48 = vmul.f32 %v3401_v39, %v2728_v55  ;;  %v3407_v39 = vld [vmem:[#allocation22_spill] sm:$0xff]  ;;  %v2938_v11 = vmul.f32 %v3411_v32, %v2728_v55  ;;  %v3421_v32 = vld [vmem:[#allocation29_spill] sm:$0xff]  ;;  %v3430_v61 = vld [vmem:[#allocation4_spill] sm:$0xff] }
 0x139   : > { %3406 = vst [vmem:[#allocation5_spill] sm:$0xff] %v2926_v34  ;;  %v2930_v51 = vmul.f32 %v3407_v39, %v2728_v55  ;;  %v3417_v39 = vld [vmem:[#allocation27_spill] sm:$0xff]  ;;  %v2961_v13 = vmul.f32 %v3421_v32, %v2728_v55  ;;  %v3431_v32 = vld [vmem:[#allocation33_spill] sm:$0xff] }
 0x13a   : > { %3412 = vst [vmem:[#allocation8_spill] sm:$0xff] %v2938_v11  ;;  %v2953_v29 = vmul.f32 %v3417_v39, %v2728_v55  ;;  %v2973_v39 = vmul.f32 %v3427_v15, %v2728_v55  ;;  %v3435_v15 = vld [vmem:[#allocation37_spill] sm:$0xff] }
 0x13b   : > { %3408 = vst [vmem:[#allocation6_spill] sm:$0xff] %v2930_v51  ;;  %3422 = vst [vmem:[#allocation13_spill] sm:$0xff] %v2961_v13 }
 0x13c   : > { %3418 = vst [vmem:[#allocation11_spill] sm:$0xff] %v2953_v29  ;;  %3428 = vst [vmem:[#allocation16_spill] sm:$0xff] %v2973_v39  ;;  %v3429_v29 = vld [vmem:[#allocation3_spill] sm:$0xff] }
 0x145   : > { %v2043_v21 = vpop.eup %2042 }
 0x146   : > { %v2945_v8 = vrot.slane %v2043_v21, %v2725_v38  ;;  %v2965_v21 = vmul.f32 %v3423_v49, %v2728_v55  ;;  %v3425_v38 = vld [vmem:[#allocation31_spill] sm:$0xff]  ;;  %v3432_v49 = vld [vmem:[#allocation34_spill] sm:$0xff] }
 0x147   : > { %v2969_v35 = vmul.f32 %v3425_v38, %v2728_v55 }
 0x148   : > { %3424 = vst [vmem:[#allocation14_spill] sm:$0xff] %v2965_v21  ;;  %v1024_v25 = vmul.f32 %v3429_v29, %v2945_v8  ;;  %v1056_v12 = vmul.f32 %v3430_v61, %v2945_v8  ;;  %v1040_v13 = vmul.f32 %v3431_v32, %v2945_v8  ;;  %v1072_v21 = vmul.f32 %v3432_v49, %v2945_v8  ;;  %v3436_v29 = vld [vmem:[#allocation38_spill] sm:$0xff] }
 0x149   : > { %3426 = vst [vmem:[#allocation15_spill] sm:$0xff] %v2969_v35  ;;  %v1039_v38 = vmul.f32 %v3433_v63, %v2945_v8  ;;  %v3434_v35 = vld [vmem:[#allocation36_spill] sm:$0xff]  ;;  %v1023_v55 = vmul.f32 %v3435_v15, %v2945_v8  ;;  %v1055_v39 = vmul.f32 %v3436_v29, %v2945_v8 }
 0x14a   : > { %v1071_v4 = vmul.f32 %v3434_v35, %v2945_v8  ;;  %v1088_v58 = vsub.f32 %v956_v59, %v1024_v25  ;;  %v1104_v61 = vsub.f32 %v972_v53, %v1040_v13  ;;  %v1120_v50 = vsub.f32 %v988_v41, %v1056_v12  ;;  %v3437_v59 = vld [vmem:[#allocation39_spill] sm:$0xff]  ;;  %v3438_v53 = vld [vmem:[#allocation40_spill] sm:$0xff]  ;;  %v3439_v12 = vld [vmem:[#allocation41_spill] sm:$0xff] }
 0x14b   : > { %v1136_v11 = vsub.f32 %v1004_v54, %v1072_v21  ;;  %v1103_v32 = vsub.f32 %v971_v46, %v1039_v38  ;;  %v1087_v49 = vsub.f32 %v2788_v22, %v1023_v55  ;;  %v1119_v5 = vsub.f32 %v987_v23, %v1055_v39  ;;  %v3443_v25 = vld [vmem:[#allocation45_spill] sm:$0xff] }
 0x14c   : > { %v1135_v36 = vsub.f32 %v1003_v60, %v1071_v4  ;;  %v1168_v43 = vmul.f32 %v1104_v61, %v1104_v61  ;;  %v1152_v51 = vmul.f32 %v1088_v58, %v1088_v58  ;;  %v1184_v34 = vmul.f32 %v1120_v50, %v1120_v50  ;;  %v3440_v58 = vld [vmem:[#allocation42_spill] sm:$0xff] }
 0x14d   : > { %v1200_v63 = vmul.f32 %v1136_v11, %v1136_v11  ;;  %v1167_v35 = vmul.f32 %v1103_v32, %v1103_v32  ;;  %v1151_v17 = vmul.f32 %v1087_v49, %v1087_v49  ;;  %v1183_v15 = vmul.f32 %v1119_v5, %v1119_v5  ;;  %v3447_v32 = vld [vmem:[#allocation49_spill] sm:$0xff] }
 0x14e   : > { %v1199_v26 = vmul.f32 %v1135_v36, %v1135_v36  ;;  %1940 = vmatprep.subr.mxu0 %v1168_v43  ;;  %v1038_v13 = vmul.f32 %v3437_v59, %v2945_v8  ;;  %v1070_v46 = vmul.f32 %v3438_v53, %v2945_v8  ;;  %v1022_v22 = vmul.f32 %v3439_v12, %v2945_v8  ;;  %v3441_v36 = vld [vmem:[#allocation43_spill] sm:$0xff]  ;;  %v3442_v43 = vld [vmem:[#allocation44_spill] sm:$0xff] }
 0x14f   : > { %1975 = vmatprep.subr.mxu1 %v1200_v63  ;;  %1941 = vmatpush3.msra.mxu0 %v1152_v51  ;;  %v1054_v50 = vmul.f32 %v3440_v58, %v2945_v8  ;;  %v1037_v11 = vmul.f32 %v3441_v36, %v2945_v8  ;;  %v1069_v4 = vmul.f32 %v3442_v43, %v2945_v8  ;;  %v3448_v63 = vld [vmem:[#allocation50_spill] sm:$0xff] }
 0x150   : > { %1976 = vmatpush3.msra.mxu1 %v1184_v34  ;;  %1942 = vmatprep.subr.mxu0 %v1167_v35  ;;  %v1102_v5 = vsub.f32 %v2862_v40, %v1038_v13  ;;  %v1134_v23 = vsub.f32 %v2866_v33, %v1070_v46  ;;  %v1086_v41 = vsub.f32 %v2784_v28, %v1022_v22  ;;  %v3444_v33 = vld [vmem:[#allocation46_spill] sm:$0xff] }
 0x151   : > { %1977 = vmatprep.subr.mxu1 %v1199_v26  ;;  %1943 = vmatpush3.msra.mxu0 %v1151_v17  ;;  %v1118_v51 = vsub.f32 %v2850_v31, %v1054_v50  ;;  %v1101_v60 = vsub.f32 %v2870_v14, %v1037_v11  ;;  %v1133_v54 = vsub.f32 %v2874_v3, %v1069_v4  ;;  %v3445_v31 = vld [vmem:[#allocation47_spill] sm:$0xff]  ;;  %v3446_v3 = vld [vmem:[#allocation48_spill] sm:$0xff]  ;;  %v3451_v11 = vld [vmem:[#allocation53_spill] sm:$0xff] }
 0x152   : > { %1978 = vmatpush3.msra.mxu1 %v1183_v15  ;;  %v1166_v34 = vmul.f32 %v1102_v5, %v1102_v5  ;;  %v1198_v21 = vmul.f32 %v1134_v23, %v1134_v23  ;;  %v1150_v39 = vmul.f32 %v1086_v41, %v1086_v41  ;;  %v1021_v26 = vmul.f32 %v3443_v25, %v2945_v8  ;;  %v3450_v50 = vld [vmem:[#allocation52_spill] sm:$0xff]  ;;  %v3453_v41 = vld [vmem:[#allocation55_spill] sm:$0xff] }
 0x153   : > { %v1182_v38 = vmul.f32 %v1118_v51, %v1118_v51  ;;  %v1165_v40 = vmul.f32 %v1101_v60, %v1101_v60  ;;  %v1197_v55 = vmul.f32 %v1133_v54, %v1133_v54  ;;  %v1053_v28 = vmul.f32 %v3444_v33, %v2945_v8  ;;  %v3457_v33 = vld [vmem:[#allocation59_spill] sm:$0xff] }
 0x154   : > { %1944 = vmatprep.subr.mxu0 %v1166_v34  ;;  %1979 = vmatprep.subr.mxu1 %v1198_v21  ;;  %v1085_v17 = vsub.f32 %v2780_v52, %v1021_v26  ;;  %v1036_v14 = vmul.f32 %v3445_v31, %v2945_v8  ;;  %v1068_v29 = vmul.f32 %v3446_v3, %v2945_v8  ;;  %v3454_v34 = vld [vmem:[#allocation56_spill] sm:$0xff]  ;;  %v3455_v26 = vld [vmem:[#allocation57_spill] sm:$0xff] }
 0x155   : > { %1945 = vmatpush3.msra.mxu0 %v1150_v39  ;;  %1980 = vmatpush3.msra.mxu1 %v1182_v38  ;;  %v1117_v61 = vsub.f32 %v2846_v56, %v1053_v28  ;;  %v1020_v49 = vmul.f32 %v3447_v32, %v2945_v8  ;;  %v1052_v35 = vmul.f32 %v3448_v63, %v2945_v8  ;;  %v3449_v56 = vld [vmem:[#allocation51_spill] sm:$0xff]  ;;  %v3460_v63 = vld [vmem:[#allocation62_spill] sm:$0xff] }
 0x156   : > { %1946 = vmatprep.subr.mxu0 %v1165_v40  ;;  %1981 = vmatprep.subr.mxu1 %v1197_v55  ;;  %v1149_v15 = vmul.f32 %v1085_v17, %v1085_v17  ;;  %v1100_v52 = vsub.f32 %v2878_v27, %v1036_v14  ;;  %v1132_v59 = vsub.f32 %v2882_v18, %v1068_v29  ;;  %v3456_v40 = vld [vmem:[#allocation58_spill] sm:$0xff]  ;;  %v3459_v29 = vld [vmem:[#allocation61_spill] sm:$0xff] }
 0x157   : > { %v1181_v13 = vmul.f32 %v1117_v61, %v1117_v61  ;;  %v1084_v53 = vsub.f32 %v2776_v1, %v1020_v49  ;;  %v1116_v46 = vsub.f32 %v2842_v2, %v1052_v35  ;;  %v1035_v12 = vmul.f32 %v3449_v56, %v2945_v8  ;;  %v3452_v1 = vld [vmem:[#allocation54_spill] sm:$0xff]  ;;  %v3463_v56 = vld [vmem:[#allocation65_spill] sm:$0xff] }
 0x158   : > { %1947 = vmatpush3.msra.mxu0 %v1149_v15  ;;  %v1164_v22 = vmul.f32 %v1100_v52, %v1100_v52  ;;  %v1196_v58 = vmul.f32 %v1132_v59, %v1132_v59  ;;  %v1067_v36 = vmul.f32 %v3450_v50, %v2945_v8  ;;  %v1019_v43 = vmul.f32 %v3451_v11, %v2945_v8  ;;  %v3464_v50 = vld [vmem:[#allocation66_spill] sm:$0xff] }
 0x159   : > { %1982 = vmatpush3.msra.mxu1 %v1181_v13  ;;  %v1148_v27 = vmul.f32 %v1084_v53, %v1084_v53  ;;  %v1180_v18 = vmul.f32 %v1116_v46, %v1116_v46  ;;  %v1099_v4 = vsub.f32 %v2886_v10, %v1035_v12  ;;  %v1051_v2 = vmul.f32 %v3452_v1, %v2945_v8 }
 0x15a   : > { %1948 = vmatprep.subr.mxu0 %v1164_v22  ;;  %1983 = vmatprep.subr.mxu1 %v1196_v58  ;;  %v1131_v5 = vsub.f32 %v2890_v9, %v1067_v36  ;;  %v1083_v23 = vsub.f32 %v2772_v44, %v1019_v43  ;;  %v1034_v51 = vmul.f32 %v3453_v41, %v2945_v8 }
 0x15b   : > { %1949 = vmatpush3.msra.mxu0 %v1148_v27  ;;  %1984 = vmatpush3.msra.mxu1 %v1180_v18  ;;  %v1163_v60 = vmul.f32 %v1099_v4, %v1099_v4  ;;  %v1115_v54 = vsub.f32 %v2838_v45, %v1051_v2  ;;  %v1066_v10 = vmul.f32 %v3454_v34, %v2945_v8  ;;  %v3466_v4 = vld [vmem:[#allocation68_spill] sm:$0xff]  ;;  %v3470_v34 = vld [vmem:[#allocation71_spill] sm:$0xff] }
 0x15c   : > { %v1195_v21 = vmul.f32 %v1131_v5, %v1131_v5  ;;  %v1147_v39 = vmul.f32 %v1083_v23, %v1083_v23  ;;  %v1098_v25 = vsub.f32 %v2894_v37, %v1034_v51  ;;  %v1018_v9 = vmul.f32 %v3455_v26, %v2945_v8  ;;  %v3458_v37 = vld [vmem:[#allocation60_spill] sm:$0xff] }
 0x15d   : > { %1950 = vmatprep.subr.mxu0 %v1163_v60  ;;  %v1179_v44 = vmul.f32 %v1115_v54, %v1115_v54  ;;  %v1130_v38 = vsub.f32 %v2898_v19, %v1066_v10  ;;  %v1050_v55 = vmul.f32 %v3456_v40, %v2945_v8  ;;  %v1033_v45 = vmul.f32 %v3457_v33, %v2945_v8  ;;  %v3469_v54 = vld [vmem:[#allocation104_spill] sm:$0xff]  ;;  %v3475_v33 = vld [vmem:[#allocation74_spill] sm:$0xff] }
 0x15e   : > { %1985 = vmatprep.subr.mxu1 %v1195_v21  ;;  %1951 = vmatpush3.msra.mxu0 %v1147_v39  ;;  %v1162_v28 = vmul.f32 %v1098_v25, %v1098_v25  ;;  %v1082_v17 = vsub.f32 %v2768_v57, %v1018_v9  ;;  %v1065_v31 = vmul.f32 %v3458_v37, %v2945_v8  ;;  %v3461_v57 = vld [vmem:[#allocation63_spill] sm:$0xff]  ;;  %v3472_v26 = vld [vmem:[#allocation72_spill] sm:$0xff] }
 0x15f   : > { %1986 = vmatpush3.msra.mxu1 %v1179_v44  ;;  %v1194_v14 = vmul.f32 %v1130_v38, %v1130_v38  ;;  %v1114_v3 = vsub.f32 %v2834_v62, %v1050_v55  ;;  %v1097_v19 = vsub.f32 %v2902_v7, %v1033_v45  ;;  %v1017_v61 = vmul.f32 %v3459_v29, %v2945_v8  ;;  %v3462_v7 = vld [vmem:[#allocation64_spill] sm:$0xff]  ;;  %v3471_v39 = vld [vmem:[#allocation111_spill] sm:$0xff]  ;;  %v3474_v55 = vld [vmem:[#allocation5_spill] sm:$0xff] }
 0x160   : > { %1952 = vmatprep.subr.mxu0 %v1162_v28  ;;  %v1146_v32 = vmul.f32 %v1082_v17, %v1082_v17  ;;  %v1129_v49 = vsub.f32 %v2906_v16, %v1065_v31  ;;  %v1049_v35 = vmul.f32 %v3460_v63, %v2945_v8  ;;  %v1032_v15 = vmul.f32 %v3461_v57, %v2945_v8  ;;  %v3476_v17 = vld [vmem:[#allocation6_spill] sm:$0xff]  ;;  %v3477_v31 = vld [vmem:[#allocation103_spill] sm:$0xff] }
 0x161   : > { %1987 = vmatprep.subr.mxu1 %v1194_v14  ;;  %v1178_v52 = vmul.f32 %v1114_v3, %v1114_v3  ;;  %v1161_v59 = vmul.f32 %v1097_v19, %v1097_v19  ;;  %v1081_v62 = vsub.f32 %v2764_v42, %v1017_v61  ;;  %v1064_v13 = vmul.f32 %v3462_v7, %v2945_v8  ;;  %v3478_v3 = vld [vmem:[#allocation75_spill] sm:$0xff]  ;;  %v3479_v61 = vld [vmem:[#allocation110_spill] sm:$0xff] }
 0x162   : > { %1953 = vmatpush3.msra.mxu0 %v1146_v32  ;;  %v1193_v53 = vmul.f32 %v1129_v49, %v1129_v49  ;;  %v1113_v46 = vsub.f32 %v2830_v47, %v1049_v35  ;;  %v1096_v16 = vsub.f32 %v2910_v48, %v1032_v15  ;;  %v1016_v12 = vmul.f32 %v3463_v56, %v2945_v8  ;;  %v3465_v47 = vld [vmem:[#allocation67_spill] sm:$0xff]  ;;  %v3480_v49 = vld [vmem:[#allocation76_spill] sm:$0xff] }
 0x163   : > { %1988 = vmatpush3.msra.mxu1 %v1178_v52  ;;  %1954 = vmatprep.subr.mxu0 %v1161_v59  ;;  %v1145_v22 = vmul.f32 %v1081_v62, %v1081_v62  ;;  %v1128_v58 = vsub.f32 %v2914_v20, %v1064_v13  ;;  %v1048_v42 = vmul.f32 %v3464_v50, %v2945_v8  ;;  %v3467_v20 = vld [vmem:[#allocation69_spill] sm:$0xff]  ;;  %v3481_v15 = vld [vmem:[#allocation7_spill] sm:$0xff]  ;;  %v3483_v13 = vld [vmem:[#allocation8_spill] sm:$0xff] }
 0x164   : > { %1989 = vmatprep.subr.mxu1 %v1193_v53  ;;  %v1177_v36 = vmul.f32 %v1113_v46, %v1113_v46  ;;  %v1160_v11 = vmul.f32 %v1096_v16, %v1096_v16  ;;  %v1080_v43 = vsub.f32 %v2760_v24, %v1016_v12  ;;  %v1031_v27 = vmul.f32 %v3465_v47, %v2945_v8  ;;  %v3468_v24 = vld [vmem:[#allocation70_spill] sm:$0xff]  ;;  %v3482_v59 = vld [vmem:[#allocation77_spill] sm:$0xff]  ;;  %v3485_v56 = vld [vmem:[#allocation79_spill] sm:$0xff] }
 0x165   : > { %1955 = vmatpush3.msra.mxu0 %v1145_v22  ;;  %v1192_v48 = vmul.f32 %v1128_v58, %v1128_v58  ;;  %v1112_v18 = vsub.f32 %v2826_v0, %v1048_v42  ;;  %v1063_v1 = vmul.f32 %v3466_v4, %v2945_v8  ;;  %v1015_v2 = vmul.f32 %v3467_v20, %v2945_v8  ;;  %v3484_v46 = vld [vmem:[#allocation78_spill] sm:$0xff]  ;;  %v3487_v42 = vld [vmem:[#allocation80_spill] sm:$0xff] }
 0x166   : > { %1990 = vmatpush3.msra.mxu1 %v1177_v36  ;;  %1956 = vmatprep.subr.mxu0 %v1160_v11  ;;  %v1144_v5 = vmul.f32 %v1080_v43, %v1080_v43  ;;  %v1095_v23 = vsub.f32 %v2918_v30, %v1031_v27  ;;  %v1047_v41 = vmul.f32 %v3468_v24, %v2945_v8  ;;  %v3473_v30 = vld [vmem:[#allocation73_spill] sm:$0xff]  ;;  %v3486_v58 = vld [vmem:[#allocation102_spill] sm:$0xff]  ;;  %v3493_v24 = vld [vmem:[#allocation83_spill] sm:$0xff] }
 0x167   : > { %1991 = vmatprep.subr.mxu1 %v1192_v48  ;;  %v1176_v51 = vmul.f32 %v1112_v18, %v1112_v18  ;;  %v1127_v60 = vsub.f32 %v2922_v6, %v1063_v1  ;;  %v1079_v0 = vsub.f32 %v3469_v54, %v1015_v2  ;;  %v1030_v10 = vmul.f32 %v3470_v34, %v2945_v8  ;;  %v3488_v43 = vld [vmem:[#allocation109_spill] sm:$0xff]  ;;  %v3491_v20 = vld [vmem:[#allocation10_spill] sm:$0xff]  ;;  %v3495_v34 = vld [vmem:[#allocation84_spill] sm:$0xff] }
 0x168   : > { %1957 = vmatpush3.msra.mxu0 %v1144_v5  ;;  %v1159_v21 = vmul.f32 %v1095_v23, %v1095_v23  ;;  %v1111_v25 = vsub.f32 %v3471_v39, %v1047_v41  ;;  %v1062_v9 = vmul.f32 %v3472_v26, %v2945_v8  ;;  %v1014_v44 = vmul.f32 %v3473_v30, %v2945_v8  ;;  %v3489_v27 = vld [vmem:[#allocation9_spill] sm:$0xff]  ;;  %v3492_v5 = vld [vmem:[#allocation82_spill] sm:$0xff]  ;;  %v3496_v39 = vld [vmem:[#allocation108_spill] sm:$0xff] }
 0x169   : > { %1992 = vmatpush3.msra.mxu1 %v1176_v51  ;;  %v1191_v38 = vmul.f32 %v1127_v60, %v1127_v60  ;;  %v1143_v40 = vmul.f32 %v1079_v0, %v1079_v0  ;;  %v1094_v6 = vsub.f32 %v3474_v55, %v1030_v10  ;;  %v1046_v45 = vmul.f32 %v3475_v33, %v2945_v8  ;;  %v3490_v18 = vld [vmem:[#allocation81_spill] sm:$0xff]  ;;  %v3497_v26 = vld [vmem:[#allocation11_spill] sm:$0xff] }
 0x16a   : > { %1958 = vmatprep.subr.mxu0 %v1159_v21  ;;  %v1175_v28 = vmul.f32 %v1111_v25, %v1111_v25  ;;  %v1126_v37 = vsub.f32 %v3476_v17, %v1062_v9  ;;  %v1078_v14 = vsub.f32 %v3477_v31, %v1014_v44  ;;  %v1029_v19 = vmul.f32 %v3478_v3, %v2945_v8  ;;  %v3494_v54 = vld [vmem:[#allocation101_spill] sm:$0xff]  ;;  %v3501_v17 = vld [vmem:[#allocation100_spill] sm:$0xff]  ;;  %v3502_v31 = vld [vmem:[#allocation87_spill] sm:$0xff] }
 0x16b   : > { %1993 = vmatprep.subr.mxu1 %v1191_v38  ;;  %1959 = vmatpush3.msra.mxu0 %v1143_v40  ;;  %v1158_v29 = vmul.f32 %v1094_v6, %v1094_v6  ;;  %v1110_v32 = vsub.f32 %v3479_v61, %v1046_v45  ;;  %v1061_v63 = vmul.f32 %v3480_v49, %v2945_v8  ;;  %v3498_v30 = vld [vmem:[#allocation85_spill] sm:$0xff]  ;;  %v3499_v40 = vld [vmem:[#allocation12_spill] sm:$0xff]  ;;  %v3500_v6 = vld [vmem:[#allocation86_spill] sm:$0xff] }
 0x16c   : > { %1994 = vmatpush3.msra.mxu1 %v1175_v28  ;;  %v1190_v35 = vmul.f32 %v1126_v37, %v1126_v37  ;;  %v1142_v57 = vmul.f32 %v1078_v14, %v1078_v14  ;;  %v1093_v52 = vsub.f32 %v3481_v15, %v1029_v19  ;;  %v1013_v62 = vmul.f32 %v3482_v59, %v2945_v8  ;;  %v3503_v19 = vld [vmem:[#allocation107_spill] sm:$0xff]  ;;  %v3504_v61 = vld [vmem:[#allocation88_spill] sm:$0xff]  ;;  %v3505_v49 = vld [vmem:[#allocation89_spill] sm:$0xff] }
 0x16d   : > { %1960 = vmatprep.subr.mxu0 %v1158_v29  ;;  %v1174_v7 = vmul.f32 %v1110_v32, %v1110_v32  ;;  %v1125_v53 = vsub.f32 %v3483_v13, %v1061_v63  ;;  %v1045_v16 = vmul.f32 %v3484_v46, %v2945_v8  ;;  %v1028_v12 = vmul.f32 %v3485_v56, %v2945_v8 }
 0x16e   : > { %1995 = vmatprep.subr.mxu1 %v1190_v35  ;;  %1961 = vmatpush3.msra.mxu0 %v1142_v57  ;;  %v1157_v22 = vmul.f32 %v1093_v52, %v1093_v52  ;;  %v1077_v50 = vsub.f32 %v3486_v58, %v1013_v62  ;;  %v1060_v36 = vmul.f32 %v3487_v42, %v2945_v8  ;;  %v3506_v57 = vld [vmem:[#allocation13_spill] sm:$0xff]  ;;  %v3507_v52 = vld [vmem:[#allocation90_spill] sm:$0xff]  ;;  %v3508_v62 = vld [vmem:[#allocation95_spill] sm:$0xff] }
 0x16f   : > { %1996 = vmatpush3.msra.mxu1 %v1174_v7  ;;  %v1189_v11 = vmul.f32 %v1125_v53, %v1125_v53  ;;  %v1109_v47 = vsub.f32 %v3488_v43, %v1045_v16  ;;  %v1092_v48 = vsub.f32 %v3489_v27, %v1028_v12  ;;  %v1012_v4 = vmul.f32 %v3490_v18, %v2945_v8  ;;  %v3509_v53 = vld [vmem:[#allocation14_spill] sm:$0xff]  ;;  %v3510_v16 = vld [vmem:[#allocation99_spill] sm:$0xff]  ;;  %v3514_v43 = vld [vmem:[#allocation93_spill] sm:$0xff] }
 0x170   : > { %1962 = vmatprep.subr.mxu0 %v1157_v22  ;;  %v1141_v1 = vmul.f32 %v1077_v50, %v1077_v50  ;;  %v1124_v2 = vsub.f32 %v3491_v20, %v1060_v36  ;;  %v1044_v23 = vmul.f32 %v3492_v5, %v2945_v8  ;;  %v1027_v41 = vmul.f32 %v3493_v24, %v2945_v8  ;;  %v3511_v12 = vld [vmem:[#allocation91_spill] sm:$0xff]  ;;  %v3512_v50 = vld [vmem:[#allocation106_spill] sm:$0xff]  ;;  %v3513_v36 = vld [vmem:[#allocation92_spill] sm:$0xff] }
 0x171   : > { %1997 = vmatprep.subr.mxu1 %v1189_v11  ;;  %v1173_v51 = vmul.f32 %v1109_v47, %v1109_v47  ;;  %v1156_v60 = vmul.f32 %v1092_v48, %v1092_v48  ;;  %v1076_v0 = vsub.f32 %v3494_v54, %v1012_v4  ;;  %v1059_v10 = vmul.f32 %v3495_v34, %v2945_v8  ;;  %v3515_v18 = vld [vmem:[#allocation15_spill] sm:$0xff]  ;;  %v3517_v5 = vld [vmem:[#allocation16_spill] sm:$0xff]  ;;  %v3518_v24 = vld [vmem:[#allocation98_spill] sm:$0xff] }
 0x172   : > { %1963 = vmatpush3.msra.mxu0 %v1141_v1  ;;  %v1188_v21 = vmul.f32 %v1124_v2, %v1124_v2  ;;  %v1108_v25 = vsub.f32 %v3496_v39, %v1044_v23  ;;  %v1091_v9 = vsub.f32 %v3497_v26, %v1027_v41  ;;  %v1011_v44 = vmul.f32 %v3498_v30, %v2945_v8  ;;  %v3516_v1 = vld [vmem:[#allocation94_spill] sm:$0xff]  ;;  %v3521_v34 = vld [vmem:[#allocation96_spill] sm:$0xff] }
 0x173   : > { %1998 = vmatpush3.msra.mxu1 %v1173_v51  ;;  %1964 = vmatprep.subr.mxu0 %v1156_v60  ;;  %v1140_v38 = vmul.f32 %v1076_v0, %v1076_v0  ;;  %v1123_v55 = vsub.f32 %v3499_v40, %v1059_v10  ;;  %v1043_v33 = vmul.f32 %v3500_v6, %v2945_v8  ;;  %v1214_v7 = vsub.s32 2, %v3508_v62  ;;  %v3519_v60 = vld [vmem:[#allocation105_spill] sm:$0xff] }
 0x174   : > { %1999 = vmatprep.subr.mxu1 %v1188_v21  ;;  %v1172_v45 = vmul.f32 %v1108_v25, %v1108_v25  ;;  %v1155_v28 = vmul.f32 %v1091_v9, %v1091_v9  ;;  %v1075_v37 = vsub.f32 %v3501_v17, %v1011_v44  ;;  %v1026_v14 = vmul.f32 %v3502_v31, %v2945_v8  ;;  %v3520_v0 = vld [vmem:[#allocation97_spill] sm:$0xff] }
 0x175   : > { %1965 = vmatpush3.msra.mxu0 %v1140_v38  ;;  %v1187_v3 = vmul.f32 %v1123_v55, %v1123_v55  ;;  %v1107_v29 = vsub.f32 %v3503_v19, %v1043_v33  ;;  %v1058_v32 = vmul.f32 %v3504_v61, %v2945_v8  ;;  %v1010_v63 = vmul.f32 %v3505_v49, %v2945_v8 }
 0x176   : > { %2000 = vmatpush3.msra.mxu1 %v1172_v45  ;;  %1966 = vmatprep.subr.mxu0 %v1155_v28  ;;  %v1139_v35 = vmul.f32 %v1075_v37, %v1075_v37  ;;  %v1090_v15 = vsub.f32 %v3506_v57, %v1026_v14  ;;  %v1042_v59 = vmul.f32 %v3507_v52, %v2945_v8  ;;  %v2069_v26 = vmov 0.0  }
 0x177   : > { %2001 = vmatprep.subr.mxu1 %v1187_v3  ;;  %v1171_v13 = vmul.f32 %v1107_v29, %v1107_v29  ;;  %v1122_v46 = vsub.f32 %v3509_v53, %v1058_v32  ;;  %v1074_v56 = vsub.f32 %v3510_v16, %v1010_v63  ;;  %v1025_v22 = vmul.f32 %v3511_v12, %v2945_v8 }
 0x178   : > { %1967 = vmatpush3.msra.mxu0 %v1139_v35  ;;  %v1154_v58 = vmul.f32 %v1090_v15, %v1090_v15  ;;  %v1106_v42 = vsub.f32 %v3512_v50, %v1042_v59  ;;  %v1057_v11 = vmul.f32 %v3513_v36, %v2945_v8  ;;  %v1009_v47 = vmul.f32 %v3514_v43, %v2945_v8 }
 0x179   : > { %2002 = vmatpush3.msra.mxu1 %v1171_v13  ;;  %v1186_v27 = vmul.f32 %v1122_v46, %v1122_v46  ;;  %v1138_v48 = vmul.f32 %v1074_v56, %v1074_v56  ;;  %v1089_v4 = vsub.f32 %v3515_v18, %v1025_v22  ;;  %v1041_v20 = vmul.f32 %v3516_v1, %v2945_v8 }
 0x17a   : > { %1968 = vmatprep.subr.mxu0 %v1154_v58  ;;  %v1170_v2 = vmul.f32 %v1106_v42, %v1106_v42  ;;  %v1121_v23 = vsub.f32 %v3517_v5, %v1057_v11  ;;  %v1073_v41 = vsub.f32 %v3518_v24, %v1009_v47  ;;  %v1207_v10 = vrot.slane %v3521_v34, %v3520_v0 }
 0x17b   : > { %2003 = vmatprep.subr.mxu1 %v1186_v27  ;;  %1969 = vmatpush3.msra.mxu0 %v1138_v48  ;;  %v1153_v51 = vmul.f32 %v1089_v4, %v1089_v4  ;;  %v1105_v54 = vsub.f32 %v3519_v60, %v1041_v20  ;;  %v1215_v25 = vrot.slane %v3521_v34, %v1214_v7 }
 0x17c   : > { %2004 = vmatpush3.msra.mxu1 %v1170_v2  ;;  %v1185_v21 = vmul.f32 %v1121_v23, %v1121_v23  ;;  %v1137_v39 = vmul.f32 %v1073_v41, %v1073_v41  ;;  %254 = vst [vmem:[#allocation2] sm:$0x1] %v2069_v26 }
 0x17d   : > { %1970 = vmatprep.subr.mxu0 %v1153_v51  ;;  %v1169_v8 = vmul.f32 %v1105_v54, %v1105_v54 }
 0x17e   : > { %2005 = vmatprep.subr.mxu1 %v1185_v21  ;;  %1971 = vmatpush3.msra.mxu0 %v1137_v39 }
 0x17f   : > { %2006 = vmatpush3.msra.mxu1 %v1169_v8  ;;  %1289 = vmatmul.mubr.f32.vlgmr.msra.gmra.mxu0 %v1207_v10 }
 0x180   : > { %1359 = vmatmul.mubr.f32.vlgmr.msra.gmra.mxu1 %v1215_v25 }
 0x183   : > { %v1201_v6 = vld [vmem:[#allocation2] sm:$0x1] }
 0x23f   : > { %v1972_v9 = vpop.f32.mrf.mxu0 }
 0x240   : > { %v2007_v30 = vpop.f32.mrf.mxu1 }
 0x241   : > { %v1973_v44 = vpop.f32.mrf.mxu0 }
 0x242   : > { %v1974_v38 = vadd.f32 %v1973_v44, %v1972_v9  ;;  %v2008_v40 = vpop.f32.mrf.mxu1 }
 0x243   : > { %v2009_v55 = vadd.f32 %v2008_v40, %v2007_v30 }
 0x245   : > { %v1361_v33 = vadd.f32 %v2009_v55, %v1974_v38 }
 0x247   : > { %v1364_v45 = vadd.f32 %v1361_v33, %v1201_v6 }
 0x249   : > { %1365 = vst [vmem:[#allocation2] sm:$0x1] %v1364_v45 }
 0x250   : > { %v1369_v28 = vld [vmem:[#allocation2] sm:$0x1] }
 0x251   : > { %v1371_v17 = vsel %vm1370_vm4, %v1369_v28, 0.0 }
 0x252   : > { %1372 = vadd.xlane.f32.xlu0 %v1371_v17 }
 0x2db   : > { %v1373_v37 = vpop.xlane.xlu0 %1372 }
 0x2dc   : > { %v1374_v31 = vmul.f32 0.25, %v1373_v37 }
 0x2de   : > { %1376 = vst.msk [vmem:[%s249_s27] sm:$0x1] %vm1375_vm5, %v1374_v31 }
 0x2df PF: > { %s13_s14 = sadd.s32 1, %s2066_s14   ;;  %s3522_s12 = smov %s2062_s13 }
 0x2e0   : > { %p10_p5 = scmp.ge.s32.totalorder %s13_s14, 4   ;;  %s3523_s13 = smov %s3525_s15 }
 0x2e2   :  { %12 = sbr.rel (!%p10_p5) target bundleno = 2 (0x2), region = 73 }

// kernel: pnetlin_forward.9
= control target key start
LH: loop header
LB: loop body
LE: loop exit
PB: predicated region body
PF: predicated region fallthrough
CT: control target
= control target key end

     0   :  { %s2089_s12 = smov 0   ;;  %s2091_s13 = smov 0   ;;  %s3176_s0 = inlined_call_operand.vmem [shape: bf16[2,512,128], index: 0, kind: input, shape index: {}]   ;;  %s3177_s1 = inlined_call_operand.vmem [shape: bf16[2,512,128], index: 1, kind: input, shape index: {}]   ;;  %s3178_s2 = inlined_call_operand.vmem [shape: f32[1,512], index: 2, kind: input, shape index: {}]   ;;  %s3179_s3 = inlined_call_operand.vmem [shape: f32[2,1,1,1], index: 3, kind: output, shape index: {}]  }
   0x1   :  { %s2093_s14 = smov 0  }
   0x2 LB: > { %s32_s15 = sadd.s32 1, %s2061_s13  ;;  %p1472_p0 = scmp.ge.s32.totalorder %s2065_s14, 1  ;;  %s2065_s14 = sphi %s2093_s14, %s13_s14   ;;  %s2061_s13 = sphi %s2091_s13, %s3522_s13   ;;  %s2057_s12 = sphi %s2089_s12, %s3521_s12  }
   0x3   : > { %p34_p1 = scmp.ge.s32.totalorder %s32_s15, 2  ;;  %p186_p2 = scmp.lt.s32.totalorder %s2065_s14, 3 }
   0x5   : > { %s3524_s15 = smov (%p34_p1, %s32_s15), 0  ;;  %p187_p3 = pnand %p1472_p0, %p186_p2 }
   0x7   : > { %190 = sbr.rel (%p187_p3) target bundleno = 733 (0x2dd), region = 32 }
   0xc   : > { %p225_p4 = scmp.lt.s32.totalorder %s2057_s12, 1  ;;  %v3180_v0 = vmov 1.0   ;;  %vm1370_vm4 = vcmask 1040384   ;;  %vm1374_vm5 = vcmask 0  }
   0xd   : > { %639 = vmatprep.mubr.f32.mxu0 %v3180_v0  ;;  %709 = vmatprep.mubr.f32.mxu1 %v3180_v0 }
   0xe   : > { %s3526_s12 = smov (!%p225_p4, %s2057_s12), 1 }
   0xf   : > { %s1479_s16 = sshll.u32 %s3526_s12, 8  ;;  %s249_s27 = scalar_lea.vmem %s3179_s3, %s3526_s12 }
  0x10   : > { %s2115_s19 = scalar_lea.vmem %s3176_s0, %s1479_s16  ;;  %s2120_s22 = scalar_lea.vmem %s3177_s1, %s1479_s16 }
  0x11   : > { %v1751_v1 = vld [vmem:[%s2115_s19 + $0x78] sm:$0xff]   ;;  %v1750_v15 = vld [vmem:[%s2115_s19 + $0x70] sm:$0xff]   ;;  %v1749_v31 = vld [vmem:[%s2115_s19 + $0x68] sm:$0xff]  }
  0x12   : > { %v1767_v2 = vld [vmem:[%s2115_s19 + $0xf8] sm:$0xff]   ;;  %v2125_v4 = vunpack.c.l.bf16 %v1751_v1  ;;  %v2127_v5 = vunpack.c.h.bf16 %v1751_v1  ;;  %v1766_v16 = vld [vmem:[%s2115_s19 + $0xf0] sm:$0xff]   ;;  %v2174_v29 = vunpack.c.h.bf16 %v1750_v15  ;;  %v2183_v34 = vunpack.c.l.bf16 %v1750_v15  ;;  %v1765_v36 = vld [vmem:[%s2115_s19 + $0xe8] sm:$0xff]  }
  0x13   : > { %v1743_v3 = vld [vmem:[%s2115_s19 + $0x38] sm:$0xff]   ;;  %v2129_v6 = vunpack.c.l.bf16 %v1767_v2  ;;  %v2131_v7 = vunpack.c.h.bf16 %v1767_v2  ;;  %v1742_v21 = vld [vmem:[%s2115_s19 + $0x30] sm:$0xff]   ;;  %v2176_v30 = vunpack.c.h.bf16 %v1766_v16  ;;  %v2185_v35 = vunpack.c.l.bf16 %v1766_v16  ;;  %v1741_v41 = vld [vmem:[%s2115_s19 + $0x28] sm:$0xff]  }
  0x14   : > { %v2134_v8 = vld [vmem:[%s2120_s22 + $0x38] sm:$0xff]   ;;  %v2140_v11 = vunpack.c.l.bf16 %v1743_v3  ;;  %v2142_v12 = vunpack.c.h.bf16 %v1743_v3  ;;  %v542_v17 = vmul.f32 %v2127_v5, %v2127_v5  ;;  %v1758_v22 = vld [vmem:[%s2115_s19 + $0xb0] sm:$0xff]   ;;  %v541_v24 = vmul.f32 %v2125_v4, %v2125_v4  ;;  %3280 = vst [vmem:[#allocation5_spill] sm:$0xff] %v2174_v29  ;;  %3282 = vst [vmem:[#allocation7_spill] sm:$0xff] %v2183_v34 }
  0x15   : > { %v1759_v9 = vld [vmem:[%s2115_s19 + $0xb8] sm:$0xff]   ;;  %v2145_v13 = vunpack.c.h.bf16 %v2134_v8  ;;  %v574_v18 = vmul.f32 %v2131_v7, %v2131_v7  ;;  %v573_v25 = vmul.f32 %v2129_v6, %v2129_v6  ;;  %3281 = vst [vmem:[#allocation6_spill] sm:$0xff] %v2176_v30  ;;  %v2179_v32 = vunpack.c.h.bf16 %v1742_v21  ;;  %3283 = vst [vmem:[#allocation8_spill] sm:$0xff] %v2185_v35  ;;  %v1757_v42 = vld [vmem:[%s2115_s19 + $0xa8] sm:$0xff]  }
  0x16   : > { %v2138_v10 = vld [vmem:[%s2120_s22 + $0xb8] sm:$0xff]   ;;  %v2147_v14 = vunpack.c.l.bf16 %v1759_v9  ;;  %v2155_v19 = vunpack.c.h.bf16 %v1759_v9  ;;  %v526_v23 = vmul.f32 %v2142_v12, %v2142_v12  ;;  %v525_v26 = vmul.f32 %v2140_v11, %v2140_v11  ;;  %1799 = vmatprep.subr.mxu0 %v542_v17  ;;  %v1748_v51 = vld [vmem:[%s2115_s19 + $0x60] sm:$0xff]  }
  0x17   : > { %3278 = vst [vmem:[#allocation3_spill] sm:$0xff] %v2145_v13  ;;  %v2158_v20 = vunpack.c.h.bf16 %v2138_v10  ;;  %1834 = vmatprep.subr.mxu1 %v574_v18  ;;  %v2181_v33 = vunpack.c.h.bf16 %v1758_v22  ;;  %v540_v37 = vmul.f32 %v2174_v29, %v2174_v29  ;;  %v572_v38 = vmul.f32 %v2176_v30, %v2176_v30  ;;  %v1764_v56 = vld [vmem:[%s2115_s19 + $0xe0] sm:$0xff]   ;;  %v1747_v18 = vld [vmem:[%s2115_s19 + $0x58] sm:$0xff]  }
  0x18   : > { %v558_v27 = vmul.f32 %v2155_v19, %v2155_v19  ;;  %v557_v28 = vmul.f32 %v2147_v14, %v2147_v14  ;;  %1800 = vmatpush3.msra.mxu0 %v526_v23  ;;  %v2192_v39 = vunpack.c.l.bf16 %v1742_v21  ;;  %v2194_v40 = vunpack.c.l.bf16 %v1758_v22  ;;  %v1740_v61 = vld [vmem:[%s2115_s19 + $0x20] sm:$0xff]  }
  0x19   : > { %3279 = vst [vmem:[#allocation4_spill] sm:$0xff] %v2158_v20  ;;  %1801 = vmatprep.subr.mxu0 %v541_v24  ;;  %v524_v43 = vmul.f32 %v2179_v32, %v2179_v32  ;;  %v556_v44 = vmul.f32 %v2181_v33, %v2181_v33  ;;  %v539_v45 = vmul.f32 %v2183_v34, %v2183_v34  ;;  %v2204_v46 = vunpack.c.h.bf16 %v1749_v31  ;;  %v1756_v62 = vld [vmem:[%s2115_s19 + $0xa0] sm:$0xff]  }
  0x1a   : > { %1835 = vmatpush3.msra.mxu1 %v558_v27  ;;  %1802 = vmatpush3.msra.mxu0 %v525_v26  ;;  %v571_v47 = vmul.f32 %v2185_v35, %v2185_v35  ;;  %v523_v48 = vmul.f32 %v2192_v39, %v2192_v39  ;;  %v555_v49 = vmul.f32 %v2194_v40, %v2194_v40  ;;  %v2212_v50 = vunpack.c.h.bf16 %v1765_v36 }
  0x1b   : > { %1836 = vmatprep.subr.mxu1 %v573_v25  ;;  %3284 = vst [vmem:[#allocation9_spill] sm:$0xff] %v2204_v46  ;;  %1803 = vmatprep.subr.mxu0 %v540_v37  ;;  %v538_v52 = vmul.f32 %v2204_v46, %v2204_v46  ;;  %v2217_v53 = vunpack.c.h.bf16 %v1741_v41  ;;  %v2219_v54 = vunpack.c.h.bf16 %v1757_v42  ;;  %v2221_v55 = vunpack.c.l.bf16 %v1749_v31  ;;  %v1763_v25 = vld [vmem:[%s2115_s19 + $0xd8] sm:$0xff]  }
  0x1c   : > { %1837 = vmatpush3.msra.mxu1 %v557_v28  ;;  %3285 = vst [vmem:[#allocation10_spill] sm:$0xff] %v2212_v50  ;;  %1804 = vmatpush3.msra.mxu0 %v524_v43  ;;  %v570_v57 = vmul.f32 %v2212_v50, %v2212_v50  ;;  %v2226_v58 = vunpack.c.l.bf16 %v1765_v36  ;;  %v2228_v59 = vunpack.c.l.bf16 %v1741_v41  ;;  %v2230_v60 = vunpack.c.l.bf16 %v1757_v42  ;;  %v1739_v36 = vld [vmem:[%s2115_s19 + $0x18] sm:$0xff]   ;;  %v1789_v50 = vld [vmem:[%s2120_s22 + $0xb0] sm:$0xff]  }
  0x1d   : > { %1838 = vmatprep.subr.mxu1 %v572_v38  ;;  %3286 = vst [vmem:[#allocation11_spill] sm:$0xff] %v2221_v55  ;;  %1805 = vmatprep.subr.mxu0 %v539_v45  ;;  %v522_v63 = vmul.f32 %v2217_v53, %v2217_v53  ;;  %v554_v1 = vmul.f32 %v2219_v54, %v2219_v54  ;;  %v2240_v3 = vunpack.c.h.bf16 %v1748_v51  ;;  %v2248_v17 = vunpack.c.h.bf16 %v1764_v56  ;;  %v1755_v37 = vld [vmem:[%s2115_s19 + $0x98] sm:$0xff]  }
  0x1e   : > { %1839 = vmatpush3.msra.mxu1 %v556_v44  ;;  %3287 = vst [vmem:[#allocation12_spill] sm:$0xff] %v2226_v58  ;;  %1806 = vmatpush3.msra.mxu0 %v523_v48  ;;  %v537_v2 = vmul.f32 %v2221_v55, %v2221_v55  ;;  %v569_v9 = vmul.f32 %v2226_v58, %v2226_v58  ;;  %v2253_v22 = vunpack.c.h.bf16 %v1740_v61  ;;  %v2255_v23 = vunpack.c.h.bf16 %v1756_v62  ;;  %v1773_v55 = vld [vmem:[%s2120_s22 + $0x30] sm:$0xff]  }
  0x1f   : > { %1840 = vmatprep.subr.mxu1 %v571_v47  ;;  %3288 = vst [vmem:[#allocation13_spill] sm:$0xff] %v2240_v3  ;;  %1807 = vmatprep.subr.mxu0 %v538_v52  ;;  %v521_v15 = vmul.f32 %v2228_v59, %v2228_v59  ;;  %v553_v16 = vmul.f32 %v2230_v60, %v2230_v60  ;;  %3289 = vst [vmem:[#allocation14_spill] sm:$0xff] %v2248_v17  ;;  %v2257_v24 = vunpack.c.l.bf16 %v1748_v51 }
  0x20   : > { %1841 = vmatpush3.msra.mxu1 %v555_v49  ;;  %1808 = vmatpush3.msra.mxu0 %v522_v63  ;;  %v536_v21 = vmul.f32 %v2240_v3, %v2240_v3  ;;  %v568_v26 = vmul.f32 %v2248_v17, %v2248_v17  ;;  %v2262_v27 = vunpack.c.l.bf16 %v1764_v56  ;;  %v2264_v28 = vunpack.c.l.bf16 %v1740_v61  ;;  %v1746_v49 = vld [vmem:[%s2115_s19 + $0x50] sm:$0xff]  }
  0x21   : > { %1842 = vmatprep.subr.mxu1 %v570_v57  ;;  %3290 = vst [vmem:[#allocation15_spill] sm:$0xff] %v2257_v24  ;;  %1809 = vmatprep.subr.mxu0 %v537_v2  ;;  %v2266_v31 = vunpack.c.l.bf16 %v1756_v62  ;;  %v520_v38 = vmul.f32 %v2253_v22, %v2253_v22  ;;  %v552_v41 = vmul.f32 %v2255_v23, %v2255_v23  ;;  %v2276_v43 = vunpack.c.h.bf16 %v1747_v18  ;;  %v1762_v61 = vld [vmem:[%s2115_s19 + $0xd0] sm:$0xff]  }
  0x22   : > { %1843 = vmatpush3.msra.mxu1 %v554_v1  ;;  %3291 = vst [vmem:[#allocation16_spill] sm:$0xff] %v2262_v27  ;;  %1810 = vmatpush3.msra.mxu0 %v521_v15  ;;  %v535_v42 = vmul.f32 %v2257_v24, %v2257_v24  ;;  %v567_v44 = vmul.f32 %v2262_v27, %v2262_v27  ;;  %v2284_v48 = vunpack.c.h.bf16 %v1763_v25  ;;  %v2289_v52 = vunpack.c.h.bf16 %v1739_v36  ;;  %v1754_v15 = vld [vmem:[%s2115_s19 + $0x90] sm:$0xff]  }
  0x23   : > { %1844 = vmatprep.subr.mxu1 %v569_v9  ;;  %3292 = vst [vmem:[#allocation17_spill] sm:$0xff] %v2276_v43  ;;  %1811 = vmatprep.subr.mxu0 %v536_v21  ;;  %v519_v45 = vmul.f32 %v2264_v28, %v2264_v28  ;;  %v551_v47 = vmul.f32 %v2266_v31, %v2266_v31  ;;  %v2291_v56 = vunpack.c.h.bf16 %v1755_v37  ;;  %v2293_v57 = vunpack.c.l.bf16 %v1747_v18  ;;  %v1738_v9 = vld [vmem:[%s2115_s19 + $0x10] sm:$0xff]  }
  0x24   : > { %1845 = vmatpush3.msra.mxu1 %v553_v16  ;;  %3293 = vst [vmem:[#allocation18_spill] sm:$0xff] %v2284_v48  ;;  %1812 = vmatpush3.msra.mxu0 %v520_v38  ;;  %v534_v51 = vmul.f32 %v2276_v43, %v2276_v43  ;;  %v566_v62 = vmul.f32 %v2284_v48, %v2284_v48  ;;  %v2298_v63 = vunpack.c.l.bf16 %v1763_v25  ;;  %v2300_v1 = vunpack.c.l.bf16 %v1739_v36  ;;  %v1760_v48 = vld [vmem:[%s2115_s19 + $0xc0] sm:$0xff]  }
  0x25   : > { %1846 = vmatprep.subr.mxu1 %v568_v26  ;;  %3294 = vst [vmem:[#allocation19_spill] sm:$0xff] %v2293_v57  ;;  %1813 = vmatprep.subr.mxu0 %v535_v42  ;;  %v2302_v2 = vunpack.c.l.bf16 %v1755_v37  ;;  %v518_v16 = vmul.f32 %v2289_v52, %v2289_v52  ;;  %v550_v18 = vmul.f32 %v2291_v56, %v2291_v56  ;;  %v2312_v25 = vunpack.c.h.bf16 %v1746_v49 }
  0x26   : > { %1847 = vmatpush3.msra.mxu1 %v552_v41  ;;  %3295 = vst [vmem:[#allocation20_spill] sm:$0xff] %v2298_v63  ;;  %1814 = vmatpush3.msra.mxu0 %v519_v45  ;;  %v533_v21 = vmul.f32 %v2293_v57, %v2293_v57  ;;  %v565_v26 = vmul.f32 %v2298_v63, %v2298_v63  ;;  %v2320_v38 = vunpack.c.h.bf16 %v1762_v61  ;;  %v1745_v41 = vld [vmem:[%s2115_s19 + $0x48] sm:$0xff]   ;;  %v2327_v45 = vunpack.c.h.bf16 %v1754_v15 }
  0x27   : > { %1848 = vmatprep.subr.mxu1 %v567_v44  ;;  %3296 = vst [vmem:[#allocation21_spill] sm:$0xff] %v2312_v25  ;;  %1815 = vmatprep.subr.mxu0 %v534_v51  ;;  %v517_v36 = vmul.f32 %v2300_v1, %v2300_v1  ;;  %v549_v37 = vmul.f32 %v2302_v2, %v2302_v2  ;;  %v2325_v44 = vunpack.c.h.bf16 %v1738_v9  ;;  %v1761_v51 = vld [vmem:[%s2115_s19 + $0xc8] sm:$0xff]   ;;  %v2334_v63 = vunpack.c.l.bf16 %v1762_v61 }
  0x28   : > { %1849 = vmatpush3.msra.mxu1 %v551_v47  ;;  %3297 = vst [vmem:[#allocation22_spill] sm:$0xff] %v2320_v38  ;;  %1816 = vmatpush3.msra.mxu0 %v518_v16  ;;  %v532_v42 = vmul.f32 %v2312_v25, %v2312_v25  ;;  %v2329_v47 = vunpack.c.l.bf16 %v1746_v49  ;;  %v564_v0 = vmul.f32 %v2320_v38, %v2320_v38  ;;  %v2336_v57 = vunpack.c.l.bf16 %v1738_v9  ;;  %v1737_v16 = vld [vmem:[%s2115_s19 + $0x8] sm:$0xff]   ;;  %v1744_v38 = vld [vmem:[%s2115_s19 + $0x40] sm:$0xff]  }
  0x29   : > { %1850 = vmatprep.subr.mxu1 %v566_v62  ;;  %1817 = vmatprep.subr.mxu0 %v533_v21  ;;  %3299 = vst [vmem:[#allocation24_spill] sm:$0xff] %v2334_v63  ;;  %v2338_v62 = vunpack.c.l.bf16 %v1754_v15  ;;  %v1753_v25 = vld [vmem:[%s2115_s19 + $0x88] sm:$0xff]   ;;  %v516_v49 = vmul.f32 %v2325_v44, %v2325_v44  ;;  %v2348_v21 = vunpack.c.h.bf16 %v1745_v41  ;;  %v563_v9 = vmul.f32 %v2334_v63, %v2334_v63 }
  0x2a   : > { %3298 = vst [vmem:[#allocation23_spill] sm:$0xff] %v2329_v47  ;;  %1851 = vmatpush3.msra.mxu1 %v550_v18  ;;  %1818 = vmatpush3.msra.mxu0 %v517_v36  ;;  %v548_v18 = vmul.f32 %v2327_v45, %v2327_v45  ;;  %v531_v61 = vmul.f32 %v2329_v47, %v2329_v47  ;;  %v2356_v36 = vunpack.c.h.bf16 %v1761_v51  ;;  %v2363_v47 = vunpack.c.h.bf16 %v1753_v25 }
  0x2b   : > { %1852 = vmatprep.subr.mxu1 %v565_v26  ;;  %3300 = vst [vmem:[#allocation25_spill] sm:$0xff] %v2348_v21  ;;  %1819 = vmatprep.subr.mxu0 %v532_v42  ;;  %v515_v15 = vmul.f32 %v2336_v57, %v2336_v57  ;;  %v547_v26 = vmul.f32 %v2338_v62, %v2338_v62  ;;  %v2361_v42 = vunpack.c.h.bf16 %v1737_v16  ;;  %v2365_v63 = vunpack.c.l.bf16 %v1745_v41 }
  0x2c   : > { %1853 = vmatpush3.msra.mxu1 %v549_v37  ;;  %3301 = vst [vmem:[#allocation26_spill] sm:$0xff] %v2356_v36  ;;  %1820 = vmatpush3.msra.mxu0 %v516_v49  ;;  %v530_v37 = vmul.f32 %v2348_v21, %v2348_v21  ;;  %v562_v43 = vmul.f32 %v2356_v36, %v2356_v36  ;;  %v2370_v27 = vunpack.c.l.bf16 %v1761_v51  ;;  %v2372_v24 = vunpack.c.l.bf16 %v1737_v16  ;;  %v1482_v49 = vld [vmem:[%s2115_s19] sm:$0xff]   ;;  %v1782_v36 = vld [vmem:[%s2120_s22 + $0x78] sm:$0xff]  }
  0x2d   : > { %1854 = vmatprep.subr.mxu1 %v564_v0  ;;  %3302 = vst [vmem:[#allocation27_spill] sm:$0xff] %v2365_v63  ;;  %1821 = vmatprep.subr.mxu0 %v531_v61  ;;  %v2374_v0 = vunpack.c.l.bf16 %v1753_v25  ;;  %v1752_v21 = vld [vmem:[%s2115_s19 + $0x80] sm:$0xff]   ;;  %v514_v41 = vmul.f32 %v2361_v42, %v2361_v42  ;;  %v529_v51 = vmul.f32 %v2365_v63, %v2365_v63  ;;  %v2384_v61 = vunpack.c.h.bf16 %v1744_v38 }
  0x2e   : > { %1855 = vmatpush3.msra.mxu1 %v548_v18  ;;  %3303 = vst [vmem:[#allocation28_spill] sm:$0xff] %v2370_v27  ;;  %1822 = vmatpush3.msra.mxu0 %v515_v15  ;;  %v546_v18 = vmul.f32 %v2363_v47, %v2363_v47  ;;  %v561_v25 = vmul.f32 %v2370_v27, %v2370_v27  ;;  %v2392_v15 = vunpack.c.h.bf16 %v1760_v48  ;;  %v2397_v17 = vunpack.c.h.bf16 %v1482_v49  ;;  %v1798_v27 = vld [vmem:[%s2120_s22 + $0xf8] sm:$0xff]  }
  0x2f   : > { %1856 = vmatprep.subr.mxu1 %v563_v9  ;;  %3304 = vst [vmem:[#allocation29_spill] sm:$0xff] %v2384_v61  ;;  %1823 = vmatprep.subr.mxu0 %v530_v37  ;;  %v513_v16 = vmul.f32 %v2372_v24, %v2372_v24  ;;  %v545_v9 = vmul.f32 %v2374_v0, %v2374_v0  ;;  %v2401_v37 = vunpack.c.l.bf16 %v1744_v38  ;;  %v2406_v58 = vunpack.c.l.bf16 %v1760_v48 }
  0x30   : > { %1857 = vmatpush3.msra.mxu1 %v547_v26  ;;  %3305 = vst [vmem:[#allocation30_spill] sm:$0xff] %v2392_v15  ;;  %1824 = vmatpush3.msra.mxu0 %v514_v41  ;;  %v528_v63 = vmul.f32 %v2384_v61, %v2384_v61  ;;  %v2399_v26 = vunpack.c.h.bf16 %v1752_v21  ;;  %v560_v3 = vmul.f32 %v2392_v15, %v2392_v15  ;;  %v2410_v41 = vunpack.c.l.bf16 %v1752_v21  ;;  %v1797_v61 = vld [vmem:[%s2120_s22 + $0xf0] sm:$0xff]  }
  0x31   : > { %1858 = vmatprep.subr.mxu1 %v562_v43  ;;  %3306 = vst [vmem:[#allocation31_spill] sm:$0xff] %v2401_v37  ;;  %1825 = vmatprep.subr.mxu0 %v529_v51  ;;  %3307 = vst [vmem:[#allocation32_spill] sm:$0xff] %v2406_v58  ;;  %v2408_v43 = vunpack.c.l.bf16 %v1482_v49  ;;  %v512_v38 = vmul.f32 %v2397_v17, %v2397_v17  ;;  %v527_v51 = vmul.f32 %v2401_v37, %v2401_v37 }
  0x32   : > { %1859 = vmatpush3.msra.mxu1 %v546_v18  ;;  %1826 = vmatpush3.msra.mxu0 %v513_v16  ;;  %v544_v18 = vmul.f32 %v2399_v26, %v2399_v26  ;;  %v2418_v15 = vunpack.c.h.bf16 %v1782_v36  ;;  %v559_v48 = vmul.f32 %v2406_v58, %v2406_v58  ;;  %v543_v49 = vmul.f32 %v2410_v41, %v2410_v41  ;;  %v1781_v16 = vld [vmem:[%s2120_s22 + $0x70] sm:$0xff]  }
  0x33   : > { %1860 = vmatprep.subr.mxu1 %v561_v25  ;;  %1827 = vmatprep.subr.mxu0 %v528_v63  ;;  %v511_v21 = vmul.f32 %v2408_v43, %v2408_v43  ;;  %v2426_v25 = vunpack.c.h.bf16 %v1798_v27  ;;  %v730_v63 = vmul.f32 %v2145_v13, %v2145_v13  ;;  %v762_v58 = vmul.f32 %v2158_v20, %v2158_v20  ;;  %v1796_v20 = vld [vmem:[%s2120_s22 + $0xe8] sm:$0xff]  }
  0x34   : > { %3308 = vst [vmem:[#allocation33_spill] sm:$0xff] %v2418_v15  ;;  %1861 = vmatpush3.msra.mxu1 %v545_v9  ;;  %1828 = vmatpush3.msra.mxu0 %v512_v38  ;;  %v746_v9 = vmul.f32 %v2418_v15, %v2418_v15  ;;  %v2437_v37 = vunpack.c.l.bf16 %v1782_v36  ;;  %v2445_v38 = vunpack.c.l.bf16 %v2134_v8  ;;  %v2448_v15 = vunpack.c.l.bf16 %v2138_v10  ;;  %v1772_v13 = vld [vmem:[%s2120_s22 + $0x28] sm:$0xff]  }
  0x35   : > { %3309 = vst [vmem:[#allocation34_spill] sm:$0xff] %v2426_v25  ;;  %1862 = vmatprep.subr.mxu1 %v560_v3  ;;  %1829 = vmatprep.subr.mxu0 %v527_v51  ;;  %v778_v46 = vmul.f32 %v2426_v25, %v2426_v25  ;;  %v2442_v3 = vunpack.c.l.bf16 %v1798_v27  ;;  %v2454_v51 = vunpack.c.h.bf16 %v1797_v61  ;;  %v2456_v25 = vunpack.c.h.bf16 %v1773_v55 }
  0x36   : > { %3310 = vst [vmem:[#allocation35_spill] sm:$0xff] %v2437_v37  ;;  %1863 = vmatpush3.msra.mxu1 %v544_v18  ;;  %3312 = vst [vmem:[#allocation37_spill] sm:$0xff] %v2445_v38  ;;  %1830 = vmatpush3.msra.mxu0 %v511_v21  ;;  %v745_v36 = vmul.f32 %v2437_v37, %v2437_v37  ;;  %v2452_v18 = vunpack.c.h.bf16 %v1781_v16  ;;  %v3317_v27 = vmov 1.0   ;;  %v729_v10 = vmul.f32 %v2445_v38, %v2445_v38  ;;  %v1780_v37 = vld [vmem:[%s2120_s22 + $0x68] sm:$0xff]  }
  0x37   : > { %3311 = vst [vmem:[#allocation36_spill] sm:$0xff] %v2442_v3  ;;  %3313 = vst [vmem:[#allocation38_spill] sm:$0xff] %v2448_v15  ;;  %1864 = vmatprep.subr.mxu1 %v559_v48  ;;  %640 = vmatmul.mubr.f32.vlgmr.msra.gmra.mxu0 %v3317_v27  ;;  %v777_v8 = vmul.f32 %v2442_v3, %v2442_v3  ;;  %v761_v48 = vmul.f32 %v2448_v15, %v2448_v15  ;;  %v2465_v21 = vunpack.c.h.bf16 %v1789_v50  ;;  %v1788_v15 = vld [vmem:[%s2120_s22 + $0xa8] sm:$0xff]  }
  0x38   : > { %3314 = vst [vmem:[#allocation39_spill] sm:$0xff] %v2452_v18  ;;  %3315 = vst [vmem:[#allocation40_spill] sm:$0xff] %v2454_v51  ;;  %1865 = vmatpush3.msra.mxu1 %v543_v49  ;;  %1869 = vmatprep.subr.mxu0 %v746_v9  ;;  %v744_v49 = vmul.f32 %v2452_v18, %v2452_v18  ;;  %v776_v3 = vmul.f32 %v2454_v51, %v2454_v51  ;;  %v2477_v35 = vunpack.c.l.bf16 %v1781_v16  ;;  %v1787_v51 = vld [vmem:[%s2120_s22 + $0xa0] sm:$0xff]  }
  0x39   : > { %3316 = vst [vmem:[#allocation41_spill] sm:$0xff] %v2456_v25  ;;  %3318 = vst [vmem:[#allocation42_spill] sm:$0xff] %v2465_v21  ;;  %710 = vmatmul.mubr.f32.vlgmr.msra.gmra.mxu1 %v3317_v27  ;;  %v728_v38 = vmul.f32 %v2456_v25, %v2456_v25  ;;  %1904 = vmatprep.subr.mxu1 %v778_v46  ;;  %v760_v34 = vmul.f32 %v2465_v21, %v2465_v21  ;;  %v2482_v30 = vunpack.c.l.bf16 %v1797_v61  ;;  %v1771_v21 = vld [vmem:[%s2120_s22 + $0x20] sm:$0xff]  }
  0x3a   : > { %3319 = vst [vmem:[#allocation43_spill] sm:$0xff] %v2477_v35  ;;  %1870 = vmatpush3.msra.mxu0 %v730_v63  ;;  %v2484_v9 = vunpack.c.l.bf16 %v1773_v55  ;;  %v2486_v18 = vunpack.c.l.bf16 %v1789_v50  ;;  %1905 = vmatpush3.msra.mxu1 %v762_v58  ;;  %v743_v16 = vmul.f32 %v2477_v35, %v2477_v35  ;;  %v2490_v25 = vunpack.c.h.bf16 %v1780_v37  ;;  %v1795_v35 = vld [vmem:[%s2120_s22 + $0xe0] sm:$0xff]  }
  0x3b   : > { %3320 = vst [vmem:[#allocation44_spill] sm:$0xff] %v2482_v30  ;;  %1871 = vmatprep.subr.mxu0 %v745_v36  ;;  %v2492_v46 = vunpack.c.h.bf16 %v1796_v20  ;;  %v2494_v63 = vunpack.c.h.bf16 %v1772_v13  ;;  %1906 = vmatprep.subr.mxu1 %v777_v8  ;;  %v775_v55 = vmul.f32 %v2482_v30, %v2482_v30  ;;  %v2502_v61 = vunpack.c.h.bf16 %v1788_v15  ;;  %v1779_v36 = vld [vmem:[%s2120_s22 + $0x60] sm:$0xff]  }
  0x3c   : > { %3321 = vst [vmem:[#allocation45_spill] sm:$0xff] %v2484_v9  ;;  %3322 = vst [vmem:[#allocation46_spill] sm:$0xff] %v2486_v18  ;;  %1872 = vmatpush3.msra.mxu0 %v729_v10  ;;  %v727_v50 = vmul.f32 %v2484_v9, %v2484_v9  ;;  %v759_v58 = vmul.f32 %v2486_v18, %v2486_v18  ;;  %1907 = vmatpush3.msra.mxu1 %v761_v48  ;;  %v2513_v9 = vunpack.c.l.bf16 %v1780_v37 }
  0x3d   : > { %3323 = vst [vmem:[#allocation47_spill] sm:$0xff] %v2490_v25  ;;  %3324 = vst [vmem:[#allocation48_spill] sm:$0xff] %v2492_v46  ;;  %1873 = vmatprep.subr.mxu0 %v744_v49  ;;  %v742_v8 = vmul.f32 %v2490_v25, %v2490_v25  ;;  %v774_v10 = vmul.f32 %v2492_v46, %v2492_v46  ;;  %v726_v30 = vmul.f32 %v2494_v63, %v2494_v63  ;;  %v1786_v46 = vld [vmem:[%s2120_s22 + $0x98] sm:$0xff]  }
  0x3e   : > { %3325 = vst [vmem:[#allocation49_spill] sm:$0xff] %v2494_v63  ;;  %3326 = vst [vmem:[#allocation50_spill] sm:$0xff] %v2502_v61  ;;  %1908 = vmatprep.subr.mxu1 %v776_v3  ;;  %1874 = vmatpush3.msra.mxu0 %v728_v38  ;;  %v758_v18 = vmul.f32 %v2502_v61, %v2502_v61  ;;  %v2518_v48 = vunpack.c.l.bf16 %v1796_v20  ;;  %v2520_v49 = vunpack.c.l.bf16 %v1772_v13  ;;  %v2522_v25 = vunpack.c.l.bf16 %v1788_v15  ;;  %v1770_v61 = vld [vmem:[%s2120_s22 + $0x18] sm:$0xff]  }
  0x3f   : > { %3327 = vst [vmem:[#allocation51_spill] sm:$0xff] %v2513_v9  ;;  %1909 = vmatpush3.msra.mxu1 %v760_v34  ;;  %1875 = vmatprep.subr.mxu0 %v743_v16  ;;  %v741_v37 = vmul.f32 %v2513_v9, %v2513_v9  ;;  %v2526_v63 = vunpack.c.h.bf16 %v1779_v36  ;;  %v2528_v3 = vunpack.c.h.bf16 %v1795_v35  ;;  %v2530_v38 = vunpack.c.h.bf16 %v1771_v21  ;;  %v1778_v16 = vld [vmem:[%s2120_s22 + $0x58] sm:$0xff]  }
  0x40   : > { %3328 = vst [vmem:[#allocation52_spill] sm:$0xff] %v2518_v48  ;;  %3329 = vst [vmem:[#allocation53_spill] sm:$0xff] %v2520_v49  ;;  %1910 = vmatprep.subr.mxu1 %v775_v55  ;;  %1876 = vmatpush3.msra.mxu0 %v727_v50  ;;  %v773_v13 = vmul.f32 %v2518_v48, %v2518_v48  ;;  %v725_v20 = vmul.f32 %v2520_v49, %v2520_v49  ;;  %v2538_v15 = vunpack.c.h.bf16 %v1787_v51  ;;  %v1794_v9 = vld [vmem:[%s2120_s22 + $0xd8] sm:$0xff]  }
  0x41   : > { %3330 = vst [vmem:[#allocation54_spill] sm:$0xff] %v2522_v25  ;;  %3331 = vst [vmem:[#allocation55_spill] sm:$0xff] %v2526_v63  ;;  %v757_v34 = vmul.f32 %v2522_v25, %v2522_v25  ;;  %1911 = vmatpush3.msra.mxu1 %v759_v58  ;;  %1877 = vmatprep.subr.mxu0 %v742_v8  ;;  %v740_v55 = vmul.f32 %v2526_v63, %v2526_v63  ;;  %v2549_v49 = vunpack.c.l.bf16 %v1779_v36 }
  0x42   : > { %3332 = vst [vmem:[#allocation56_spill] sm:$0xff] %v2528_v3  ;;  %3333 = vst [vmem:[#allocation57_spill] sm:$0xff] %v2530_v38  ;;  %v772_v50 = vmul.f32 %v2528_v3, %v2528_v3  ;;  %v724_v48 = vmul.f32 %v2530_v38, %v2530_v38  ;;  %1912 = vmatprep.subr.mxu1 %v774_v10  ;;  %1878 = vmatpush3.msra.mxu0 %v726_v30  ;;  %v2554_v58 = vunpack.c.l.bf16 %v1795_v35  ;;  %v1785_v3 = vld [vmem:[%s2120_s22 + $0x90] sm:$0xff]  }
  0x43   : > { %3334 = vst [vmem:[#allocation58_spill] sm:$0xff] %v2538_v15  ;;  %3335 = vst [vmem:[#allocation59_spill] sm:$0xff] %v2549_v49  ;;  %v756_v25 = vmul.f32 %v2538_v15, %v2538_v15  ;;  %v2556_v8 = vunpack.c.l.bf16 %v1771_v21  ;;  %v2558_v63 = vunpack.c.l.bf16 %v1787_v51  ;;  %1913 = vmatpush3.msra.mxu1 %v758_v18  ;;  %1879 = vmatprep.subr.mxu0 %v741_v37  ;;  %v2562_v38 = vunpack.c.h.bf16 %v1778_v16  ;;  %v1777_v37 = vld [vmem:[%s2120_s22 + $0x50] sm:$0xff]  }
  0x44   : > { %3336 = vst [vmem:[#allocation60_spill] sm:$0xff] %v2554_v58  ;;  %v739_v36 = vmul.f32 %v2549_v49, %v2549_v49  ;;  %v2564_v30 = vunpack.c.h.bf16 %v1794_v9  ;;  %v2566_v10 = vunpack.c.h.bf16 %v1770_v61  ;;  %1914 = vmatprep.subr.mxu1 %v773_v13  ;;  %1880 = vmatpush3.msra.mxu0 %v725_v20  ;;  %v771_v35 = vmul.f32 %v2554_v58, %v2554_v58  ;;  %v1793_v49 = vld [vmem:[%s2120_s22 + $0xd0] sm:$0xff]  }
  0x45   : > { %3337 = vst [vmem:[#allocation61_spill] sm:$0xff] %v2556_v8  ;;  %3338 = vst [vmem:[#allocation62_spill] sm:$0xff] %v2558_v63  ;;  %v723_v51 = vmul.f32 %v2556_v8, %v2556_v8  ;;  %v755_v18 = vmul.f32 %v2558_v63, %v2558_v63  ;;  %v2574_v21 = vunpack.c.h.bf16 %v1786_v46  ;;  %v1769_v15 = vld [vmem:[%s2120_s22 + $0x10] sm:$0xff]   ;;  %1915 = vmatpush3.msra.mxu1 %v757_v34  ;;  %1881 = vmatprep.subr.mxu0 %v740_v55 }
  0x46   : > { %3339 = vst [vmem:[#allocation63_spill] sm:$0xff] %v2562_v38  ;;  %3340 = vst [vmem:[#allocation64_spill] sm:$0xff] %v2564_v30  ;;  %v738_v13 = vmul.f32 %v2562_v38, %v2562_v38  ;;  %v770_v20 = vmul.f32 %v2564_v30, %v2564_v30  ;;  %v722_v58 = vmul.f32 %v2566_v10, %v2566_v10  ;;  %v2585_v8 = vunpack.c.l.bf16 %v1778_v16  ;;  %v1784_v30 = vld [vmem:[%s2120_s22 + $0x88] sm:$0xff]  }
  0x47   : > { %3341 = vst [vmem:[#allocation65_spill] sm:$0xff] %v2566_v10  ;;  %3342 = vst [vmem:[#allocation66_spill] sm:$0xff] %v2574_v21  ;;  %1916 = vmatprep.subr.mxu1 %v772_v50  ;;  %1882 = vmatpush3.msra.mxu0 %v724_v48  ;;  %v754_v63 = vmul.f32 %v2574_v21, %v2574_v21  ;;  %v2590_v34 = vunpack.c.l.bf16 %v1794_v9  ;;  %v2592_v55 = vunpack.c.l.bf16 %v1770_v61  ;;  %v2594_v38 = vunpack.c.l.bf16 %v1786_v46  ;;  %v1768_v21 = vld [vmem:[%s2120_s22 + $0x8] sm:$0xff]  }
  0x48   : > { %3343 = vst [vmem:[#allocation67_spill] sm:$0xff] %v2585_v8  ;;  %1917 = vmatpush3.msra.mxu1 %v756_v25  ;;  %1883 = vmatprep.subr.mxu0 %v739_v36  ;;  %v737_v16 = vmul.f32 %v2585_v8, %v2585_v8  ;;  %v2598_v10 = vunpack.c.h.bf16 %v1777_v37  ;;  %v2600_v48 = vunpack.c.h.bf16 %v1793_v49  ;;  %v2602_v50 = vunpack.c.h.bf16 %v1769_v15  ;;  %v1776_v36 = vld [vmem:[%s2120_s22 + $0x48] sm:$0xff]  }
  0x49   : > { %3344 = vst [vmem:[#allocation68_spill] sm:$0xff] %v2590_v34  ;;  %3345 = vst [vmem:[#allocation69_spill] sm:$0xff] %v2592_v55  ;;  %1918 = vmatprep.subr.mxu1 %v771_v35  ;;  %1884 = vmatpush3.msra.mxu0 %v723_v51  ;;  %v769_v9 = vmul.f32 %v2590_v34, %v2590_v34  ;;  %v721_v46 = vmul.f32 %v2592_v55, %v2592_v55  ;;  %v2610_v61 = vunpack.c.h.bf16 %v1785_v3  ;;  %v1792_v8 = vld [vmem:[%s2120_s22 + $0xc8] sm:$0xff]  }
  0x4a   : > { %3346 = vst [vmem:[#allocation70_spill] sm:$0xff] %v2594_v38  ;;  %3347 = vst [vmem:[#allocation71_spill] sm:$0xff] %v2598_v10  ;;  %v753_v25 = vmul.f32 %v2594_v38, %v2594_v38  ;;  %1919 = vmatpush3.msra.mxu1 %v755_v18  ;;  %1885 = vmatprep.subr.mxu0 %v738_v13  ;;  %v736_v35 = vmul.f32 %v2598_v10, %v2598_v10  ;;  %v2621_v55 = vunpack.c.l.bf16 %v1777_v37 }
  0x4b   : > { %3348 = vst [vmem:[#allocation72_spill] sm:$0xff] %v2600_v48  ;;  %3349 = vst [vmem:[#allocation73_spill] sm:$0xff] %v2602_v50  ;;  %v768_v51 = vmul.f32 %v2600_v48, %v2600_v48  ;;  %v720_v34 = vmul.f32 %v2602_v50, %v2602_v50  ;;  %1920 = vmatprep.subr.mxu1 %v770_v20  ;;  %1886 = vmatpush3.msra.mxu0 %v722_v58  ;;  %v2626_v18 = vunpack.c.l.bf16 %v1793_v49  ;;  %v1783_v48 = vld [vmem:[%s2120_s22 + $0x80] sm:$0xff]  }
  0x4c   : > { %3350 = vst [vmem:[#allocation74_spill] sm:$0xff] %v2610_v61  ;;  %3351 = vst [vmem:[#allocation75_spill] sm:$0xff] %v2621_v55  ;;  %v752_v38 = vmul.f32 %v2610_v61, %v2610_v61  ;;  %v2628_v13 = vunpack.c.l.bf16 %v1769_v15  ;;  %v2630_v10 = vunpack.c.l.bf16 %v1785_v3  ;;  %1921 = vmatpush3.msra.mxu1 %v754_v63  ;;  %1887 = vmatprep.subr.mxu0 %v737_v16  ;;  %v2634_v50 = vunpack.c.h.bf16 %v1776_v36  ;;  %v1775_v16 = vld [vmem:[%s2120_s22 + $0x40] sm:$0xff]  }
  0x4d   : > { %3352 = vst [vmem:[#allocation76_spill] sm:$0xff] %v2626_v18  ;;  %v735_v37 = vmul.f32 %v2621_v55, %v2621_v55  ;;  %v2636_v58 = vunpack.c.h.bf16 %v1792_v8  ;;  %v2638_v20 = vunpack.c.h.bf16 %v1768_v21  ;;  %1922 = vmatprep.subr.mxu1 %v769_v9  ;;  %1888 = vmatpush3.msra.mxu0 %v721_v46  ;;  %v767_v49 = vmul.f32 %v2626_v18, %v2626_v18  ;;  %v1791_v55 = vld [vmem:[%s2120_s22 + $0xc0] sm:$0xff]  }
  0x4e   : > { %3353 = vst [vmem:[#allocation77_spill] sm:$0xff] %v2628_v13  ;;  %3354 = vst [vmem:[#allocation78_spill] sm:$0xff] %v2630_v10  ;;  %v719_v3 = vmul.f32 %v2628_v13, %v2628_v13  ;;  %v751_v63 = vmul.f32 %v2630_v10, %v2630_v10  ;;  %v2646_v15 = vunpack.c.h.bf16 %v1784_v30  ;;  %v1610_v61 = vld [vmem:[%s2120_s22] sm:$0xff]   ;;  %1923 = vmatpush3.msra.mxu1 %v753_v25  ;;  %1889 = vmatprep.subr.mxu0 %v736_v35 }
  0x4f   : > { %3355 = vst [vmem:[#allocation79_spill] sm:$0xff] %v2634_v50  ;;  %3356 = vst [vmem:[#allocation80_spill] sm:$0xff] %v2636_v58  ;;  %v734_v9 = vmul.f32 %v2634_v50, %v2634_v50  ;;  %v766_v46 = vmul.f32 %v2636_v58, %v2636_v58  ;;  %v718_v18 = vmul.f32 %v2638_v20, %v2638_v20  ;;  %v2657_v13 = vunpack.c.l.bf16 %v1776_v36 }
  0x50   : > { %3357 = vst [vmem:[#allocation81_spill] sm:$0xff] %v2638_v20  ;;  %3358 = vst [vmem:[#allocation82_spill] sm:$0xff] %v2646_v15  ;;  %1924 = vmatprep.subr.mxu1 %v768_v51  ;;  %1890 = vmatpush3.msra.mxu0 %v720_v34  ;;  %v750_v10 = vmul.f32 %v2646_v15, %v2646_v15  ;;  %v2662_v29 = vunpack.c.l.bf16 %v1792_v8  ;;  %v2664_v25 = vunpack.c.l.bf16 %v1768_v21  ;;  %v2666_v35 = vunpack.c.l.bf16 %v1784_v30  ;;  %v3426_v15 = vld [vmem:[#allocation32_spill] sm:$0xff] }
  0x51   : > { %3359 = vst [vmem:[#allocation83_spill] sm:$0xff] %v2657_v13  ;;  %1925 = vmatpush3.msra.mxu1 %v752_v38  ;;  %1891 = vmatprep.subr.mxu0 %v735_v37  ;;  %v733_v58 = vmul.f32 %v2657_v13, %v2657_v13  ;;  %v2670_v20 = vunpack.c.h.bf16 %v1775_v16  ;;  %v2672_v36 = vunpack.c.h.bf16 %v1791_v55  ;;  %v2674_v51 = vunpack.c.h.bf16 %v1610_v61 }
  0x52   : > { %3360 = vst [vmem:[#allocation84_spill] sm:$0xff] %v2662_v29  ;;  %3361 = vst [vmem:[#allocation85_spill] sm:$0xff] %v2664_v25  ;;  %1926 = vmatprep.subr.mxu1 %v767_v49  ;;  %1892 = vmatpush3.msra.mxu0 %v719_v3  ;;  %v765_v8 = vmul.f32 %v2662_v29, %v2662_v29  ;;  %v717_v30 = vmul.f32 %v2664_v25, %v2664_v25  ;;  %v2680_v21 = vunpack.c.h.bf16 %v1783_v48 }
  0x53   : > { %3362 = vst [vmem:[#allocation86_spill] sm:$0xff] %v2666_v35  ;;  %3363 = vst [vmem:[#allocation87_spill] sm:$0xff] %v2670_v20  ;;  %1927 = vmatpush3.msra.mxu1 %v751_v63  ;;  %1893 = vmatprep.subr.mxu0 %v734_v9  ;;  %v749_v38 = vmul.f32 %v2666_v35, %v2666_v35  ;;  %v732_v34 = vmul.f32 %v2670_v20, %v2670_v20  ;;  %v2688_v49 = vunpack.c.l.bf16 %v1775_v16  ;;  %v3414_v35 = vld [vmem:[#allocation26_spill] sm:$0xff] }
  0x54   : > { %3364 = vst [vmem:[#allocation88_spill] sm:$0xff] %v2672_v36  ;;  %3365 = vst [vmem:[#allocation89_spill] sm:$0xff] %v2674_v51  ;;  %v764_v37 = vmul.f32 %v2672_v36, %v2672_v36  ;;  %1928 = vmatprep.subr.mxu1 %v766_v46  ;;  %1894 = vmatpush3.msra.mxu0 %v718_v18  ;;  %v716_v3 = vmul.f32 %v2674_v51, %v2674_v51  ;;  %v2692_v25 = vunpack.c.l.bf16 %v1791_v55 }
  0x55   : > { %3366 = vst [vmem:[#allocation90_spill] sm:$0xff] %v2680_v21  ;;  %3367 = vst [vmem:[#allocation91_spill] sm:$0xff] %v2688_v49  ;;  %v2694_v63 = vunpack.c.l.bf16 %v1610_v61  ;;  %v2696_v9 = vunpack.c.l.bf16 %v1783_v48  ;;  %1929 = vmatpush3.msra.mxu1 %v750_v10  ;;  %1895 = vmatprep.subr.mxu0 %v733_v58  ;;  %v748_v20 = vmul.f32 %v2680_v21, %v2680_v21  ;;  %v937_v48 = vlaneseq }
  0x56   : > { %3368 = vst [vmem:[#allocation92_spill] sm:$0xff] %v2692_v25  ;;  %v731_v16 = vmul.f32 %v2688_v49, %v2688_v49  ;;  %1930 = vmatprep.subr.mxu1 %v765_v8  ;;  %1896 = vmatpush3.msra.mxu0 %v717_v30  ;;  %v763_v18 = vmul.f32 %v2692_v25, %v2692_v25 }
  0x57   : > { %3369 = vst [vmem:[#allocation93_spill] sm:$0xff] %v2694_v63  ;;  %3370 = vst [vmem:[#allocation94_spill] sm:$0xff] %v2696_v9  ;;  %v715_v55 = vmul.f32 %v2694_v63, %v2694_v63  ;;  %1931 = vmatpush3.msra.mxu1 %v749_v38  ;;  %1897 = vmatprep.subr.mxu0 %v732_v34  ;;  %v747_v10 = vmul.f32 %v2696_v9, %v2696_v9  ;;  %v2712_v8 = vshrl.u32 %v937_v48, 7  ;;  %v2717_v34 = vld [vmem:[%s3178_s2] sm:$0xf] }
  0x58   : > { %1932 = vmatprep.subr.mxu1 %v764_v37  ;;  %1898 = vmatpush3.msra.mxu0 %v716_v3  ;;  %3372 = vst [vmem:[#allocation96_spill] sm:$0xff] %v2717_v34 }
  0x59   : > { %1933 = vmatpush3.msra.mxu1 %v748_v20  ;;  %1899 = vmatprep.subr.mxu0 %v731_v16  ;;  %3371 = vst [vmem:[#allocation95_spill] sm:$0xff] %v2712_v8  ;;  %v1210_v37 = vsub.s32 1, %v2712_v8  ;;  %v1218_v3 = vsub.s32 3, %v2712_v8 }
  0x5a   : > { %1934 = vmatprep.subr.mxu1 %v763_v18  ;;  %1900 = vmatpush3.msra.mxu0 %v715_v55 }
  0x5b   : > { %843 = vmatprep.mubr.f32.mxu0 %v3317_v27  ;;  %1935 = vmatpush3.msra.mxu1 %v747_v10  ;;  %v1219_v18 = vrot.slane %v2717_v34, %v1218_v3 }
  0x5c   : > { %913 = vmatprep.mubr.f32.mxu1 %v3317_v27  ;;  %844 = vmatmul.mubr.f32.vlgmr.msra.gmra.mxu0 %v3317_v27 }
  0x5d   : > { %914 = vmatmul.mubr.f32.vlgmr.msra.gmra.mxu1 %v3317_v27  ;;  %v1211_v27 = vrot.slane %v2717_v34, %v1210_v37  ;;  %v3399_v34 = vld [vmem:[#allocation16_spill] sm:$0xff] }
  0x5e   : > { %1358 = vmatprep.mubr.f32.mxu1 %v1219_v18 }
  0x5f   : > { %1288 = vmatprep.mubr.f32.mxu0 %v1211_v27 }
  0xf7   : > { %v1831_v61 = vpop.f32.mrf.mxu0 }
  0xf9   : > { %v1866_v58 = vpop.f32.mrf.mxu1  ;;  %v1832_v46 = vpop.f32.mrf.mxu0 }
  0xfa   : > { %v1833_v30 = vadd.f32 %v1832_v46, %v1831_v61 }
  0xfb   : > { %v1867_v20 = vpop.f32.mrf.mxu1 }
  0xfc   : > { %v1868_v38 = vadd.f32 %v1867_v20, %v1866_v58 }
  0xfe   : > { %v712_v16 = vadd.f32 %v1868_v38, %v1833_v30  ;;  %v2724_v38 = vsub.s32 0, %v2712_v8  ;;  %v3404_v8 = vld [vmem:[#allocation21_spill] sm:$0xff] }
 0x100   : > { %2035 = vrsqrt.f32 %v712_v16  ;;  %vm921_vm0 = vcmp.eq.f32.partialorder %v712_v16, inf  ;;  %v924_v61 = vand.u32 2147483648, %v712_v16  ;;  %vm923_vm1 = vcmp.eq.f32.partialorder %v712_v16, 0.0  ;;  %3373 = vst [vmem:[#allocation97_spill] sm:$0xff] %v2724_v38 }
 0x10d   : > { %v2036_v55 = vpop.eup %2035 }
 0x10e   : > { %v920_v10 = vmul.f32 %v2036_v55, %v712_v16 }
 0x110   : > { %v922_v48 = vsel %vm921_vm0, %v712_v16, %v920_v10 }
 0x111   : > { %v925_v58 = vsel %vm923_vm1, %v924_v61, %v922_v48 }
 0x112   : > { %v926_v63 = vadd.f32 1e-10, %v925_v58 }
 0x114   : > { %2037 = vrcp.f32 %v926_v63 }
 0x11c   : > { %v1901_v46 = vpop.f32.mrf.mxu0 }
 0x11d   : > { %v1936_v20 = vpop.f32.mrf.mxu1 }
 0x11e   : > { %v1902_v9 = vpop.f32.mrf.mxu0 }
 0x11f   : > { %v1903_v25 = vadd.f32 %v1902_v9, %v1901_v46  ;;  %v1937_v49 = vpop.f32.mrf.mxu1 }
 0x120   : > { %v1938_v37 = vadd.f32 %v1937_v49, %v1936_v20  ;;  %v3388_v20 = vld [vmem:[#allocation5_spill] sm:$0xff] }
 0x121   : > { %v2038_v3 = vpop.eup %2037 }
 0x122   : > { %v916_v30 = vadd.f32 %v1938_v37, %v1903_v25  ;;  %v2727_v55 = vrot.slane %v2038_v3, %v2724_v38  ;;  %v3389_v37 = vld [vmem:[#allocation6_spill] sm:$0xff] }
 0x124   : > { %2039 = vrsqrt.f32 %v916_v30  ;;  %vm930_vm2 = vcmp.eq.f32.partialorder %v916_v30, inf  ;;  %v933_v16 = vand.u32 2147483648, %v916_v30  ;;  %vm932_vm3 = vcmp.eq.f32.partialorder %v916_v30, 0.0 }
 0x125   : > { %v2731_v25 = vmul.f32 %v2408_v43, %v2727_v55  ;;  %v2735_v49 = vmul.f32 %v2397_v17, %v2727_v55  ;;  %v2739_v63 = vmul.f32 %v2372_v24, %v2727_v55  ;;  %v2743_v61 = vmul.f32 %v2361_v42, %v2727_v55 }
 0x126   : > { %v2747_v58 = vmul.f32 %v2336_v57, %v2727_v55  ;;  %v2751_v43 = vmul.f32 %v2325_v44, %v2727_v55  ;;  %v2755_v17 = vmul.f32 %v2300_v1, %v2727_v55  ;;  %v2759_v24 = vmul.f32 %v2289_v52, %v2727_v55 }
 0x127   : > { %3374 = vst [vmem:[#allocation98_spill] sm:$0xff] %v2731_v25  ;;  %3375 = vst [vmem:[#allocation99_spill] sm:$0xff] %v2735_v49  ;;  %v2763_v42 = vmul.f32 %v2264_v28, %v2727_v55  ;;  %v2767_v57 = vmul.f32 %v2253_v22, %v2727_v55  ;;  %v2771_v44 = vmul.f32 %v2228_v59, %v2727_v55  ;;  %v3401_v25 = vld [vmem:[#allocation18_spill] sm:$0xff]  ;;  %v3403_v49 = vld [vmem:[#allocation20_spill] sm:$0xff] }
 0x128   : > { %3376 = vst [vmem:[#allocation100_spill] sm:$0xff] %v2739_v63  ;;  %3377 = vst [vmem:[#allocation101_spill] sm:$0xff] %v2743_v61  ;;  %v2775_v1 = vmul.f32 %v2217_v53, %v2727_v55  ;;  %v2779_v52 = vmul.f32 %v2192_v39, %v2727_v55  ;;  %v2783_v28 = vmul.f32 %v2179_v32, %v2727_v55 }
 0x129   : > { %3378 = vst [vmem:[#allocation102_spill] sm:$0xff] %v2747_v58  ;;  %3379 = vst [vmem:[#allocation103_spill] sm:$0xff] %v2751_v43  ;;  %v2787_v22 = vmul.f32 %v2140_v11, %v2727_v55  ;;  %v956_v59 = vmul.f32 %v2142_v12, %v2727_v55  ;;  %v971_v46 = vmul.f32 %v2125_v4, %v2727_v55 }
 0x12a   : > { %3380 = vst [vmem:[#allocation104_spill] sm:$0xff] %v2755_v17  ;;  %v972_v53 = vmul.f32 %v2127_v5, %v2727_v55  ;;  %v2797_v39 = vmul.f32 %v2410_v41, %v2727_v55  ;;  %v2801_v32 = vmul.f32 %v2399_v26, %v2727_v55  ;;  %v2805_v11 = vmul.f32 %v2374_v0, %v2727_v55 }
 0x12b   : > { %v2809_v12 = vmul.f32 %v2363_v47, %v2727_v55  ;;  %v2813_v4 = vmul.f32 %v2338_v62, %v2727_v55  ;;  %v2817_v5 = vmul.f32 %v2327_v45, %v2727_v55  ;;  %v2821_v26 = vmul.f32 %v2302_v2, %v2727_v55 }
 0x12c   : > { %3381 = vst [vmem:[#allocation105_spill] sm:$0xff] %v2797_v39  ;;  %3382 = vst [vmem:[#allocation106_spill] sm:$0xff] %v2801_v32  ;;  %v2825_v0 = vmul.f32 %v2291_v56, %v2727_v55  ;;  %v2829_v47 = vmul.f32 %v2266_v31, %v2727_v55  ;;  %v2833_v62 = vmul.f32 %v2255_v23, %v2727_v55  ;;  %v3400_v39 = vld [vmem:[#allocation17_spill] sm:$0xff]  ;;  %v3402_v32 = vld [vmem:[#allocation19_spill] sm:$0xff] }
 0x12d   : > { %3383 = vst [vmem:[#allocation107_spill] sm:$0xff] %v2805_v11  ;;  %3384 = vst [vmem:[#allocation108_spill] sm:$0xff] %v2809_v12  ;;  %v2837_v45 = vmul.f32 %v2230_v60, %v2727_v55  ;;  %v2841_v2 = vmul.f32 %v2219_v54, %v2727_v55  ;;  %v2845_v56 = vmul.f32 %v2194_v40, %v2727_v55 }
 0x12e   : > { %3385 = vst [vmem:[#allocation109_spill] sm:$0xff] %v2813_v4  ;;  %3386 = vst [vmem:[#allocation110_spill] sm:$0xff] %v2817_v5  ;;  %v2849_v31 = vmul.f32 %v2181_v33, %v2727_v55  ;;  %v987_v23 = vmul.f32 %v2147_v14, %v2727_v55  ;;  %v988_v41 = vmul.f32 %v2155_v19, %v2727_v55  ;;  %v3391_v19 = vld [vmem:[#allocation8_spill] sm:$0xff] }
 0x12f   : > { %3387 = vst [vmem:[#allocation111_spill] sm:$0xff] %v2821_v26  ;;  %v1003_v60 = vmul.f32 %v2129_v6, %v2727_v55  ;;  %v1004_v54 = vmul.f32 %v2131_v7, %v2727_v55  ;;  %v2861_v40 = vmul.f32 %v3388_v20, %v2727_v55  ;;  %v2865_v33 = vmul.f32 %v3389_v37, %v2727_v55  ;;  %v3392_v6 = vld [vmem:[#allocation9_spill] sm:$0xff]  ;;  %v3393_v7 = vld [vmem:[#allocation10_spill] sm:$0xff] }
 0x130   : > { %v2873_v3 = vmul.f32 %v3391_v19, %v2727_v55  ;;  %v3396_v20 = vld [vmem:[#allocation13_spill] sm:$0xff]  ;;  %v2948_v12 = vmul.f32 %v3414_v35, %v2727_v55 }
 0x131   : > { %v2040_v27 = vpop.eup %2039  ;;  %v2893_v37 = vmul.f32 %v3396_v20, %v2727_v55  ;;  %v2913_v20 = vmul.f32 %v3401_v25, %v2727_v55  ;;  %v3408_v25 = vld [vmem:[#allocation23_spill] sm:$0xff] }
 0x132   : > { %v929_v18 = vmul.f32 %v2040_v27, %v916_v30  ;;  %v2877_v27 = vmul.f32 %v3392_v6, %v2727_v55  ;;  %v3398_v6 = vld [vmem:[#allocation15_spill] sm:$0xff]  ;;  %v2933_v36 = vmul.f32 %v3408_v25, %v2727_v55  ;;  %3415 = vst [vmem:[#allocation10_spill] sm:$0xff] %v2948_v12  ;;  %v3418_v25 = vld [vmem:[#allocation28_spill] sm:$0xff] }
 0x133   : > { %v2956_v61 = vmul.f32 %v3418_v25, %v2727_v55 }
 0x134   : > { %v931_v10 = vsel %vm930_vm2, %v916_v30, %v929_v18  ;;  %v3390_v30 = vld [vmem:[#allocation7_spill] sm:$0xff]  ;;  %v2881_v18 = vmul.f32 %v3393_v7, %v2727_v55  ;;  %v2901_v7 = vmul.f32 %v3398_v6, %v2727_v55  ;;  %v2921_v6 = vmul.f32 %v3403_v49, %v2727_v55  ;;  %v3412_v49 = vld [vmem:[#allocation25_spill] sm:$0xff] }
 0x135   : > { %v934_v48 = vsel %vm932_vm3, %v933_v16, %v931_v10  ;;  %v2869_v14 = vmul.f32 %v3390_v30, %v2727_v55  ;;  %v3394_v16 = vld [vmem:[#allocation11_spill] sm:$0xff]  ;;  %v3397_v30 = vld [vmem:[#allocation14_spill] sm:$0xff]  ;;  %3409 = vst [vmem:[#allocation7_spill] sm:$0xff] %v2933_v36  ;;  %v2941_v63 = vmul.f32 %v3412_v49, %v2727_v55 }
 0x136   : > { %v935_v9 = vadd.f32 1e-10, %v934_v48  ;;  %v2885_v10 = vmul.f32 %v3394_v16, %v2727_v55  ;;  %v3395_v48 = vld [vmem:[#allocation12_spill] sm:$0xff]  ;;  %v2897_v19 = vmul.f32 %v3397_v30, %v2727_v55  ;;  %v2905_v16 = vmul.f32 %v3399_v34, %v2727_v55  ;;  %v3422_v49 = vld [vmem:[#allocation30_spill] sm:$0xff] }
 0x137   : > { %v2917_v30 = vmul.f32 %v3402_v32, %v2727_v55  ;;  %v2925_v34 = vmul.f32 %v3404_v8, %v2727_v55  ;;  %v3410_v32 = vld [vmem:[#allocation24_spill] sm:$0xff]  ;;  %3413 = vst [vmem:[#allocation9_spill] sm:$0xff] %v2941_v63  ;;  %3419 = vst [vmem:[#allocation12_spill] sm:$0xff] %v2956_v61  ;;  %v3432_v63 = vld [vmem:[#allocation35_spill] sm:$0xff] }
 0x138   : > { %2041 = vrcp.f32 %v935_v9  ;;  %v2889_v9 = vmul.f32 %v3395_v48, %v2727_v55  ;;  %v2909_v48 = vmul.f32 %v3400_v39, %v2727_v55  ;;  %v3406_v39 = vld [vmem:[#allocation22_spill] sm:$0xff]  ;;  %v2937_v11 = vmul.f32 %v3410_v32, %v2727_v55  ;;  %v3420_v32 = vld [vmem:[#allocation29_spill] sm:$0xff]  ;;  %v3429_v61 = vld [vmem:[#allocation4_spill] sm:$0xff] }
 0x139   : > { %3405 = vst [vmem:[#allocation5_spill] sm:$0xff] %v2925_v34  ;;  %v2929_v51 = vmul.f32 %v3406_v39, %v2727_v55  ;;  %v3416_v39 = vld [vmem:[#allocation27_spill] sm:$0xff]  ;;  %v2960_v13 = vmul.f32 %v3420_v32, %v2727_v55  ;;  %v3430_v32 = vld [vmem:[#allocation33_spill] sm:$0xff] }
 0x13a   : > { %3411 = vst [vmem:[#allocation8_spill] sm:$0xff] %v2937_v11  ;;  %v2952_v29 = vmul.f32 %v3416_v39, %v2727_v55  ;;  %v2972_v39 = vmul.f32 %v3426_v15, %v2727_v55  ;;  %v3434_v15 = vld [vmem:[#allocation37_spill] sm:$0xff] }
 0x13b   : > { %3407 = vst [vmem:[#allocation6_spill] sm:$0xff] %v2929_v51  ;;  %3421 = vst [vmem:[#allocation13_spill] sm:$0xff] %v2960_v13 }
 0x13c   : > { %3417 = vst [vmem:[#allocation11_spill] sm:$0xff] %v2952_v29  ;;  %3427 = vst [vmem:[#allocation16_spill] sm:$0xff] %v2972_v39  ;;  %v3428_v29 = vld [vmem:[#allocation3_spill] sm:$0xff] }
 0x145   : > { %v2042_v21 = vpop.eup %2041 }
 0x146   : > { %v2944_v8 = vrot.slane %v2042_v21, %v2724_v38  ;;  %v2964_v21 = vmul.f32 %v3422_v49, %v2727_v55  ;;  %v3424_v38 = vld [vmem:[#allocation31_spill] sm:$0xff]  ;;  %v3431_v49 = vld [vmem:[#allocation34_spill] sm:$0xff] }
 0x147   : > { %v2968_v35 = vmul.f32 %v3424_v38, %v2727_v55 }
 0x148   : > { %3423 = vst [vmem:[#allocation14_spill] sm:$0xff] %v2964_v21  ;;  %v1024_v25 = vmul.f32 %v3428_v29, %v2944_v8  ;;  %v1056_v12 = vmul.f32 %v3429_v61, %v2944_v8  ;;  %v1040_v13 = vmul.f32 %v3430_v32, %v2944_v8  ;;  %v1072_v21 = vmul.f32 %v3431_v49, %v2944_v8  ;;  %v3435_v29 = vld [vmem:[#allocation38_spill] sm:$0xff] }
 0x149   : > { %3425 = vst [vmem:[#allocation15_spill] sm:$0xff] %v2968_v35  ;;  %v1039_v38 = vmul.f32 %v3432_v63, %v2944_v8  ;;  %v3433_v35 = vld [vmem:[#allocation36_spill] sm:$0xff]  ;;  %v1023_v55 = vmul.f32 %v3434_v15, %v2944_v8  ;;  %v1055_v39 = vmul.f32 %v3435_v29, %v2944_v8 }
 0x14a   : > { %v1071_v4 = vmul.f32 %v3433_v35, %v2944_v8  ;;  %v1088_v58 = vsub.f32 %v956_v59, %v1024_v25  ;;  %v1104_v61 = vsub.f32 %v972_v53, %v1040_v13  ;;  %v1120_v50 = vsub.f32 %v988_v41, %v1056_v12  ;;  %v3436_v59 = vld [vmem:[#allocation39_spill] sm:$0xff]  ;;  %v3437_v53 = vld [vmem:[#allocation40_spill] sm:$0xff]  ;;  %v3438_v12 = vld [vmem:[#allocation41_spill] sm:$0xff] }
 0x14b   : > { %v1136_v11 = vsub.f32 %v1004_v54, %v1072_v21  ;;  %v1103_v32 = vsub.f32 %v971_v46, %v1039_v38  ;;  %v1087_v49 = vsub.f32 %v2787_v22, %v1023_v55  ;;  %v1119_v5 = vsub.f32 %v987_v23, %v1055_v39  ;;  %v3442_v25 = vld [vmem:[#allocation45_spill] sm:$0xff] }
 0x14c   : > { %v1135_v36 = vsub.f32 %v1003_v60, %v1071_v4  ;;  %v1168_v43 = vmul.f32 %v1104_v61, %v1104_v61  ;;  %v1152_v51 = vmul.f32 %v1088_v58, %v1088_v58  ;;  %v1184_v34 = vmul.f32 %v1120_v50, %v1120_v50  ;;  %v3439_v58 = vld [vmem:[#allocation42_spill] sm:$0xff] }
 0x14d   : > { %v1200_v63 = vmul.f32 %v1136_v11, %v1136_v11  ;;  %v1167_v35 = vmul.f32 %v1103_v32, %v1103_v32  ;;  %v1151_v17 = vmul.f32 %v1087_v49, %v1087_v49  ;;  %v1183_v15 = vmul.f32 %v1119_v5, %v1119_v5  ;;  %v3446_v32 = vld [vmem:[#allocation49_spill] sm:$0xff] }
 0x14e   : > { %v1199_v26 = vmul.f32 %v1135_v36, %v1135_v36  ;;  %1939 = vmatprep.subr.mxu0 %v1168_v43  ;;  %v1038_v13 = vmul.f32 %v3436_v59, %v2944_v8  ;;  %v1070_v46 = vmul.f32 %v3437_v53, %v2944_v8  ;;  %v1022_v22 = vmul.f32 %v3438_v12, %v2944_v8  ;;  %v3440_v36 = vld [vmem:[#allocation43_spill] sm:$0xff]  ;;  %v3441_v43 = vld [vmem:[#allocation44_spill] sm:$0xff] }
 0x14f   : > { %1974 = vmatprep.subr.mxu1 %v1200_v63  ;;  %1940 = vmatpush3.msra.mxu0 %v1152_v51  ;;  %v1054_v50 = vmul.f32 %v3439_v58, %v2944_v8  ;;  %v1037_v11 = vmul.f32 %v3440_v36, %v2944_v8  ;;  %v1069_v4 = vmul.f32 %v3441_v43, %v2944_v8  ;;  %v3447_v63 = vld [vmem:[#allocation50_spill] sm:$0xff] }
 0x150   : > { %1975 = vmatpush3.msra.mxu1 %v1184_v34  ;;  %1941 = vmatprep.subr.mxu0 %v1167_v35  ;;  %v1102_v5 = vsub.f32 %v2861_v40, %v1038_v13  ;;  %v1134_v23 = vsub.f32 %v2865_v33, %v1070_v46  ;;  %v1086_v41 = vsub.f32 %v2783_v28, %v1022_v22  ;;  %v3443_v33 = vld [vmem:[#allocation46_spill] sm:$0xff] }
 0x151   : > { %1976 = vmatprep.subr.mxu1 %v1199_v26  ;;  %1942 = vmatpush3.msra.mxu0 %v1151_v17  ;;  %v1118_v51 = vsub.f32 %v2849_v31, %v1054_v50  ;;  %v1101_v60 = vsub.f32 %v2869_v14, %v1037_v11  ;;  %v1133_v54 = vsub.f32 %v2873_v3, %v1069_v4  ;;  %v3444_v31 = vld [vmem:[#allocation47_spill] sm:$0xff]  ;;  %v3445_v3 = vld [vmem:[#allocation48_spill] sm:$0xff]  ;;  %v3450_v11 = vld [vmem:[#allocation53_spill] sm:$0xff] }
 0x152   : > { %1977 = vmatpush3.msra.mxu1 %v1183_v15  ;;  %v1166_v34 = vmul.f32 %v1102_v5, %v1102_v5  ;;  %v1198_v21 = vmul.f32 %v1134_v23, %v1134_v23  ;;  %v1150_v39 = vmul.f32 %v1086_v41, %v1086_v41  ;;  %v1021_v26 = vmul.f32 %v3442_v25, %v2944_v8  ;;  %v3449_v50 = vld [vmem:[#allocation52_spill] sm:$0xff]  ;;  %v3452_v41 = vld [vmem:[#allocation55_spill] sm:$0xff] }
 0x153   : > { %v1182_v38 = vmul.f32 %v1118_v51, %v1118_v51  ;;  %v1165_v40 = vmul.f32 %v1101_v60, %v1101_v60  ;;  %v1197_v55 = vmul.f32 %v1133_v54, %v1133_v54  ;;  %v1053_v28 = vmul.f32 %v3443_v33, %v2944_v8  ;;  %v3456_v33 = vld [vmem:[#allocation59_spill] sm:$0xff] }
 0x154   : > { %1943 = vmatprep.subr.mxu0 %v1166_v34  ;;  %1978 = vmatprep.subr.mxu1 %v1198_v21  ;;  %v1085_v17 = vsub.f32 %v2779_v52, %v1021_v26  ;;  %v1036_v14 = vmul.f32 %v3444_v31, %v2944_v8  ;;  %v1068_v29 = vmul.f32 %v3445_v3, %v2944_v8  ;;  %v3453_v34 = vld [vmem:[#allocation56_spill] sm:$0xff]  ;;  %v3454_v26 = vld [vmem:[#allocation57_spill] sm:$0xff] }
 0x155   : > { %1944 = vmatpush3.msra.mxu0 %v1150_v39  ;;  %1979 = vmatpush3.msra.mxu1 %v1182_v38  ;;  %v1117_v61 = vsub.f32 %v2845_v56, %v1053_v28  ;;  %v1020_v49 = vmul.f32 %v3446_v32, %v2944_v8  ;;  %v1052_v35 = vmul.f32 %v3447_v63, %v2944_v8  ;;  %v3448_v56 = vld [vmem:[#allocation51_spill] sm:$0xff]  ;;  %v3459_v63 = vld [vmem:[#allocation62_spill] sm:$0xff] }
 0x156   : > { %1945 = vmatprep.subr.mxu0 %v1165_v40  ;;  %1980 = vmatprep.subr.mxu1 %v1197_v55  ;;  %v1149_v15 = vmul.f32 %v1085_v17, %v1085_v17  ;;  %v1100_v52 = vsub.f32 %v2877_v27, %v1036_v14  ;;  %v1132_v59 = vsub.f32 %v2881_v18, %v1068_v29  ;;  %v3455_v40 = vld [vmem:[#allocation58_spill] sm:$0xff]  ;;  %v3458_v29 = vld [vmem:[#allocation61_spill] sm:$0xff] }
 0x157   : > { %v1181_v13 = vmul.f32 %v1117_v61, %v1117_v61  ;;  %v1084_v53 = vsub.f32 %v2775_v1, %v1020_v49  ;;  %v1116_v46 = vsub.f32 %v2841_v2, %v1052_v35  ;;  %v1035_v12 = vmul.f32 %v3448_v56, %v2944_v8  ;;  %v3451_v1 = vld [vmem:[#allocation54_spill] sm:$0xff]  ;;  %v3462_v56 = vld [vmem:[#allocation65_spill] sm:$0xff] }
 0x158   : > { %1946 = vmatpush3.msra.mxu0 %v1149_v15  ;;  %v1164_v22 = vmul.f32 %v1100_v52, %v1100_v52  ;;  %v1196_v58 = vmul.f32 %v1132_v59, %v1132_v59  ;;  %v1067_v36 = vmul.f32 %v3449_v50, %v2944_v8  ;;  %v1019_v43 = vmul.f32 %v3450_v11, %v2944_v8  ;;  %v3463_v50 = vld [vmem:[#allocation66_spill] sm:$0xff] }
 0x159   : > { %1981 = vmatpush3.msra.mxu1 %v1181_v13  ;;  %v1148_v27 = vmul.f32 %v1084_v53, %v1084_v53  ;;  %v1180_v18 = vmul.f32 %v1116_v46, %v1116_v46  ;;  %v1099_v4 = vsub.f32 %v2885_v10, %v1035_v12  ;;  %v1051_v2 = vmul.f32 %v3451_v1, %v2944_v8 }
 0x15a   : > { %1947 = vmatprep.subr.mxu0 %v1164_v22  ;;  %1982 = vmatprep.subr.mxu1 %v1196_v58  ;;  %v1131_v5 = vsub.f32 %v2889_v9, %v1067_v36  ;;  %v1083_v23 = vsub.f32 %v2771_v44, %v1019_v43  ;;  %v1034_v51 = vmul.f32 %v3452_v41, %v2944_v8 }
 0x15b   : > { %1948 = vmatpush3.msra.mxu0 %v1148_v27  ;;  %1983 = vmatpush3.msra.mxu1 %v1180_v18  ;;  %v1163_v60 = vmul.f32 %v1099_v4, %v1099_v4  ;;  %v1115_v54 = vsub.f32 %v2837_v45, %v1051_v2  ;;  %v1066_v10 = vmul.f32 %v3453_v34, %v2944_v8  ;;  %v3465_v4 = vld [vmem:[#allocation68_spill] sm:$0xff]  ;;  %v3469_v34 = vld [vmem:[#allocation71_spill] sm:$0xff] }
 0x15c   : > { %v1195_v21 = vmul.f32 %v1131_v5, %v1131_v5  ;;  %v1147_v39 = vmul.f32 %v1083_v23, %v1083_v23  ;;  %v1098_v25 = vsub.f32 %v2893_v37, %v1034_v51  ;;  %v1018_v9 = vmul.f32 %v3454_v26, %v2944_v8  ;;  %v3457_v37 = vld [vmem:[#allocation60_spill] sm:$0xff] }
 0x15d   : > { %1949 = vmatprep.subr.mxu0 %v1163_v60  ;;  %v1179_v44 = vmul.f32 %v1115_v54, %v1115_v54  ;;  %v1130_v38 = vsub.f32 %v2897_v19, %v1066_v10  ;;  %v1050_v55 = vmul.f32 %v3455_v40, %v2944_v8  ;;  %v1033_v45 = vmul.f32 %v3456_v33, %v2944_v8  ;;  %v3468_v54 = vld [vmem:[#allocation104_spill] sm:$0xff]  ;;  %v3474_v33 = vld [vmem:[#allocation74_spill] sm:$0xff] }
 0x15e   : > { %1984 = vmatprep.subr.mxu1 %v1195_v21  ;;  %1950 = vmatpush3.msra.mxu0 %v1147_v39  ;;  %v1162_v28 = vmul.f32 %v1098_v25, %v1098_v25  ;;  %v1082_v17 = vsub.f32 %v2767_v57, %v1018_v9  ;;  %v1065_v31 = vmul.f32 %v3457_v37, %v2944_v8  ;;  %v3460_v57 = vld [vmem:[#allocation63_spill] sm:$0xff]  ;;  %v3471_v26 = vld [vmem:[#allocation72_spill] sm:$0xff] }
 0x15f   : > { %1985 = vmatpush3.msra.mxu1 %v1179_v44  ;;  %v1194_v14 = vmul.f32 %v1130_v38, %v1130_v38  ;;  %v1114_v3 = vsub.f32 %v2833_v62, %v1050_v55  ;;  %v1097_v19 = vsub.f32 %v2901_v7, %v1033_v45  ;;  %v1017_v61 = vmul.f32 %v3458_v29, %v2944_v8  ;;  %v3461_v7 = vld [vmem:[#allocation64_spill] sm:$0xff]  ;;  %v3470_v39 = vld [vmem:[#allocation111_spill] sm:$0xff]  ;;  %v3473_v55 = vld [vmem:[#allocation5_spill] sm:$0xff] }
 0x160   : > { %1951 = vmatprep.subr.mxu0 %v1162_v28  ;;  %v1146_v32 = vmul.f32 %v1082_v17, %v1082_v17  ;;  %v1129_v49 = vsub.f32 %v2905_v16, %v1065_v31  ;;  %v1049_v35 = vmul.f32 %v3459_v63, %v2944_v8  ;;  %v1032_v15 = vmul.f32 %v3460_v57, %v2944_v8  ;;  %v3475_v17 = vld [vmem:[#allocation6_spill] sm:$0xff]  ;;  %v3476_v31 = vld [vmem:[#allocation103_spill] sm:$0xff] }
 0x161   : > { %1986 = vmatprep.subr.mxu1 %v1194_v14  ;;  %v1178_v52 = vmul.f32 %v1114_v3, %v1114_v3  ;;  %v1161_v59 = vmul.f32 %v1097_v19, %v1097_v19  ;;  %v1081_v62 = vsub.f32 %v2763_v42, %v1017_v61  ;;  %v1064_v13 = vmul.f32 %v3461_v7, %v2944_v8  ;;  %v3477_v3 = vld [vmem:[#allocation75_spill] sm:$0xff]  ;;  %v3478_v61 = vld [vmem:[#allocation110_spill] sm:$0xff] }
 0x162   : > { %1952 = vmatpush3.msra.mxu0 %v1146_v32  ;;  %v1193_v53 = vmul.f32 %v1129_v49, %v1129_v49  ;;  %v1113_v46 = vsub.f32 %v2829_v47, %v1049_v35  ;;  %v1096_v16 = vsub.f32 %v2909_v48, %v1032_v15  ;;  %v1016_v12 = vmul.f32 %v3462_v56, %v2944_v8  ;;  %v3464_v47 = vld [vmem:[#allocation67_spill] sm:$0xff]  ;;  %v3479_v49 = vld [vmem:[#allocation76_spill] sm:$0xff] }
 0x163   : > { %1987 = vmatpush3.msra.mxu1 %v1178_v52  ;;  %1953 = vmatprep.subr.mxu0 %v1161_v59  ;;  %v1145_v22 = vmul.f32 %v1081_v62, %v1081_v62  ;;  %v1128_v58 = vsub.f32 %v2913_v20, %v1064_v13  ;;  %v1048_v42 = vmul.f32 %v3463_v50, %v2944_v8  ;;  %v3466_v20 = vld [vmem:[#allocation69_spill] sm:$0xff]  ;;  %v3480_v15 = vld [vmem:[#allocation7_spill] sm:$0xff]  ;;  %v3482_v13 = vld [vmem:[#allocation8_spill] sm:$0xff] }
 0x164   : > { %1988 = vmatprep.subr.mxu1 %v1193_v53  ;;  %v1177_v36 = vmul.f32 %v1113_v46, %v1113_v46  ;;  %v1160_v11 = vmul.f32 %v1096_v16, %v1096_v16  ;;  %v1080_v43 = vsub.f32 %v2759_v24, %v1016_v12  ;;  %v1031_v27 = vmul.f32 %v3464_v47, %v2944_v8  ;;  %v3467_v24 = vld [vmem:[#allocation70_spill] sm:$0xff]  ;;  %v3481_v59 = vld [vmem:[#allocation77_spill] sm:$0xff]  ;;  %v3484_v56 = vld [vmem:[#allocation79_spill] sm:$0xff] }
 0x165   : > { %1954 = vmatpush3.msra.mxu0 %v1145_v22  ;;  %v1192_v48 = vmul.f32 %v1128_v58, %v1128_v58  ;;  %v1112_v18 = vsub.f32 %v2825_v0, %v1048_v42  ;;  %v1063_v1 = vmul.f32 %v3465_v4, %v2944_v8  ;;  %v1015_v2 = vmul.f32 %v3466_v20, %v2944_v8  ;;  %v3483_v46 = vld [vmem:[#allocation78_spill] sm:$0xff]  ;;  %v3486_v42 = vld [vmem:[#allocation80_spill] sm:$0xff] }
 0x166   : > { %1989 = vmatpush3.msra.mxu1 %v1177_v36  ;;  %1955 = vmatprep.subr.mxu0 %v1160_v11  ;;  %v1144_v5 = vmul.f32 %v1080_v43, %v1080_v43  ;;  %v1095_v23 = vsub.f32 %v2917_v30, %v1031_v27  ;;  %v1047_v41 = vmul.f32 %v3467_v24, %v2944_v8  ;;  %v3472_v30 = vld [vmem:[#allocation73_spill] sm:$0xff]  ;;  %v3485_v58 = vld [vmem:[#allocation102_spill] sm:$0xff]  ;;  %v3492_v24 = vld [vmem:[#allocation83_spill] sm:$0xff] }
 0x167   : > { %1990 = vmatprep.subr.mxu1 %v1192_v48  ;;  %v1176_v51 = vmul.f32 %v1112_v18, %v1112_v18  ;;  %v1127_v60 = vsub.f32 %v2921_v6, %v1063_v1  ;;  %v1079_v0 = vsub.f32 %v3468_v54, %v1015_v2  ;;  %v1030_v10 = vmul.f32 %v3469_v34, %v2944_v8  ;;  %v3487_v43 = vld [vmem:[#allocation109_spill] sm:$0xff]  ;;  %v3490_v20 = vld [vmem:[#allocation10_spill] sm:$0xff]  ;;  %v3494_v34 = vld [vmem:[#allocation84_spill] sm:$0xff] }
 0x168   : > { %1956 = vmatpush3.msra.mxu0 %v1144_v5  ;;  %v1159_v21 = vmul.f32 %v1095_v23, %v1095_v23  ;;  %v1111_v25 = vsub.f32 %v3470_v39, %v1047_v41  ;;  %v1062_v9 = vmul.f32 %v3471_v26, %v2944_v8  ;;  %v1014_v44 = vmul.f32 %v3472_v30, %v2944_v8  ;;  %v3488_v27 = vld [vmem:[#allocation9_spill] sm:$0xff]  ;;  %v3491_v5 = vld [vmem:[#allocation82_spill] sm:$0xff]  ;;  %v3495_v39 = vld [vmem:[#allocation108_spill] sm:$0xff] }
 0x169   : > { %1991 = vmatpush3.msra.mxu1 %v1176_v51  ;;  %v1191_v38 = vmul.f32 %v1127_v60, %v1127_v60  ;;  %v1143_v40 = vmul.f32 %v1079_v0, %v1079_v0  ;;  %v1094_v6 = vsub.f32 %v3473_v55, %v1030_v10  ;;  %v1046_v45 = vmul.f32 %v3474_v33, %v2944_v8  ;;  %v3489_v18 = vld [vmem:[#allocation81_spill] sm:$0xff]  ;;  %v3496_v26 = vld [vmem:[#allocation11_spill] sm:$0xff] }
 0x16a   : > { %1957 = vmatprep.subr.mxu0 %v1159_v21  ;;  %v1175_v28 = vmul.f32 %v1111_v25, %v1111_v25  ;;  %v1126_v37 = vsub.f32 %v3475_v17, %v1062_v9  ;;  %v1078_v14 = vsub.f32 %v3476_v31, %v1014_v44  ;;  %v1029_v19 = vmul.f32 %v3477_v3, %v2944_v8  ;;  %v3493_v54 = vld [vmem:[#allocation101_spill] sm:$0xff]  ;;  %v3500_v17 = vld [vmem:[#allocation100_spill] sm:$0xff]  ;;  %v3501_v31 = vld [vmem:[#allocation87_spill] sm:$0xff] }
 0x16b   : > { %1992 = vmatprep.subr.mxu1 %v1191_v38  ;;  %1958 = vmatpush3.msra.mxu0 %v1143_v40  ;;  %v1158_v29 = vmul.f32 %v1094_v6, %v1094_v6  ;;  %v1110_v32 = vsub.f32 %v3478_v61, %v1046_v45  ;;  %v1061_v63 = vmul.f32 %v3479_v49, %v2944_v8  ;;  %v3497_v30 = vld [vmem:[#allocation85_spill] sm:$0xff]  ;;  %v3498_v40 = vld [vmem:[#allocation12_spill] sm:$0xff]  ;;  %v3499_v6 = vld [vmem:[#allocation86_spill] sm:$0xff] }
 0x16c   : > { %1993 = vmatpush3.msra.mxu1 %v1175_v28  ;;  %v1190_v35 = vmul.f32 %v1126_v37, %v1126_v37  ;;  %v1142_v57 = vmul.f32 %v1078_v14, %v1078_v14  ;;  %v1093_v52 = vsub.f32 %v3480_v15, %v1029_v19  ;;  %v1013_v62 = vmul.f32 %v3481_v59, %v2944_v8  ;;  %v3502_v19 = vld [vmem:[#allocation107_spill] sm:$0xff]  ;;  %v3503_v61 = vld [vmem:[#allocation88_spill] sm:$0xff]  ;;  %v3504_v49 = vld [vmem:[#allocation89_spill] sm:$0xff] }
 0x16d   : > { %1959 = vmatprep.subr.mxu0 %v1158_v29  ;;  %v1174_v7 = vmul.f32 %v1110_v32, %v1110_v32  ;;  %v1125_v53 = vsub.f32 %v3482_v13, %v1061_v63  ;;  %v1045_v16 = vmul.f32 %v3483_v46, %v2944_v8  ;;  %v1028_v12 = vmul.f32 %v3484_v56, %v2944_v8 }
 0x16e   : > { %1994 = vmatprep.subr.mxu1 %v1190_v35  ;;  %1960 = vmatpush3.msra.mxu0 %v1142_v57  ;;  %v1157_v22 = vmul.f32 %v1093_v52, %v1093_v52  ;;  %v1077_v50 = vsub.f32 %v3485_v58, %v1013_v62  ;;  %v1060_v36 = vmul.f32 %v3486_v42, %v2944_v8  ;;  %v3505_v57 = vld [vmem:[#allocation13_spill] sm:$0xff]  ;;  %v3506_v52 = vld [vmem:[#allocation90_spill] sm:$0xff]  ;;  %v3507_v62 = vld [vmem:[#allocation95_spill] sm:$0xff] }
 0x16f   : > { %1995 = vmatpush3.msra.mxu1 %v1174_v7  ;;  %v1189_v11 = vmul.f32 %v1125_v53, %v1125_v53  ;;  %v1109_v47 = vsub.f32 %v3487_v43, %v1045_v16  ;;  %v1092_v48 = vsub.f32 %v3488_v27, %v1028_v12  ;;  %v1012_v4 = vmul.f32 %v3489_v18, %v2944_v8  ;;  %v3508_v53 = vld [vmem:[#allocation14_spill] sm:$0xff]  ;;  %v3509_v16 = vld [vmem:[#allocation99_spill] sm:$0xff]  ;;  %v3513_v43 = vld [vmem:[#allocation93_spill] sm:$0xff] }
 0x170   : > { %1961 = vmatprep.subr.mxu0 %v1157_v22  ;;  %v1141_v1 = vmul.f32 %v1077_v50, %v1077_v50  ;;  %v1124_v2 = vsub.f32 %v3490_v20, %v1060_v36  ;;  %v1044_v23 = vmul.f32 %v3491_v5, %v2944_v8  ;;  %v1027_v41 = vmul.f32 %v3492_v24, %v2944_v8  ;;  %v3510_v12 = vld [vmem:[#allocation91_spill] sm:$0xff]  ;;  %v3511_v50 = vld [vmem:[#allocation106_spill] sm:$0xff]  ;;  %v3512_v36 = vld [vmem:[#allocation92_spill] sm:$0xff] }
 0x171   : > { %1996 = vmatprep.subr.mxu1 %v1189_v11  ;;  %v1173_v51 = vmul.f32 %v1109_v47, %v1109_v47  ;;  %v1156_v60 = vmul.f32 %v1092_v48, %v1092_v48  ;;  %v1076_v0 = vsub.f32 %v3493_v54, %v1012_v4  ;;  %v1059_v10 = vmul.f32 %v3494_v34, %v2944_v8  ;;  %v3514_v18 = vld [vmem:[#allocation15_spill] sm:$0xff]  ;;  %v3516_v5 = vld [vmem:[#allocation16_spill] sm:$0xff]  ;;  %v3517_v24 = vld [vmem:[#allocation98_spill] sm:$0xff] }
 0x172   : > { %1962 = vmatpush3.msra.mxu0 %v1141_v1  ;;  %v1188_v21 = vmul.f32 %v1124_v2, %v1124_v2  ;;  %v1108_v25 = vsub.f32 %v3495_v39, %v1044_v23  ;;  %v1091_v9 = vsub.f32 %v3496_v26, %v1027_v41  ;;  %v1011_v44 = vmul.f32 %v3497_v30, %v2944_v8  ;;  %v3515_v1 = vld [vmem:[#allocation94_spill] sm:$0xff]  ;;  %v3520_v34 = vld [vmem:[#allocation96_spill] sm:$0xff] }
 0x173   : > { %1997 = vmatpush3.msra.mxu1 %v1173_v51  ;;  %1963 = vmatprep.subr.mxu0 %v1156_v60  ;;  %v1140_v38 = vmul.f32 %v1076_v0, %v1076_v0  ;;  %v1123_v55 = vsub.f32 %v3498_v40, %v1059_v10  ;;  %v1043_v33 = vmul.f32 %v3499_v6, %v2944_v8  ;;  %v1214_v7 = vsub.s32 2, %v3507_v62  ;;  %v3518_v60 = vld [vmem:[#allocation105_spill] sm:$0xff] }
 0x174   : > { %1998 = vmatprep.subr.mxu1 %v1188_v21  ;;  %v1172_v45 = vmul.f32 %v1108_v25, %v1108_v25  ;;  %v1155_v28 = vmul.f32 %v1091_v9, %v1091_v9  ;;  %v1075_v37 = vsub.f32 %v3500_v17, %v1011_v44  ;;  %v1026_v14 = vmul.f32 %v3501_v31, %v2944_v8  ;;  %v3519_v0 = vld [vmem:[#allocation97_spill] sm:$0xff] }
 0x175   : > { %1964 = vmatpush3.msra.mxu0 %v1140_v38  ;;  %v1187_v3 = vmul.f32 %v1123_v55, %v1123_v55  ;;  %v1107_v29 = vsub.f32 %v3502_v19, %v1043_v33  ;;  %v1058_v32 = vmul.f32 %v3503_v61, %v2944_v8  ;;  %v1010_v63 = vmul.f32 %v3504_v49, %v2944_v8 }
 0x176   : > { %1999 = vmatpush3.msra.mxu1 %v1172_v45  ;;  %1965 = vmatprep.subr.mxu0 %v1155_v28  ;;  %v1139_v35 = vmul.f32 %v1075_v37, %v1075_v37  ;;  %v1090_v15 = vsub.f32 %v3505_v57, %v1026_v14  ;;  %v1042_v59 = vmul.f32 %v3506_v52, %v2944_v8  ;;  %v2068_v26 = vmov 0.0  }
 0x177   : > { %2000 = vmatprep.subr.mxu1 %v1187_v3  ;;  %v1171_v13 = vmul.f32 %v1107_v29, %v1107_v29  ;;  %v1122_v46 = vsub.f32 %v3508_v53, %v1058_v32  ;;  %v1074_v56 = vsub.f32 %v3509_v16, %v1010_v63  ;;  %v1025_v22 = vmul.f32 %v3510_v12, %v2944_v8 }
 0x178   : > { %1966 = vmatpush3.msra.mxu0 %v1139_v35  ;;  %v1154_v58 = vmul.f32 %v1090_v15, %v1090_v15  ;;  %v1106_v42 = vsub.f32 %v3511_v50, %v1042_v59  ;;  %v1057_v11 = vmul.f32 %v3512_v36, %v2944_v8  ;;  %v1009_v47 = vmul.f32 %v3513_v43, %v2944_v8 }
 0x179   : > { %2001 = vmatpush3.msra.mxu1 %v1171_v13  ;;  %v1186_v27 = vmul.f32 %v1122_v46, %v1122_v46  ;;  %v1138_v48 = vmul.f32 %v1074_v56, %v1074_v56  ;;  %v1089_v4 = vsub.f32 %v3514_v18, %v1025_v22  ;;  %v1041_v20 = vmul.f32 %v3515_v1, %v2944_v8 }
 0x17a   : > { %1967 = vmatprep.subr.mxu0 %v1154_v58  ;;  %v1170_v2 = vmul.f32 %v1106_v42, %v1106_v42  ;;  %v1121_v23 = vsub.f32 %v3516_v5, %v1057_v11  ;;  %v1073_v41 = vsub.f32 %v3517_v24, %v1009_v47  ;;  %v1207_v10 = vrot.slane %v3520_v34, %v3519_v0 }
 0x17b   : > { %2002 = vmatprep.subr.mxu1 %v1186_v27  ;;  %1968 = vmatpush3.msra.mxu0 %v1138_v48  ;;  %v1153_v51 = vmul.f32 %v1089_v4, %v1089_v4  ;;  %v1105_v54 = vsub.f32 %v3518_v60, %v1041_v20  ;;  %v1215_v25 = vrot.slane %v3520_v34, %v1214_v7 }
 0x17c   : > { %2003 = vmatpush3.msra.mxu1 %v1170_v2  ;;  %v1185_v21 = vmul.f32 %v1121_v23, %v1121_v23  ;;  %v1137_v39 = vmul.f32 %v1073_v41, %v1073_v41  ;;  %254 = vst [vmem:[#allocation2] sm:$0x1] %v2068_v26 }
 0x17d   : > { %1969 = vmatprep.subr.mxu0 %v1153_v51  ;;  %v1169_v8 = vmul.f32 %v1105_v54, %v1105_v54 }
 0x17e   : > { %2004 = vmatprep.subr.mxu1 %v1185_v21  ;;  %1970 = vmatpush3.msra.mxu0 %v1137_v39 }
 0x17f   : > { %2005 = vmatpush3.msra.mxu1 %v1169_v8  ;;  %1289 = vmatmul.mubr.f32.vlgmr.msra.gmra.mxu0 %v1207_v10 }
 0x180   : > { %1359 = vmatmul.mubr.f32.vlgmr.msra.gmra.mxu1 %v1215_v25 }
 0x183   : > { %v1201_v6 = vld [vmem:[#allocation2] sm:$0x1] }
 0x23f   : > { %v1971_v9 = vpop.f32.mrf.mxu0 }
 0x240   : > { %v2006_v30 = vpop.f32.mrf.mxu1 }
 0x241   : > { %v1972_v44 = vpop.f32.mrf.mxu0 }
 0x242   : > { %v1973_v38 = vadd.f32 %v1972_v44, %v1971_v9  ;;  %v2007_v40 = vpop.f32.mrf.mxu1 }
 0x243   : > { %v2008_v55 = vadd.f32 %v2007_v40, %v2006_v30 }
 0x245   : > { %v1361_v33 = vadd.f32 %v2008_v55, %v1973_v38 }
 0x247   : > { %v1364_v45 = vadd.f32 %v1361_v33, %v1201_v6 }
 0x249   : > { %1365 = vst [vmem:[#allocation2] sm:$0x1] %v1364_v45 }
 0x250   : > { %v1369_v28 = vld [vmem:[#allocation2] sm:$0x1] }
 0x251   : > { %v1371_v17 = vsel %vm1370_vm4, %v1369_v28, 0.0 }
 0x252   : > { %1372 = vadd.xlane.f32.xlu0 %v1371_v17 }
 0x2db   : > { %v1373_v37 = vpop.xlane.xlu0 %1372 }
 0x2dc   : > { %1375 = vst.msk [vmem:[%s249_s27] sm:$0x1] %vm1374_vm5, %v1373_v37 }
 0x2dd PF: > { %s13_s14 = sadd.s32 1, %s2065_s14   ;;  %s3521_s12 = smov %s2061_s13 }
 0x2de   : > { %p10_p5 = scmp.ge.s32.totalorder %s13_s14, 4   ;;  %s3522_s13 = smov %s3524_s15 }
 0x2e0   :  { %12 = sbr.rel (!%p10_p5) target bundleno = 2 (0x2), region = 73 }

</bundles_post_ra>
